<compile_context>
chip_gen: v5e
topology: v5e:2x2
jax: 0.10.0
libtpu: 0.0.40
codegen_flags: <defaults>
</compile_context>

<pallas_src>
import functools

import jax
import jax.numpy as jnp
from jax.experimental import pallas as pl
from jax.experimental.pallas import tpu as pltpu

LN_EPS = 1e-5
LANE = 128


def _round_up(x, m):
    return ((x + m - 1) // m) * m


# ----------------------------------------------------------------------------
# Fused kernel: Linear -> ReLU -> LN -> Linear -> ReLU -> LN -> Linear
# ----------------------------------------------------------------------------
def _layernorm(h, gamma, beta):
    mean = jnp.mean(h, axis=-1, keepdims=True)
    cent = h - mean
    var = jnp.mean(cent * cent, axis=-1, keepdims=True)
    return cent * jax.lax.rsqrt(var + LN_EPS) * gamma + beta


def _fused_mlp_kernel(x_ref, w1_ref, w2_ref, w3_ref, vec_ref, o_ref):
    # bf16 operands for the MXU; f32 accumulation; f32 elementwise (v5e-safe).
    x = x_ref[...]
    if x.dtype != jnp.bfloat16:
        x = x.astype(jnp.bfloat16)

    vec = vec_ref[...]                          # (8, 128) packed small vectors (f32)
    h1 = w1_ref.shape[1]
    h2 = w2_ref.shape[1]
    c = w3_ref.shape[1]

    b1, g1, bt1 = vec[0:1, :h1], vec[1:2, :h1], vec[2:3, :h1]
    b2, g2, bt2 = vec[3:4, :h2], vec[4:5, :h2], vec[5:6, :h2]
    b3 = vec[6:7, :c]

    h = jnp.dot(x, w1_ref[...], preferred_element_type=jnp.float32) + b1
    h = jnp.maximum(h, 0.0)
    h = _layernorm(h, g1, bt1)

    h = jnp.dot(h.astype(jnp.bfloat16), w2_ref[...],
                preferred_element_type=jnp.float32) + b2
    h = jnp.maximum(h, 0.0)
    h = _layernorm(h, g2, bt2)

    out = jnp.dot(h.astype(jnp.bfloat16), w3_ref[...],
                  preferred_element_type=jnp.float32) + b3
    o_ref[...] = out.astype(o_ref.dtype)        # (TILE_M, num_classes) store


# ----------------------------------------------------------------------------
# Wrapper
# ----------------------------------------------------------------------------
def _pick_tile(n, tile_m):
    """Row tile: multiple of 16 (valid for bf16 & f32 x); >=2 grid blocks when there
    is enough work so v7x's 2 TensorCores both get a share of the row axis."""
    n16 = _round_up(max(n, 16), 16)
    tm = min(_round_up(tile_m, 16), n16)
    if (n16 // tm) < 2 and n16 >= 512:
        tm = _round_up(pl.cdiv(n16, 2), 16)
    return tm


@functools.partial(jax.jit, static_argnames=("tile_m",))
def mlp_forward(x, packed, *, tile_m=2048):
    """packed: dict with 'w1' (F,H) bf16, 'w2' (H,H) bf16, 'w3' (H,C) bf16, 'vecs' (8,128) f32."""
    # TODO(synk): training-mode dropout (stateful PRNG masking) not implemented;
    #             forward matches PyTorch model.eval() semantics.
    n, f_in = x.shape
    w1, w2, w3, vecs = packed["w1"], packed["w2"], packed["w3"], packed["vecs"]
    num_classes = w3.shape[1]

    tm = _pick_tile(n, tile_m)
    n_pad = _round_up(n, tm)
    if n_pad != n:
        x = jnp.pad(x, ((0, n_pad - n), (0, 0)))
    grid = (n_pad // tm,)

    out = pl.pallas_call(
        _fused_mlp_kernel,
        out_shape=jax.ShapeDtypeStruct((n_pad, num_classes), jnp.float32),
        grid_spec=pltpu.PrefetchScalarGridSpec(
            num_scalar_prefetch=0,
            grid=grid,
            in_specs=[
                pl.BlockSpec((tm, f_in), lambda i: (i, 0)),   # streamed rows of x
                pl.BlockSpec(w1.shape, lambda i: (0, 0)),     # VMEM-resident weights
                pl.BlockSpec(w2.shape, lambda i: (0, 0)),
                pl.BlockSpec(w3.shape, lambda i: (0, 0)),
                pl.BlockSpec(vecs.shape, lambda i: (0, 0)),   # packed b/gamma/beta
            ],
            out_specs=pl.BlockSpec((tm, num_classes), lambda i: (i, 0)),
        ),
        compiler_params=pltpu.CompilerParams(
            dimension_semantics=("parallel",)),
    )(x, w1, w2, w3, vecs)

    if n_pad != n:
        out = out[:n]
    return out


# ----------------------------------------------------------------------------
# Parameter construction (mimics nn.Linear default init; LN gamma=1, beta=0)
# ----------------------------------------------------------------------------
def init_params(key, in_channels, hidden_channels, out_channels, num_layers):
    dims = [in_channels] + [hidden_channels] * (num_layers - 1) + [out_channels]
    params = []
    for i in range(num_layers):
        key, kw, kb = jax.random.split(key, 3)
        fan_in, fan_out = dims[i], dims[i + 1]
        bound = 1.0 / (fan_in ** 0.5)
        w = jax.random.uniform(kw, (fan_in, fan_out), jnp.float32, -bound, bound)
        b = jax.random.uniform(kb, (1, fan_out), jnp.float32, -bound, bound)
        layer = {"w": w, "b": b}
        if i < num_layers - 1:
            layer["gamma"] = jnp.ones((1, fan_out), jnp.float32)
            layer["beta"] = jnp.zeros((1, fan_out), jnp.float32)
        params.append(layer)
    return params


def pack_params(params):
    """Pack the 3-layer MLP params for the fused kernel (bf16 MXU weights, f32 vectors)."""
    assert len(params) == 3, "fused kernel is specialized to All_num_layers=3"
    p1, p2, p3 = params
    h1 = p1["w"].shape[1]
    h2 = p2["w"].shape[1]
    c = p3["w"].shape[1]
    vecs = jnp.zeros((8, LANE), jnp.float32)
    vecs = vecs.at[0, :h1].set(p1["b"][0])
    vecs = vecs.at[1, :h1].set(p1["gamma"][0])
    vecs = vecs.at[2, :h1].set(p1["beta"][0])
    vecs = vecs.at[3, :h2].set(p2["b"][0])
    vecs = vecs.at[4, :h2].set(p2["gamma"][0])
    vecs = vecs.at[5, :h2].set(p2["beta"][0])
    vecs = vecs.at[6, :c].set(p3["b"][0])
    return {
        "w1": p1["w"].astype(jnp.bfloat16),
        "w2": p2["w"].astype(jnp.bfloat16),
        "w3": p3["w"].astype(jnp.bfloat16),
        "vecs": vecs,
    }


# ----------------------------------------------------------------------------
# Reference (pure JAX, f32 throughout)
# ----------------------------------------------------------------------------
def mlp_forward_ref(x, params):
    h = x.astype(jnp.float32)
    for p in params[:-1]:
        h = jnp.maximum(h @ p["w"] + p["b"], 0.0)
        mu = jnp.mean(h, axis=-1, keepdims=True)
        var = jnp.mean((h - mu) ** 2, axis=-1, keepdims=True)
        h = (h - mu) / jnp.sqrt(var + LN_EPS) * p["gamma"] + p["beta"]
    last = params[-1]
    return h @ last["w"] + last["b"]


if __name__ == "__main__":
    NUM_NODES = 1000        # not a multiple of the tile -> exercises row padding + 2-block grid
    NUM_FEATURES = 16
    MLP_HIDDEN = 32
    NUM_CLASSES = 4
    NUM_LAYERS = 3

    key = jax.random.PRNGKey(0)
    key, kx = jax.random.split(key)
    x = jax.random.normal(kx, (NUM_NODES, NUM_FEATURES), jnp.float32)

    params = init_params(key, NUM_FEATURES, MLP_HIDDEN, NUM_CLASSES, NUM_LAYERS)
    packed = pack_params(params)

    # f32-streamed input (bf16 MXU operands inside the kernel).
    out = mlp_forward(x, packed)
    out = jax.block_until_ready(out)
    ref = mlp_forward_ref(x, params)
    assert out.shape == (NUM_NODES, NUM_CLASSES), out.shape
    assert jnp.allclose(out, ref, atol=2e-2, rtol=2e-2), "mismatch vs reference (f32 stream)"

    # bf16-streamed input (halves HBM input bytes; f32 elementwise path unchanged).
    x_bf16 = x.astype(jnp.bfloat16)
    out_b = mlp_forward(x_bf16, packed)
    out_b = jax.block_until_ready(out_b)
    ref_b = mlp_forward_ref(x_bf16.astype(jnp.float32), params)
    assert jnp.allclose(out_b, ref_b, atol=2e-2, rtol=2e-2), "mismatch vs reference (bf16 stream)"

    print("KERNEL_OK")
</pallas_src>

<mosaic_0001>
module attributes {stable_mosaic.version = 11 : i64} {
  func.func @_fused_mlp_kernel(%arg0: i32, %arg1: memref<512x16xf32, #tpu.memory_space<vmem>>, %arg2: memref<16x32xbf16, #tpu.memory_space<vmem>>, %arg3: memref<32x32xbf16, #tpu.memory_space<vmem>>, %arg4: memref<32x4xbf16, #tpu.memory_space<vmem>>, %arg5: memref<8x128xf32, #tpu.memory_space<vmem>>, %arg6: memref<512x4xf32, #tpu.memory_space<vmem>>) attributes {dimension_semantics = [#tpu.dimension_semantics<parallel>], iteration_bounds = array<i64: 2>, scalar_prefetch = 0 : i64, scratch_operands = 0 : i64, tpu.core_type = #tpu.core_type<tc>, window_params = [{transform_indices = @transform_0, window_bounds = array<i64: 512, 16>}, {pipeline_mode = #tpu.pipeline_mode<synchronous>, transform_indices = @transform_1, window_bounds = array<i64: 16, 32>}, {pipeline_mode = #tpu.pipeline_mode<synchronous>, transform_indices = @transform_2, window_bounds = array<i64: 32, 32>}, {pipeline_mode = #tpu.pipeline_mode<synchronous>, transform_indices = @transform_3, window_bounds = array<i64: 32, 4>}, {pipeline_mode = #tpu.pipeline_mode<synchronous>, transform_indices = @transform_4, window_bounds = array<i64: 8, 128>}, {transform_indices = @transform_5, window_bounds = array<i64: 512, 4>}]} {
    %c0 = arith.constant 0 : index
    %c0_0 = arith.constant 0 : index
    %0 = vector.load %arg1[%c0, %c0_0] : memref<512x16xf32, #tpu.memory_space<vmem>>, vector<512x16xf32>
    %1 = arith.truncf %0 : vector<512x16xf32> to vector<512x16xbf16>
    %c0_1 = arith.constant 0 : index
    %c0_2 = arith.constant 0 : index
    %2 = vector.load %arg5[%c0_1, %c0_2] : memref<8x128xf32, #tpu.memory_space<vmem>>, vector<8x128xf32>
    %3 = vector.extract_strided_slice %2 {offsets = [0, 0], sizes = [1, 32], strides = [1, 1]} : vector<8x128xf32> to vector<1x32xf32>
    %4 = vector.extract_strided_slice %2 {offsets = [1, 0], sizes = [1, 32], strides = [1, 1]} : vector<8x128xf32> to vector<1x32xf32>
    %5 = vector.extract_strided_slice %2 {offsets = [2, 0], sizes = [1, 32], strides = [1, 1]} : vector<8x128xf32> to vector<1x32xf32>
    %6 = vector.extract_strided_slice %2 {offsets = [3, 0], sizes = [1, 32], strides = [1, 1]} : vector<8x128xf32> to vector<1x32xf32>
    %7 = vector.extract_strided_slice %2 {offsets = [4, 0], sizes = [1, 32], strides = [1, 1]} : vector<8x128xf32> to vector<1x32xf32>
    %8 = vector.extract_strided_slice %2 {offsets = [5, 0], sizes = [1, 32], strides = [1, 1]} : vector<8x128xf32> to vector<1x32xf32>
    %9 = vector.extract_strided_slice %2 {offsets = [6, 0], sizes = [1, 4], strides = [1, 1]} : vector<8x128xf32> to vector<1x4xf32>
    %c0_3 = arith.constant 0 : index
    %c0_4 = arith.constant 0 : index
    %10 = vector.load %arg2[%c0_3, %c0_4] : memref<16x32xbf16, #tpu.memory_space<vmem>>, vector<16x32xbf16>
    %cst = arith.constant dense<0.000000e+00> : vector<512x32xf32>
    %11 = tpu.matmul %1, %10, %cst {dimension_numbers = #tpu.dot_dimension_numbers<[1], [0], [0], [1], [0, 0, 1, 1], [], []>} : vector<512x16xbf16>, vector<16x32xbf16>, vector<512x32xf32> -> vector<512x32xf32>
    %12 = vector.broadcast %3 : vector<1x32xf32> to vector<512x32xf32>
    %13 = arith.addf %11, %12 : vector<512x32xf32>
    %cst_5 = arith.constant 0.000000e+00 : f32
    %14 = vector.broadcast %cst_5 : f32 to vector<512x32xf32>
    %15 = arith.maximumf %13, %14 : vector<512x32xf32>
    %cst_6 = arith.constant dense<0.000000e+00> : vector<512xf32>
    %16 = vector.multi_reduction <add>, %15, %cst_6 [1] : vector<512x32xf32> to vector<512xf32>
    %17 = vector.shape_cast %16 : vector<512xf32> to vector<512x1xf32>
    %cst_7 = arith.constant 3.200000e+01 : f32
    %18 = vector.broadcast %cst_7 : f32 to vector<512x1xf32>
    %19 = arith.divf %17, %18 : vector<512x1xf32>
    %20 = vector.broadcast %19 : vector<512x1xf32> to vector<512x32xf32>
    %21 = arith.subf %15, %20 : vector<512x32xf32>
    %22 = arith.mulf %21, %21 : vector<512x32xf32>
    %cst_8 = arith.constant dense<0.000000e+00> : vector<512xf32>
    %23 = vector.multi_reduction <add>, %22, %cst_8 [1] : vector<512x32xf32> to vector<512xf32>
    %24 = vector.shape_cast %23 : vector<512xf32> to vector<512x1xf32>
    %cst_9 = arith.constant 3.200000e+01 : f32
    %25 = vector.broadcast %cst_9 : f32 to vector<512x1xf32>
    %26 = arith.divf %24, %25 : vector<512x1xf32>
    %cst_10 = arith.constant 9.99999974E-6 : f32
    %27 = vector.broadcast %cst_10 : f32 to vector<512x1xf32>
    %28 = arith.addf %26, %27 : vector<512x1xf32>
    %29 = math.rsqrt %28 : vector<512x1xf32>
    %30 = vector.broadcast %29 : vector<512x1xf32> to vector<512x32xf32>
    %31 = arith.mulf %21, %30 : vector<512x32xf32>
    %32 = vector.broadcast %4 : vector<1x32xf32> to vector<512x32xf32>
    %33 = arith.mulf %31, %32 : vector<512x32xf32>
    %34 = vector.broadcast %5 : vector<1x32xf32> to vector<512x32xf32>
    %35 = arith.addf %33, %34 : vector<512x32xf32>
    %36 = arith.truncf %35 : vector<512x32xf32> to vector<512x32xbf16>
    %c0_11 = arith.constant 0 : index
    %c0_12 = arith.constant 0 : index
    %37 = vector.load %arg3[%c0_11, %c0_12] : memref<32x32xbf16, #tpu.memory_space<vmem>>, vector<32x32xbf16>
    %cst_13 = arith.constant dense<0.000000e+00> : vector<512x32xf32>
    %38 = tpu.matmul %36, %37, %cst_13 {dimension_numbers = #tpu.dot_dimension_numbers<[1], [0], [0], [1], [0, 0, 1, 1], [], []>} : vector<512x32xbf16>, vector<32x32xbf16>, vector<512x32xf32> -> vector<512x32xf32>
    %39 = vector.broadcast %6 : vector<1x32xf32> to vector<512x32xf32>
    %40 = arith.addf %38, %39 : vector<512x32xf32>
    %cst_14 = arith.constant 0.000000e+00 : f32
    %41 = vector.broadcast %cst_14 : f32 to vector<512x32xf32>
    %42 = arith.maximumf %40, %41 : vector<512x32xf32>
    %cst_15 = arith.constant dense<0.000000e+00> : vector<512xf32>
    %43 = vector.multi_reduction <add>, %42, %cst_15 [1] : vector<512x32xf32> to vector<512xf32>
    %44 = vector.shape_cast %43 : vector<512xf32> to vector<512x1xf32>
    %cst_16 = arith.constant 3.200000e+01 : f32
    %45 = vector.broadcast %cst_16 : f32 to vector<512x1xf32>
    %46 = arith.divf %44, %45 : vector<512x1xf32>
    %47 = vector.broadcast %46 : vector<512x1xf32> to vector<512x32xf32>
    %48 = arith.subf %42, %47 : vector<512x32xf32>
    %49 = arith.mulf %48, %48 : vector<512x32xf32>
    %cst_17 = arith.constant dense<0.000000e+00> : vector<512xf32>
    %50 = vector.multi_reduction <add>, %49, %cst_17 [1] : vector<512x32xf32> to vector<512xf32>
    %51 = vector.shape_cast %50 : vector<512xf32> to vector<512x1xf32>
    %cst_18 = arith.constant 3.200000e+01 : f32
    %52 = vector.broadcast %cst_18 : f32 to vector<512x1xf32>
    %53 = arith.divf %51, %52 : vector<512x1xf32>
    %cst_19 = arith.constant 9.99999974E-6 : f32
    %54 = vector.broadcast %cst_19 : f32 to vector<512x1xf32>
    %55 = arith.addf %53, %54 : vector<512x1xf32>
    %56 = math.rsqrt %55 : vector<512x1xf32>
    %57 = vector.broadcast %56 : vector<512x1xf32> to vector<512x32xf32>
    %58 = arith.mulf %48, %57 : vector<512x32xf32>
    %59 = vector.broadcast %7 : vector<1x32xf32> to vector<512x32xf32>
    %60 = arith.mulf %58, %59 : vector<512x32xf32>
    %61 = vector.broadcast %8 : vector<1x32xf32> to vector<512x32xf32>
    %62 = arith.addf %60, %61 : vector<512x32xf32>
    %63 = arith.truncf %62 : vector<512x32xf32> to vector<512x32xbf16>
    %c0_20 = arith.constant 0 : index
    %c0_21 = arith.constant 0 : index
    %64 = vector.load %arg4[%c0_20, %c0_21] : memref<32x4xbf16, #tpu.memory_space<vmem>>, vector<32x4xbf16>
    %cst_22 = arith.constant dense<0.000000e+00> : vector<512x4xf32>
    %65 = tpu.matmul %63, %64, %cst_22 {dimension_numbers = #tpu.dot_dimension_numbers<[1], [0], [0], [1], [0, 0, 1, 1], [], []>} : vector<512x32xbf16>, vector<32x4xbf16>, vector<512x4xf32> -> vector<512x4xf32>
    %66 = vector.broadcast %9 : vector<1x4xf32> to vector<512x4xf32>
    %67 = arith.addf %65, %66 : vector<512x4xf32>
    %c0_23 = arith.constant 0 : index
    %c0_24 = arith.constant 0 : index
    %68 = vector.load %arg6[%c0_23, %c0_24] : memref<512x4xf32, #tpu.memory_space<vmem>>, vector<512x4xf32>
    tpu.vector_store %arg6[%c0_23, %c0_24], %67 {strides = array<i32>} : memref<512x4xf32, #tpu.memory_space<vmem>>, vector<512x4xf32>,
    return
  }
  func.func @transform_0(%arg0: i32) -> (i32, i32) {
    %c0_i32 = arith.constant 0 : i32
    %c0_i32_0 = arith.constant 0 : i32
    return %arg0, %c0_i32 : i32, i32
  }
  func.func @transform_1(%arg0: i32) -> (i32, i32) {
    %c0_i32 = arith.constant 0 : i32
    %c0_i32_0 = arith.constant 0 : i32
    %c0_i32_1 = arith.constant 0 : i32
    return %c0_i32, %c0_i32_0 : i32, i32
  }
  func.func @transform_2(%arg0: i32) -> (i32, i32) {
    %c0_i32 = arith.constant 0 : i32
    %c0_i32_0 = arith.constant 0 : i32
    %c0_i32_1 = arith.constant 0 : i32
    return %c0_i32, %c0_i32_0 : i32, i32
  }
  func.func @transform_3(%arg0: i32) -> (i32, i32) {
    %c0_i32 = arith.constant 0 : i32
    %c0_i32_0 = arith.constant 0 : i32
    %c0_i32_1 = arith.constant 0 : i32
    return %c0_i32, %c0_i32_0 : i32, i32
  }
  func.func @transform_4(%arg0: i32) -> (i32, i32) {
    %c0_i32 = arith.constant 0 : i32
    %c0_i32_0 = arith.constant 0 : i32
    %c0_i32_1 = arith.constant 0 : i32
    return %c0_i32, %c0_i32_0 : i32, i32
  }
  func.func @transform_5(%arg0: i32) -> (i32, i32) {
    %c0_i32 = arith.constant 0 : i32
    %c0_i32_0 = arith.constant 0 : i32
    return %arg0, %c0_i32 : i32, i32
  }
}

</mosaic_0001>

<bundles_post_ra>
// kernel: mlp_forward.1
= control target key start
LH: loop header
LB: loop body
LE: loop exit
PB: predicated region body
PF: predicated region fallthrough
CT: control target
= control target key end

     0   :  { %s5008_s18 = smov 0   ;;  %s9381_s0 = inlined_call_operand.vmem [shape: f32[1024,16], index: 0, kind: input, shape index: {}]   ;;  %s9382_s1 = inlined_call_operand.vmem [shape: bf16[16,32], index: 1, kind: input, shape index: {}]   ;;  %s9383_s2 = inlined_call_operand.vmem [shape: bf16[32,32], index: 2, kind: input, shape index: {}]   ;;  %s9384_s3 = inlined_call_operand.vmem [shape: bf16[32,4], index: 3, kind: input, shape index: {}]   ;;  %s9385_s4 = inlined_call_operand.vmem [shape: f32[8,128], index: 4, kind: input, shape index: {}]   ;;  %s9386_s5 = inlined_call_operand.vmem [shape: f32[1024,4], index: 5, kind: output, shape index: {}]  }
   0x1 LB: > { %s4562_s19 = sadd.s32 4294967295, %s4975_s18   ;;  %p4566_p0 = scmp.ge.s32.totalorder %s4975_s18, 1  ;;  %s4975_s18 = sphi %s5008_s18, %s15_s18  }
   0x2   : > { %p188_p1 = scmp.lt.s32.totalorder %s4975_s18, 3 }
   0x4   : > { %p189_p2 = pnand %p4566_p0, %p188_p1 }
   0x6   : > { %192 = sbr.rel (%p189_p2) target bundleno = 1732 (0x6c4), region = 40 }
   0xb   : > { %v4689_v0 = vld [vmem:[%s9382_s1] sm:$0xff]  ;;  %s4567_s22 = sshll.u32 %s4562_s19, 6  ;;  %vm335_vm0 = vcmask 130048   ;;  %vm665_vm1 = vcmask 261120  }
   0xc   : > { %p217_p3 = scmp.lt.s32.totalorder %s4567_s22, 127  ;;  %439 = vmatpush.bf16.msra.mxu0 %v4689_v0  ;;  %4694 = vmatpush.bf16.msra.mxu3 %v4689_v0  ;;  %v325_v34 = vld [vmem:[%s9385_s4] sm:$0xff] }
   0xd   : > { %v5069_v40 = vperm.slane %v325_v34, 0 }
   0xe   : > { %s9785_s22 = smov (!%p217_p3, %s4567_s22), 127 }
   0xf   : > { %s4568_s23 = sshll.u32 %s9785_s22, 3 }
  0x10   : > { %s5027_s26 = scalar_lea.vmem %s9381_s0, %s4568_s23  ;;  %s8130_s21 = scalar_lea.vmem %s9386_s5, %s4568_s23 }
  0x11   : > { %v229_v1 = vld [vmem:[%s5027_s26] sm:$0xff]  ;;  %v230_v2 = vld [vmem:[%s5027_s26 + $0x8] sm:$0xff]  ;;  %v279_v3 = vld [vmem:[%s5027_s26 + $0x190] sm:$0xff] }
  0x12   : > { %v293_v4 = vpack.c.bf16 %v230_v2, %v229_v1  ;;  %v280_v5 = vld [vmem:[%s5027_s26 + $0x198] sm:$0xff]  ;;  %v231_v7 = vld [vmem:[%s5027_s26 + $0x10] sm:$0xff]  ;;  %v281_v9 = vld [vmem:[%s5027_s26 + $0x1a0] sm:$0xff] }
  0x13   : > { %v318_v6 = vpack.c.bf16 %v280_v5, %v279_v3  ;;  %v232_v8 = vld [vmem:[%s5027_s26 + $0x18] sm:$0xff]  ;;  %v282_v10 = vld [vmem:[%s5027_s26 + $0x1a8] sm:$0xff]  ;;  %v233_v13 = vld [vmem:[%s5027_s26 + $0x20] sm:$0xff] }
  0x14   : > { %4575 = vmatmul.msk.bf16.vlgmr.msra.gmra.mxu0 %vm335_vm0, %v293_v4  ;;  %v294_v11 = vpack.c.bf16 %v232_v8, %v231_v7  ;;  %v319_v12 = vpack.c.bf16 %v282_v10, %v281_v9  ;;  %v234_v14 = vld [vmem:[%s5027_s26 + $0x28] sm:$0xff]  ;;  %v235_v16 = vld [vmem:[%s5027_s26 + $0x30] sm:$0xff]  ;;  %v236_v17 = vld [vmem:[%s5027_s26 + $0x38] sm:$0xff] }
  0x15   : > { %4600 = vmatmul.msk.bf16.vlgmr.msra.gmra.mxu3 %vm335_vm0, %v318_v6  ;;  %v295_v15 = vpack.c.bf16 %v234_v14, %v233_v13  ;;  %v296_v18 = vpack.c.bf16 %v236_v17, %v235_v16  ;;  %v237_v19 = vld [vmem:[%s5027_s26 + $0x40] sm:$0xff]  ;;  %v238_v20 = vld [vmem:[%s5027_s26 + $0x48] sm:$0xff]  ;;  %v283_v22 = vld [vmem:[%s5027_s26 + $0x1b0] sm:$0xff] }
  0x16   : > { %v297_v21 = vpack.c.bf16 %v238_v20, %v237_v19  ;;  %v284_v23 = vld [vmem:[%s5027_s26 + $0x1b8] sm:$0xff]  ;;  %v239_v25 = vld [vmem:[%s5027_s26 + $0x50] sm:$0xff]  ;;  %v241_v28 = vld [vmem:[%s5027_s26 + $0x60] sm:$0xff] }
  0x17   : > { %v320_v24 = vpack.c.bf16 %v284_v23, %v283_v22  ;;  %v240_v26 = vld [vmem:[%s5027_s26 + $0x58] sm:$0xff]  ;;  %v242_v29 = vld [vmem:[%s5027_s26 + $0x68] sm:$0xff]  ;;  %v243_v31 = vld [vmem:[%s5027_s26 + $0x70] sm:$0xff] }
  0x18   : > { %v298_v27 = vpack.c.bf16 %v240_v26, %v239_v25  ;;  %v299_v30 = vpack.c.bf16 %v242_v29, %v241_v28  ;;  %v244_v32 = vld [vmem:[%s5027_s26 + $0x78] sm:$0xff]  ;;  %v285_v35 = vld [vmem:[%s5027_s26 + $0x1c0] sm:$0xff]  ;;  %v286_v36 = vld [vmem:[%s5027_s26 + $0x1c8] sm:$0xff] }
  0x19   : > { %v300_v33 = vpack.c.bf16 %v244_v32, %v243_v31  ;;  %v245_v37 = vld [vmem:[%s5027_s26 + $0x80] sm:$0xff]  ;;  %v246_v38 = vld [vmem:[%s5027_s26 + $0x88] sm:$0xff]  ;;  %v321_v39 = vpack.c.bf16 %v286_v36, %v285_v35  ;;  %v247_v51 = vld [vmem:[%s5027_s26 + $0x90] sm:$0xff] }
  0x1a   : > { %v301_v41 = vpack.c.bf16 %v246_v38, %v245_v37  ;;  %v248_v52 = vld [vmem:[%s5027_s26 + $0x98] sm:$0xff]  ;;  %v287_v4 = vld [vmem:[%s5027_s26 + $0x1d0] sm:$0xff]  ;;  %v249_v9 = vld [vmem:[%s5027_s26 + $0xa0] sm:$0xff] }
  0x1b   : > { %v302_v55 = vpack.c.bf16 %v248_v52, %v247_v51  ;;  %v288_v5 = vld [vmem:[%s5027_s26 + $0x1d8] sm:$0xff]  ;;  %v250_v10 = vld [vmem:[%s5027_s26 + $0xa8] sm:$0xff]  ;;  %v251_v26 = vld [vmem:[%s5027_s26 + $0xb0] sm:$0xff] }
  0x1c   : > { %v303_v13 = vpack.c.bf16 %v250_v10, %v249_v9  ;;  %v253_v37 = vld [vmem:[%s5027_s26 + $0xc0] sm:$0xff]  ;;  %v254_v38 = vld [vmem:[%s5027_s26 + $0xc8] sm:$0xff] }
  0x24   : > { %4576 = vmatmul.msk.bf16.gmra.mxu0 %vm335_vm0, %v294_v11  ;;  %v322_v11 = vpack.c.bf16 %v288_v5, %v287_v4 }
  0x25   : > { %4601 = vmatmul.msk.bf16.gmra.mxu3 %vm335_vm0, %v319_v12 }
  0x34   : > { %4577 = vmatmul.msk.bf16.gmra.mxu0 %vm335_vm0, %v295_v15 }
  0x35   : > { %4602 = vmatmul.msk.bf16.gmra.mxu3 %vm335_vm0, %v320_v24 }
  0x44   : > { %4578 = vmatmul.msk.bf16.gmra.mxu0 %vm335_vm0, %v296_v18 }
  0x45   : > { %4603 = vmatmul.msk.bf16.gmra.mxu3 %vm335_vm0, %v321_v39 }
  0x54   : > { %4579 = vmatmul.msk.bf16.gmra.mxu0 %vm335_vm0, %v297_v21 }
  0x55   : > { %4604 = vmatmul.msk.bf16.gmra.mxu3 %vm335_vm0, %v322_v11 }
  0x64   : > { %4580 = vmatmul.msk.bf16.gmra.mxu0 %vm335_vm0, %v298_v27  ;;  %v252_v27 = vld [vmem:[%s5027_s26 + $0xb8] sm:$0xff] }
  0x65   : > { %v304_v29 = vpack.c.bf16 %v252_v27, %v251_v26 }
  0x74   : > { %4581 = vmatmul.msk.bf16.gmra.mxu0 %vm335_vm0, %v299_v30 }
  0x84   : > { %4582 = vmatmul.msk.bf16.gmra.mxu0 %vm335_vm0, %v300_v33 }
  0x91   : > { %v441_v42 = vpop.f32.mrf.mxu0 }
  0x92   : > { %v5073_v43 = vadd.f32 %v441_v42, %v5069_v40 }
  0x94   : > { %v601_v44 = vmax.f32 %v5073_v43, 0.0  ;;  %4583 = vmatmul.msk.bf16.gmra.mxu0 %vm335_vm0, %v301_v41  ;;  %v305_v41 = vpack.c.bf16 %v254_v38, %v253_v37  ;;  %v259_v38 = vld [vmem:[%s5027_s26 + $0xf0] sm:$0xff] }
  0x96   : > { %v666_v45 = vsel %vm665_vm1, %v601_v44, 0.0 }
  0x97   : > { %667 = vadd.xlane.f32.xlu0 %v666_v45 }
  0x98   : > { %v566_v46 = vpop.f32.mrf.mxu3 }
  0x99   : > { %v5081_v47 = vadd.f32 %v566_v46, %v5069_v40  ;;  %v443_v48 = vpop.f32.mrf.mxu0 }
  0x9a   : > { %v5090_v53 = vadd.f32 %v443_v48, %v5069_v40  ;;  %v289_v48 = vld [vmem:[%s5027_s26 + $0x1e0] sm:$0xff] }
  0x9b   : > { %v651_v49 = vmax.f32 %v5081_v47, 0.0 }
  0x9c   : > { %v602_v58 = vmax.f32 %v5090_v53, 0.0 }
  0x9d   : > { %v816_v50 = vsel %vm665_vm1, %v651_v49, 0.0 }
  0x9e   : > { %v669_v62 = vsel %vm665_vm1, %v602_v58, 0.0 }
  0x9f   : > { %817 = vadd.xlane.f32.xlu0 %v816_v50  ;;  %v290_v50 = vld [vmem:[%s5027_s26 + $0x1e8] sm:$0xff] }
  0xa0   : > { %v568_v54 = vpop.f32.mrf.mxu3  ;;  %v323_v51 = vpack.c.bf16 %v290_v50, %v289_v48 }
  0xa1   : > { %v5093_v56 = vadd.f32 %v568_v54, %v5069_v40  ;;  %v446_v57 = vpop.f32.mrf.mxu0 }
  0xa2   : > { %v5099_v60 = vadd.f32 %v446_v57, %v5069_v40  ;;  %4605 = vmatmul.msk.bf16.gmra.mxu3 %vm335_vm0, %v323_v51 }
  0xa3   : > { %v652_v59 = vmax.f32 %v5093_v56, 0.0 }
  0xa4   : > { %4584 = vmatmul.msk.bf16.gmra.mxu0 %vm335_vm0, %v302_v55  ;;  %v603_v0 = vmax.f32 %v5099_v60, 0.0 }
  0xa5   : > { %v819_v61 = vsel %vm665_vm1, %v652_v59, 0.0 }
  0xa6   : > { %820 = vadd.xlane.f32.xlu1 %v819_v61  ;;  %v672_v8 = vsel %vm665_vm1, %v603_v0, 0.0  ;;  %v255_v61 = vld [vmem:[%s5027_s26 + $0xd0] sm:$0xff] }
  0xa7   : > { %670 = vadd.xlane.f32.xlu0 %v669_v62  ;;  %v256_v62 = vld [vmem:[%s5027_s26 + $0xd8] sm:$0xff] }
  0xa8   : > { %v571_v63 = vpop.f32.mrf.mxu3 }
  0xa9   : > { %v5109_v1 = vadd.f32 %v571_v63, %v5069_v40  ;;  %v448_v2 = vpop.f32.mrf.mxu0 }
  0xaa   : > { %v5115_v6 = vadd.f32 %v448_v2, %v5069_v40  ;;  %v306_v2 = vpack.c.bf16 %v256_v62, %v255_v61 }
  0xab   : > { %v653_v3 = vmax.f32 %v5109_v1, 0.0 }
  0xac   : > { %v604_v14 = vmax.f32 %v5115_v6, 0.0 }
  0xad   : > { %v822_v7 = vsel %vm665_vm1, %v653_v3, 0.0 }
  0xae   : > { %823 = vadd.xlane.f32.xlu2 %v822_v7  ;;  %673 = vadd.xlane.f32.xlu1 %v672_v8  ;;  %v675_v20 = vsel %vm665_vm1, %v604_v14, 0.0 }
  0xb0   : > { %v573_v12 = vpop.f32.mrf.mxu3 }
  0xb1   : > { %v5128_v15 = vadd.f32 %v573_v12, %v5069_v40  ;;  %v451_v16 = vpop.f32.mrf.mxu0  ;;  %v257_v12 = vld [vmem:[%s5027_s26 + $0xe0] sm:$0xff] }
  0xb2   : > { %v5131_v17 = vadd.f32 %v451_v16, %v5069_v40 }
  0xb3   : > { %v654_v18 = vmax.f32 %v5128_v15, 0.0 }
  0xb4   : > { %v605_v19 = vmax.f32 %v5131_v17, 0.0  ;;  %4585 = vmatmul.msk.bf16.gmra.mxu0 %vm335_vm0, %v303_v13  ;;  %v258_v13 = vld [vmem:[%s5027_s26 + $0xe8] sm:$0xff] }
  0xb5   : > { %v825_v21 = vsel %vm665_vm1, %v654_v18, 0.0 }
  0xb6   : > { %676 = vadd.xlane.f32.xlu1 %v675_v20  ;;  %826 = vadd.xlane.f32.xlu0 %v825_v21  ;;  %v678_v22 = vsel %vm665_vm1, %v605_v19, 0.0  ;;  %v4977_v20 = vmov 32.0   ;;  %v307_v21 = vpack.c.bf16 %v258_v13, %v257_v12 }
  0xb7   : > { %679 = vadd.xlane.f32.xlu2 %v678_v22  ;;  %4708 = vrcp.f32 %v4977_v20  ;;  %v261_v20 = vld [vmem:[%s5027_s26 + $0x100] sm:$0xff] }
  0xb8   : > { %v576_v51 = vpop.f32.mrf.mxu3 }
  0xb9   : > { %v453_v23 = vpop.f32.mrf.mxu0 }
  0xba   : > { %v5146_v24 = vadd.f32 %v453_v23, %v5069_v40 }
  0xbc   : > { %v606_v25 = vmax.f32 %v5146_v24, 0.0 }
  0xbd   : > { %v4709_v27 = vpop.eup %4708 }
  0xbe   : > { %v681_v28 = vsel %vm665_vm1, %v606_v25, 0.0  ;;  %vm863_vm2 = vweird.f32 %v4709_v27 }
  0xbf   : > { %682 = vadd.xlane.f32.xlu2 %v681_v28 }
  0xc1   : > { %v456_v30 = vpop.f32.mrf.mxu0 }
  0xc2   : > { %v5155_v31 = vadd.f32 %v456_v30, %v5069_v40 }
  0xc4   : > { %v607_v32 = vmax.f32 %v5155_v31, 0.0  ;;  %4586 = vmatmul.msk.bf16.gmra.mxu0 %vm335_vm0, %v304_v29  ;;  %v859_v29 = vmul.f32 32.0, %v4709_v27 }
  0xc6   : > { %v684_v33 = vsel %vm665_vm1, %v607_v32, 0.0  ;;  %v860_v37 = vsub.f32 1.0, %v859_v29 }
  0xc7   : > { %685 = vadd.xlane.f32.xlu2 %v684_v33 }
  0xc8   : > { %v861_v48 = vmul.f32 %v4709_v27, %v860_v37 }
  0xc9   : > { %v458_v34 = vpop.f32.mrf.mxu0 }
  0xca   : > { %v5163_v35 = vadd.f32 %v458_v34, %v5069_v40  ;;  %v862_v61 = vadd.f32 %v4709_v27, %v861_v48 }
  0xcc   : > { %v608_v36 = vmax.f32 %v5163_v35, 0.0 }
  0xce   : > { %v687_v39 = vsel %vm665_vm1, %v608_v36, 0.0 }
  0xcf   : > { %688 = vadd.xlane.f32.xlu0 %v687_v39  ;;  %v260_v39 = vld [vmem:[%s5027_s26 + $0xf8] sm:$0xff] }
  0xd1   : > { %v461_v42 = vpop.f32.mrf.mxu0 }
  0xd2   : > { %v5172_v45 = vadd.f32 %v461_v42, %v5069_v40  ;;  %v308_v42 = vpack.c.bf16 %v260_v39, %v259_v38 }
  0xd4   : > { %v609_v46 = vmax.f32 %v5172_v45, 0.0  ;;  %4587 = vmatmul.msk.bf16.gmra.mxu0 %vm335_vm0, %v305_v41 }
  0xd6   : > { %v690_v52 = vsel %vm665_vm1, %v609_v46, 0.0 }
  0xd7   : > { %691 = vadd.xlane.f32.xlu0 %v690_v52 }
  0xd9   : > { %v463_v54 = vpop.f32.mrf.mxu0 }
  0xda   : > { %v5183_v55 = vadd.f32 %v463_v54, %v5069_v40 }
  0xdc   : > { %v610_v57 = vmax.f32 %v5183_v55, 0.0 }
  0xde   : > { %v693_v63 = vsel %vm665_vm1, %v610_v57, 0.0 }
  0xdf   : > { %694 = vadd.xlane.f32.xlu1 %v693_v63  ;;  %v5233_v63 = vsel %vm863_vm2, %v4709_v27, %v862_v61 }
  0xe1   : > { %v466_v4 = vpop.f32.mrf.mxu0 }
  0xe2   : > { %v5192_v5 = vadd.f32 %v466_v4, %v5069_v40 }
  0xe4   : > { %v611_v7 = vmax.f32 %v5192_v5, 0.0  ;;  %4588 = vmatmul.msk.bf16.gmra.mxu0 %vm335_vm0, %v306_v2 }
  0xe6   : > { %v696_v8 = vsel %vm665_vm1, %v611_v7, 0.0 }
  0xe7   : > { %697 = vadd.xlane.f32.xlu1 %v696_v8 }
  0xe9   : > { %v468_v9 = vpop.f32.mrf.mxu0 }
  0xea   : > { %v5200_v10 = vadd.f32 %v468_v9, %v5069_v40  ;;  %v578_v9 = vpop.f32.mrf.mxu3 }
  0xec   : > { %v612_v11 = vmax.f32 %v5200_v10, 0.0 }
  0xee   : > { %v699_v16 = vsel %vm665_vm1, %v612_v11, 0.0 }
  0xef   : > { %700 = vadd.xlane.f32.xlu2 %v699_v16 }
  0xf1   : > { %v471_v22 = vpop.f32.mrf.mxu0 }
  0xf2   : > { %v5209_v23 = vadd.f32 %v471_v22, %v5069_v40  ;;  %v5247_v22 = vadd.f32 %v578_v9, %v5069_v40 }
  0xf4   : > { %v613_v26 = vmax.f32 %v5209_v23, 0.0  ;;  %4589 = vmatmul.msk.bf16.gmra.mxu0 %vm335_vm0, %v307_v21  ;;  %v262_v21 = vld [vmem:[%s5027_s26 + $0x108] sm:$0xff]  ;;  %v656_v37 = vmax.f32 %v5247_v22, 0.0 }
  0xf5   : > { %v309_v29 = vpack.c.bf16 %v262_v21, %v261_v20  ;;  %v263_v21 = vld [vmem:[%s5027_s26 + $0x110] sm:$0xff] }
  0xf6   : > { %v702_v28 = vsel %vm665_vm1, %v613_v26, 0.0 }
  0xf7   : > { %703 = vadd.xlane.f32.xlu2 %v702_v28 }
  0xf9   : > { %v473_v30 = vpop.f32.mrf.mxu0 }
  0xfa   : > { %v5217_v33 = vadd.f32 %v473_v30, %v5069_v40  ;;  %v5255_v30 = vadd.f32 %v576_v51, %v5069_v40 }
  0xfc   : > { %v614_v34 = vmax.f32 %v5217_v33, 0.0 }
  0xfe   : > { %v705_v41 = vsel %vm665_vm1, %v614_v34, 0.0 }
  0xff   : > { %706 = vadd.xlane.f32.xlu0 %v705_v41  ;;  %v655_v41 = vmax.f32 %v5255_v30, 0.0 }
 0x101   : > { %v476_v50 = vpop.f32.mrf.mxu0  ;;  %v828_v61 = vsel %vm665_vm1, %v655_v41, 0.0 }
 0x102   : > { %v5226_v52 = vadd.f32 %v476_v50, %v5069_v40 }
 0x104   : > { %v615_v54 = vmax.f32 %v5226_v52, 0.0  ;;  %4590 = vmatmul.msk.bf16.gmra.mxu0 %vm335_vm0, %v308_v42  ;;  %v831_v42 = vsel %vm665_vm1, %v656_v37, 0.0 }
 0x106   : > { %v708_v62 = vsel %vm665_vm1, %v615_v54, 0.0 }
 0x107   : > { %709 = vadd.xlane.f32.xlu0 %v708_v62 }
 0x109   : > { %v478_v2 = vpop.f32.mrf.mxu0 }
 0x10a   : > { %v5236_v4 = vadd.f32 %v478_v2, %v5069_v40  ;;  %v668_v8 = vpop.xlane.xlu0 %667 }
 0x10b   : > { %v865_v12 = vmul.f32 %v5233_v63, %v668_v8 }
 0x10c   : > { %v9406_v13 = vmax.f32 %v5236_v4, 0.0 }
 0x10d   : > { %v5242_v16 = vsub.f32 %v601_v44, %v865_v12 }
 0x10e   : > { %v711_v27 = vsel %vm665_vm1, %v9406_v13, 0.0 }
 0x10f   : > { %712 = vadd.xlane.f32.xlu1 %v711_v27  ;;  %v993_v28 = vmul.f32 %v5242_v16, %v5242_v16  ;;  %v264_v27 = vld [vmem:[%s5027_s26 + $0x118] sm:$0xff] }
 0x111   : > { %v481_v43 = vpop.f32.mrf.mxu0  ;;  %v1057_v44 = vsel %vm665_vm1, %v993_v28, 0.0 }
 0x112   : > { %1058 = vadd.xlane.f32.xlu0 %v1057_v44  ;;  %v818_v38 = vpop.xlane.xlu0 %817  ;;  %v5260_v39 = vadd.f32 %v481_v43, %v5069_v40  ;;  %v310_v44 = vpack.c.bf16 %v264_v27, %v263_v21 }
 0x114   : > { %4591 = vmatmul.msk.bf16.gmra.mxu0 %vm335_vm0, %v309_v29  ;;  %v9387_v48 = vmax.f32 %v5260_v39, 0.0 }
 0x116   : > { %v714_v20 = vsel %vm665_vm1, %v9387_v48, 0.0 }
 0x117   : > { %832 = vadd.xlane.f32.xlu1 %v831_v42 }
 0x119   : > { %v821_v50 = vpop.xlane.xlu1 %820  ;;  %v483_v51 = vpop.f32.mrf.mxu0 }
 0x11a   : > { %v916_v62 = vmul.f32 %v5233_v63, %v821_v50  ;;  %v5273_v2 = vadd.f32 %v483_v51, %v5069_v40  ;;  %829 = vadd.xlane.f32.xlu0 %v828_v61  ;;  %v671_v8 = vpop.xlane.xlu0 %670  ;;  %v915_v50 = vmul.f32 %v5233_v63, %v818_v38 }
 0x11b   : > { %v866_v9 = vmul.f32 %v5233_v63, %v671_v8  ;;  %v581_v8 = vpop.f32.mrf.mxu3 }
 0x11c   : > { %v618_v12 = vmax.f32 %v5273_v2, 0.0  ;;  %v5284_v28 = vsub.f32 %v652_v59, %v916_v62  ;;  %v5306_v59 = vsub.f32 %v651_v49, %v915_v50 }
 0x11d   : > { %v5288_v29 = vsub.f32 %v602_v58, %v866_v9 }
 0x11e   : > { %9500 = vst [vmem:[#allocation2_spill] sm:$0xff] %v5284_v28  ;;  %v717_v43 = vsel %vm665_vm1, %v618_v12, 0.0  ;;  %v1044_v56 = vmul.f32 %v5284_v28, %v5284_v28  ;;  %v1043_v49 = vmul.f32 %v5306_v59, %v5306_v59 }
 0x11f   : > { %718 = vadd.xlane.f32.xlu2 %v717_v43  ;;  %715 = vadd.xlane.f32.xlu1 %v714_v20  ;;  %v994_v53 = vmul.f32 %v5288_v29, %v5288_v29  ;;  %9501 = vst [vmem:[#allocation3_spill] sm:$0xff] %v5306_v59 }
 0x120   : > { %v1210_v38 = vsel %vm665_vm1, %v1044_v56, 0.0  ;;  %v265_v56 = vld [vmem:[%s5027_s26 + $0x120] sm:$0xff] }
 0x121   : > { %v674_v42 = vpop.xlane.xlu1 %673  ;;  %v5294_v51 = vpop.xlane.xlu2 %823  ;;  %v1060_v62 = vsel %vm665_vm1, %v994_v53, 0.0  ;;  %v266_v53 = vld [vmem:[%s5027_s26 + $0x128] sm:$0xff] }
 0x122   : > { %v486_v61 = vpop.f32.mrf.mxu0  ;;  %v867_v21 = vmul.f32 %v5233_v63, %v674_v42 }
 0x123   : > { %v5301_v58 = vadd.f32 %v486_v61, %v5069_v40  ;;  %v583_v48 = vpop.f32.mrf.mxu3 }
 0x124   : > { %4592 = vmatmul.msk.bf16.gmra.mxu0 %vm335_vm0, %v310_v44  ;;  %v5326_v42 = vsub.f32 %v603_v0, %v867_v21 }
 0x125   : > { %v9388_v9 = vmax.f32 %v5301_v58, 0.0 }
 0x127   : > { %1211 = vadd.xlane.f32.xlu2 %v1210_v38  ;;  %1061 = vadd.xlane.f32.xlu1 %v1060_v62  ;;  %v720_v50 = vsel %vm665_vm1, %v9388_v9, 0.0  ;;  %v1207_v62 = vsel %vm665_vm1, %v1043_v49, 0.0  ;;  %v5347_v49 = vadd.f32 %v583_v48, %v5069_v40 }
 0x129   : > { %v677_v20 = vpop.xlane.xlu1 %676  ;;  %9502 = vst [vmem:[#allocation4_spill] sm:$0xff] %v5347_v49  ;;  %v9389_v17 = vmax.f32 %v5347_v49, 0.0 }
 0x12a   : > { %v868_v27 = vmul.f32 %v5233_v63, %v677_v20  ;;  %v488_v43 = vpop.f32.mrf.mxu0  ;;  %v680_v47 = vpop.xlane.xlu2 %679 }
 0x12b   : > { %v5316_v44 = vadd.f32 %v488_v43, %v5069_v40  ;;  %v311_v43 = vpack.c.bf16 %v266_v53, %v265_v56  ;;  %v869_v9 = vmul.f32 %v5233_v63, %v680_v47 }
 0x12c   : > { %v5330_v38 = vsub.f32 %v604_v14, %v868_v27  ;;  %v995_v14 = vmul.f32 %v5326_v42, %v5326_v42 }
 0x12d   : > { %v9403_v61 = vmax.f32 %v5316_v44, 0.0 }
 0x12e   : > { %v996_v6 = vmul.f32 %v5330_v38, %v5330_v38  ;;  %v1063_v53 = vsel %vm665_vm1, %v995_v14, 0.0 }
 0x12f   : > { %721 = vadd.xlane.f32.xlu2 %v720_v50  ;;  %v723_v20 = vsel %vm665_vm1, %v9403_v61, 0.0  ;;  %1208 = vadd.xlane.f32.xlu1 %v1207_v62  ;;  %v5352_v50 = vsub.f32 %v605_v19, %v869_v9  ;;  %v827_v62 = vpop.xlane.xlu0 %826 }
 0x130   : > { %724 = vadd.xlane.f32.xlu0 %v723_v20  ;;  %v1066_v56 = vsel %vm665_vm1, %v996_v6, 0.0  ;;  %v918_v19 = vmul.f32 %v5233_v63, %v827_v62  ;;  %v268_v6 = vld [vmem:[%s5027_s26 + $0x138] sm:$0xff] }
 0x132   : > { %v491_v60 = vpop.f32.mrf.mxu0  ;;  %v683_v0 = vpop.xlane.xlu2 %682  ;;  %v5379_v14 = vsub.f32 %v654_v18, %v918_v19 }
 0x133   : > { %v5342_v21 = vadd.f32 %v491_v60, %v5069_v40  ;;  %v870_v27 = vmul.f32 %v5233_v63, %v683_v0  ;;  %v837_v60 = vsel %vm665_vm1, %v9389_v17, 0.0  ;;  %v267_v0 = vld [vmem:[%s5027_s26 + $0x130] sm:$0xff] }
 0x134   : > { %4593 = vmatmul.msk.bf16.gmra.mxu0 %vm335_vm0, %v311_v43  ;;  %v997_v43 = vmul.f32 %v5352_v50, %v5352_v50  ;;  %9503 = vst [vmem:[#allocation5_spill] sm:$0xff] %v5379_v14  ;;  %v1046_v15 = vmul.f32 %v5379_v14, %v5379_v14 }
 0x135   : > { %v9393_v47 = vmax.f32 %v5342_v21, 0.0  ;;  %v5358_v20 = vsub.f32 %v606_v25, %v870_v27 }
 0x136   : > { %v1069_v27 = vsel %vm665_vm1, %v997_v43, 0.0 }
 0x137   : > { %1067 = vadd.xlane.f32.xlu2 %v1066_v56  ;;  %v726_v48 = vsel %vm665_vm1, %v9393_v47, 0.0  ;;  %1064 = vadd.xlane.f32.xlu1 %v1063_v53  ;;  %v998_v24 = vmul.f32 %v5358_v20, %v5358_v20  ;;  %v5383_v56 = vadd.f32 %v581_v8, %v5069_v40 }
 0x138   : > { %727 = vadd.xlane.f32.xlu0 %v726_v48 }
 0x139   : > { %v1072_v53 = vsel %vm665_vm1, %v998_v24, 0.0  ;;  %v9390_v18 = vmax.f32 %v5383_v56, 0.0  ;;  %v1216_v24 = vsel %vm665_vm1, %v1046_v15, 0.0 }
 0x13a   : > { %v493_v9 = vpop.f32.mrf.mxu0  ;;  %v686_v48 = vpop.xlane.xlu2 %685 }
 0x13b   : > { %v5370_v25 = vadd.f32 %v493_v9, %v5069_v40  ;;  %v312_v9 = vpack.c.bf16 %v268_v6, %v267_v0  ;;  %v871_v19 = vmul.f32 %v5233_v63, %v686_v48  ;;  %v586_v48 = vpop.f32.mrf.mxu3 }
 0x13d   : > { %v9392_v62 = vmax.f32 %v5370_v25, 0.0 }
 0x13f   : > { %1070 = vadd.xlane.f32.xlu2 %v1069_v27  ;;  %838 = vadd.xlane.f32.xlu1 %v837_v60  ;;  %v729_v43 = vsel %vm665_vm1, %v9392_v62, 0.0  ;;  %v5401_v60 = vsub.f32 %v607_v32, %v871_v19  ;;  %v5418_v19 = vadd.f32 %v586_v48, %v5069_v40  ;;  %v917_v48 = vmul.f32 %v5233_v63, %v5294_v51 }
 0x140   : > { %1073 = vadd.xlane.f32.xlu0 %v1072_v53 }
 0x141   : > { %v999_v32 = vmul.f32 %v5401_v60, %v5401_v60  ;;  %9504 = vst [vmem:[#allocation6_spill] sm:$0xff] %v5418_v19  ;;  %v5446_v51 = vsub.f32 %v653_v3, %v917_v48 }
 0x142   : > { %v496_v17 = vpop.f32.mrf.mxu0  ;;  %v689_v0 = vpop.xlane.xlu0 %688 }
 0x143   : > { %v5392_v8 = vadd.f32 %v496_v17, %v5069_v40  ;;  %v834_v17 = vsel %vm665_vm1, %v9390_v18, 0.0  ;;  %v872_v27 = vmul.f32 %v5233_v63, %v689_v0  ;;  %9505 = vst [vmem:[#allocation7_spill] sm:$0xff] %v5446_v51 }
 0x144   : > { %4594 = vmatmul.msk.bf16.gmra.mxu0 %vm335_vm0, %v312_v9 }
 0x145   : > { %v9391_v6 = vmax.f32 %v5392_v8, 0.0  ;;  %v5424_v0 = vsub.f32 %v608_v36, %v872_v27 }
 0x147   : > { %730 = vadd.xlane.f32.xlu1 %v729_v43  ;;  %1217 = vadd.xlane.f32.xlu2 %v1216_v24  ;;  %v732_v9 = vsel %vm665_vm1, %v9391_v6, 0.0  ;;  %v269_v43 = vld [vmem:[%s5027_s26 + $0x140] sm:$0xff]  ;;  %v270_v24 = vld [vmem:[%s5027_s26 + $0x148] sm:$0xff]  ;;  %v9394_v6 = vmax.f32 %v5418_v19, 0.0  ;;  %v1000_v35 = vmul.f32 %v5424_v0, %v5424_v0 }
 0x148   : > { %835 = vadd.xlane.f32.xlu0 %v834_v17  ;;  %v1075_v17 = vsel %vm665_vm1, %v999_v32, 0.0  ;;  %v313_v18 = vpack.c.bf16 %v270_v24, %v269_v43 }
 0x149   : > { %v1078_v43 = vsel %vm665_vm1, %v1000_v35, 0.0  ;;  %v271_v35 = vld [vmem:[%s5027_s26 + $0x150] sm:$0xff] }
 0x14a   : > { %v498_v53 = vpop.f32.mrf.mxu0 }
 0x14b   : > { %v5409_v31 = vadd.f32 %v498_v53, %v5069_v40 }
 0x14d   : > { %v9402_v15 = vmax.f32 %v5409_v31, 0.0 }
 0x14f   : > { %733 = vadd.xlane.f32.xlu1 %v732_v9  ;;  %v735_v53 = vsel %vm665_vm1, %v9402_v15, 0.0  ;;  %v840_v9 = vsel %vm665_vm1, %v9394_v6, 0.0  ;;  %v588_v6 = vpop.f32.mrf.mxu3 }
 0x150   : > { %1076 = vadd.xlane.f32.xlu0 %v1075_v17  ;;  %736 = vadd.xlane.f32.xlu2 %v735_v53  ;;  %v1045_v17 = vmul.f32 %v5446_v51, %v5446_v51 }
 0x152   : > { %v501_v62 = vpop.f32.mrf.mxu0  ;;  %v695_v47 = vpop.xlane.xlu1 %694 }
 0x153   : > { %v5436_v36 = vadd.f32 %v501_v62, %v5069_v40  ;;  %v874_v27 = vmul.f32 %v5233_v63, %v695_v47  ;;  %v692_v62 = vpop.xlane.xlu0 %691 }
 0x154   : > { %4595 = vmatmul.msk.bf16.gmra.mxu0 %vm335_vm0, %v313_v18  ;;  %v873_v1 = vmul.f32 %v5233_v63, %v692_v62 }
 0x155   : > { %v9400_v32 = vmax.f32 %v5436_v36, 0.0  ;;  %v5451_v47 = vsub.f32 %v610_v57, %v874_v27  ;;  %v272_v27 = vld [vmem:[%s5027_s26 + $0x158] sm:$0xff] }
 0x157   : > { %v738_v18 = vsel %vm665_vm1, %v9400_v32, 0.0  ;;  %1079 = vadd.xlane.f32.xlu1 %v1078_v43  ;;  %v1002_v57 = vmul.f32 %v5451_v47, %v5451_v47  ;;  %v1213_v43 = vsel %vm665_vm1, %v1045_v17, 0.0 }
 0x158   : > { %841 = vadd.xlane.f32.xlu0 %v840_v9  ;;  %739 = vadd.xlane.f32.xlu2 %v738_v18  ;;  %v5470_v9 = vsub.f32 %v609_v46, %v873_v1 }
 0x15a   : > { %v503_v3 = vpop.f32.mrf.mxu0  ;;  %v698_v24 = vpop.xlane.xlu1 %697  ;;  %v1001_v1 = vmul.f32 %v5470_v9, %v5470_v9 }
 0x15b   : > { %v5460_v53 = vadd.f32 %v503_v3, %v5069_v40  ;;  %v875_v55 = vmul.f32 %v5233_v63, %v698_v24  ;;  %v1084_v3 = vsel %vm665_vm1, %v1002_v57, 0.0  ;;  %v314_v24 = vpack.c.bf16 %v272_v27, %v271_v35 }
 0x15c   : > { %v1081_v35 = vsel %vm665_vm1, %v1001_v1, 0.0  ;;  %v273_v1 = vld [vmem:[%s5027_s26 + $0x160] sm:$0xff] }
 0x15d   : > { %v9397_v48 = vmax.f32 %v5460_v53, 0.0  ;;  %v5475_v62 = vsub.f32 %v611_v7, %v875_v55  ;;  %v5490_v55 = vadd.f32 %v588_v6, %v5069_v40 }
 0x15f   : > { %v741_v18 = vsel %vm665_vm1, %v9397_v48, 0.0  ;;  %1214 = vadd.xlane.f32.xlu1 %v1213_v43  ;;  %v1003_v17 = vmul.f32 %v5475_v62, %v5475_v62  ;;  %9506 = vst [vmem:[#allocation8_spill] sm:$0xff] %v5490_v55  ;;  %v9396_v6 = vmax.f32 %v5490_v55, 0.0 }
 0x160   : > { %742 = vadd.xlane.f32.xlu0 %v741_v18  ;;  %1085 = vadd.xlane.f32.xlu2 %v1084_v3 }
 0x161   : > { %v1087_v18 = vsel %vm665_vm1, %v1003_v17, 0.0 }
 0x162   : > { %v506_v45 = vpop.f32.mrf.mxu0  ;;  %v701_v46 = vpop.xlane.xlu2 %700 }
 0x163   : > { %v5484_v5 = vadd.f32 %v506_v45, %v5069_v40  ;;  %v876_v7 = vmul.f32 %v5233_v63, %v701_v46  ;;  %v843_v46 = vsel %vm665_vm1, %v9396_v6, 0.0 }
 0x164   : > { %4596 = vmatmul.msk.bf16.gmra.mxu0 %vm335_vm0, %v314_v24 }
 0x165   : > { %v9395_v57 = vmax.f32 %v5484_v5, 0.0  ;;  %v5497_v27 = vsub.f32 %v612_v11, %v876_v7  ;;  %v274_v7 = vld [vmem:[%s5027_s26 + $0x168] sm:$0xff] }
 0x167   : > { %v744_v43 = vsel %vm665_vm1, %v9395_v57, 0.0  ;;  %1082 = vadd.xlane.f32.xlu1 %v1081_v35  ;;  %v1004_v10 = vmul.f32 %v5497_v27, %v5497_v27 }
 0x168   : > { %745 = vadd.xlane.f32.xlu0 %v744_v43  ;;  %1088 = vadd.xlane.f32.xlu2 %v1087_v18  ;;  %v315_v18 = vpack.c.bf16 %v274_v7, %v273_v1 }
 0x169   : > { %v1090_v35 = vsel %vm665_vm1, %v1004_v10, 0.0 }
 0x16a   : > { %v508_v3 = vpop.f32.mrf.mxu0  ;;  %v704_v24 = vpop.xlane.xlu2 %703 }
 0x16b   : > { %v877_v45 = vmul.f32 %v5233_v63, %v704_v24  ;;  %v5508_v11 = vadd.f32 %v508_v3, %v5069_v40  ;;  %v591_v3 = vpop.f32.mrf.mxu3 }
 0x16d   : > { %v5517_v17 = vsub.f32 %v613_v26, %v877_v45  ;;  %v9398_v43 = vmax.f32 %v5508_v11, 0.0  ;;  %v5531_v26 = vadd.f32 %v591_v3, %v5069_v40  ;;  %v275_v3 = vld [vmem:[%s5027_s26 + $0x170] sm:$0xff] }
 0x16f   : > { %844 = vadd.xlane.f32.xlu1 %v843_v46  ;;  %v1005_v6 = vmul.f32 %v5517_v17, %v5517_v17  ;;  %v747_v23 = vsel %vm665_vm1, %v9398_v43, 0.0  ;;  %9507 = vst [vmem:[#allocation9_spill] sm:$0xff] %v5531_v26  ;;  %v9401_v46 = vmax.f32 %v5531_v26, 0.0 }
 0x170   : > { %1091 = vadd.xlane.f32.xlu0 %v1090_v35 }
 0x171   : > { %v1093_v45 = vsel %vm665_vm1, %v1005_v6, 0.0  ;;  %v276_v6 = vld [vmem:[%s5027_s26 + $0x178] sm:$0xff] }
 0x172   : > { %v511_v24 = vpop.f32.mrf.mxu0  ;;  %v707_v57 = vpop.xlane.xlu0 %706 }
 0x173   : > { %v5524_v48 = vadd.f32 %v511_v24, %v5069_v40  ;;  %v878_v1 = vmul.f32 %v5233_v63, %v707_v57 }
 0x174   : > { %4597 = vmatmul.msk.bf16.gmra.mxu0 %vm335_vm0, %v315_v18  ;;  %v846_v18 = vsel %vm665_vm1, %v9401_v46, 0.0 }
 0x175   : > { %v9399_v10 = vmax.f32 %v5524_v48, 0.0 }
 0x177   : > { %748 = vadd.xlane.f32.xlu1 %v747_v23  ;;  %v750_v35 = vsel %vm665_vm1, %v9399_v10, 0.0  ;;  %v5547_v23 = vsub.f32 %v614_v34, %v878_v1 }
 0x178   : > { %1094 = vadd.xlane.f32.xlu0 %v1093_v45  ;;  %v316_v45 = vpack.c.bf16 %v276_v6, %v275_v3 }
 0x179   : > { %v1006_v10 = vmul.f32 %v5547_v23, %v5547_v23 }
 0x17a   : > { %v513_v7 = vpop.f32.mrf.mxu0  ;;  %v710_v24 = vpop.xlane.xlu0 %709 }
 0x17b   : > { %v1096_v46 = vsel %vm665_vm1, %v1006_v10, 0.0  ;;  %v277_v10 = vld [vmem:[%s5027_s26 + $0x180] sm:$0xff] }
 0x17f   : > { %751 = vadd.xlane.f32.xlu1 %v750_v35 }
 0x180   : > { %847 = vadd.xlane.f32.xlu0 %v846_v18 }
 0x182   : > { %v516_v57 = vpop.f32.mrf.mxu0  ;;  %v713_v43 = vpop.xlane.xlu1 %712 }
 0x184   : > { %4598 = vmatmul.msk.bf16.gmra.mxu0 %vm335_vm0, %v316_v45 }
 0x185   : > { %v1059_v32 = vpop.xlane.xlu0 %1058 }
 0x186   : > { %v1249_v33 = vmul.f32 %v1059_v32, %v5233_v63 }
 0x187   : > { %1097 = vadd.xlane.f32.xlu1 %v1096_v46  ;;  %v278_v46 = vld [vmem:[%s5027_s26 + $0x188] sm:$0xff] }
 0x188   : > { %v5558_v3 = vadd.f32 1e-05, %v1249_v33  ;;  %v879_v33 = vmul.f32 %v5233_v63, %v710_v24  ;;  %v317_v22 = vpack.c.bf16 %v278_v46, %v277_v10 }
 0x18a   : > { %v518_v34 = vpop.f32.mrf.mxu0  ;;  %v833_v1 = vpop.xlane.xlu1 %832  ;;  %4710 = vrsqrt.f32 %v5558_v3  ;;  %vm1383_vm4 = vweird.f32 %v5558_v3 }
 0x18b   : > { %v5555_v35 = vadd.f32 %v518_v34, %v5069_v40  ;;  %v920_v18 = vmul.f32 %v5233_v63, %v833_v1 }
 0x18d   : > { %v9404_v6 = vmax.f32 %v5555_v35, 0.0  ;;  %v5563_v45 = vsub.f32 %v656_v37, %v920_v18  ;;  %v830_v15 = vpop.xlane.xlu0 %829  ;;  %v5579_v37 = vadd.f32 %v513_v7, %v5069_v40  ;;  %v4691_v18 = vld [vmem:[%s9383_s2 + $0x8] sm:$0xff]  ;;  %v5593_v7 = vsub.f32 %v615_v54, %v879_v33 }
 0x18e   : > { %v919_v32 = vmul.f32 %v5233_v63, %v830_v15  ;;  %2362 = vmatpush.bf16.msra.mxu1 %v4691_v18  ;;  %4695 = vmatpush.bf16.msrb.mxu3 %v4691_v18  ;;  %v5612_v33 = vadd.f32 %v516_v57, %v5069_v40 }
 0x18f   : > { %9508 = vst [vmem:[#allocation10_spill] sm:$0xff] %v5563_v45  ;;  %v759_v34 = vsel %vm665_vm1, %v9404_v6, 0.0  ;;  %v1048_v1 = vmul.f32 %v5563_v45, %v5563_v45  ;;  %v1007_v54 = vmul.f32 %v5593_v7, %v5593_v7 }
 0x190   : > { %v5576_v61 = vsub.f32 %v655_v41, %v919_v32  ;;  %760 = vadd.xlane.f32.xlu0 %v759_v34  ;;  %v9405_v32 = vmax.f32 %v5579_v37, 0.0 }
 0x191   : > { %v1222_v15 = vsel %vm665_vm1, %v1048_v1, 0.0  ;;  %v4690_v1 = vld [vmem:[%s9383_s2] sm:$0xff] }
 0x192   : > { %9509 = vst [vmem:[#allocation11_spill] sm:$0xff] %v5576_v61  ;;  %v5586_v6 = vpop.f32.mrf.mxu0  ;;  %v719_v24 = vpop.xlane.xlu2 %718  ;;  %1223 = vadd.xlane.f32.xlu2 %v1222_v15  ;;  %v1047_v30 = vmul.f32 %v5576_v61, %v5576_v61  ;;  %2363 = vmatpush.bf16.msra.mxu1 %v4690_v1 }
 0x193   : > { %v882_v41 = vmul.f32 %v5233_v63, %v719_v24  ;;  %v716_v10 = vpop.xlane.xlu1 %715  ;;  %v5605_v15 = vpop.eup %4710  ;;  %4696 = vmatpush.bf16.msrb.mxu3 %v4690_v1  ;;  %v9410_v1 = vmax.f32 %v5612_v33, 0.0 }
 0x194   : > { %v1219_v46 = vsel %vm665_vm1, %v1047_v30, 0.0  ;;  %4599 = vmatmul.msk.bf16.gmra.mxu0 %vm335_vm0, %v317_v22  ;;  %v1378_v22 = vmul.f32 %v5605_v15, %v5558_v3  ;;  %vm1384_vm3 = vweird.f32 %v5605_v15 }
 0x195   : > { %v5600_v34 = vsub.f32 %v618_v12, %v882_v41  ;;  %1220 = vadd.xlane.f32.xlu1 %v1219_v46  ;;  %v753_v12 = vsel %vm665_vm1, %v9405_v32, 0.0  ;;  %v1099_v46 = vsel %vm665_vm1, %v1007_v54, 0.0  ;;  %v756_v54 = vsel %vm665_vm1, %v9410_v1, 0.0  ;;  %vm5679_vm5 = vmor %vm1383_vm4, %vm1384_vm3 }
 0x196   : > { %v1379_v13 = vmul.f32 %v5605_v15, %v1378_v22 }
 0x197   : > { %v1010_v52 = vmul.f32 %v5600_v34, %v5600_v34 }
 0x199   : > { %v1108_v2 = vsel %vm665_vm1, %v1010_v52, 0.0  ;;  %v880_v52 = vmul.f32 %v5233_v63, %v713_v43  ;;  %v1380_v43 = vmul.f32 0.5, %v1379_v13  ;;  %v9513_v13 = vmax.f32 %v5301_v58, 0.0 }
 0x19a   : > { %v523_v18 = vpop.f32.mrf.mxu0  ;;  %v5620_v24 = vpop.xlane.xlu2 %1211  ;;  %1109 = vadd.xlane.f32.xlu0 %v1108_v2  ;;  %754 = vadd.xlane.f32.xlu2 %v753_v12  ;;  %v9511_v12 = vmax.f32 %v5236_v4, 0.0  ;;  %v9515_v58 = vmax.f32 %v5260_v39, 0.0 }
 0x19b   : > { %9510 = vst [vmem:[#allocation12_spill] sm:$0xff] %v5620_v24  ;;  %v5623_v30 = vadd.f32 %v523_v18, %v5069_v40  ;;  %v1062_v41 = vpop.xlane.xlu1 %1061 }
 0x19c   : > { %v1250_v57 = vmul.f32 %v1062_v41, %v5233_v63  ;;  %v5636_v18 = vsub.f32 %v9511_v12, %v880_v52  ;;  %v881_v52 = vmul.f32 %v5233_v63, %v716_v10 }
 0x19d   : > { %v9409_v32 = vmax.f32 %v5623_v30, 0.0  ;;  %1100 = vadd.xlane.f32.xlu1 %v1099_v46 }
 0x19e   : > { %v1314_v45 = vadd.f32 1e-05, %v1250_v57 }
 0x19f   : > { %v765_v2 = vsel %vm665_vm1, %v9409_v32, 0.0 }
 0x1a0   : > { %4712 = vrsqrt.f32 %v1314_v45  ;;  %vm1393_vm7 = vweird.f32 %v1314_v45 }
 0x1a2   : > { %v526_v41 = vpop.f32.mrf.mxu0  ;;  %v722_v14 = vpop.xlane.xlu2 %721  ;;  %766 = vadd.xlane.f32.xlu0 %v765_v2  ;;  %757 = vadd.xlane.f32.xlu2 %v756_v54  ;;  %v1008_v2 = vmul.f32 %v5636_v18, %v5636_v18 }
 0x1a3   : > { %v5642_v22 = vadd.f32 %v526_v41, %v5069_v40  ;;  %v883_v57 = vmul.f32 %v5233_v63, %v722_v14  ;;  %v5645_v46 = vpop.xlane.xlu1 %1208  ;;  %v725_v32 = vpop.xlane.xlu0 %724  ;;  %v1381_v41 = vsub.f32 1.5, %v1380_v43  ;;  %v9514_v14 = vmax.f32 %v5316_v44, 0.0 }
 0x1a4   : > { %9512 = vst [vmem:[#allocation13_spill] sm:$0xff] %v5645_v46  ;;  %v884_v4 = vmul.f32 %v5233_v63, %v725_v32  ;;  %v1102_v59 = vsel %vm665_vm1, %v1008_v2, 0.0 }
 0x1a5   : > { %v9414_v12 = vmax.f32 %v5642_v22, 0.0  ;;  %v5652_v1 = vsub.f32 %v9513_v13, %v883_v57  ;;  %v5667_v57 = vsub.f32 %v9515_v58, %v881_v52  ;;  %v1382_v44 = vmul.f32 %v5605_v15, %v1381_v41 }
 0x1a6   : > { %v4713_v54 = vpop.eup %4712  ;;  %v5658_v51 = vsub.f32 %v9514_v14, %v884_v4 }
 0x1a7   : > { %v1388_v61 = vmul.f32 %v4713_v54, %v1314_v45  ;;  %v768_v10 = vsel %vm665_vm1, %v9414_v12, 0.0  ;;  %v1011_v32 = vmul.f32 %v5652_v1, %v5652_v1  ;;  %vm1394_vm6 = vweird.f32 %v4713_v54 }
 0x1a8   : > { %769 = vadd.xlane.f32.xlu1 %v768_v10  ;;  %v1009_v58 = vmul.f32 %v5667_v57, %v5667_v57  ;;  %vm1395_vm8 = vmor %vm1393_vm7, %vm1394_vm6 }
 0x1a9   : > { %v1389_v13 = vmul.f32 %v4713_v54, %v1388_v61  ;;  %v1111_v43 = vsel %vm665_vm1, %v1011_v32, 0.0  ;;  %v1012_v61 = vmul.f32 %v5658_v51, %v5658_v51 }
 0x1aa   : > { %v528_v4 = vpop.f32.mrf.mxu0  ;;  %v1068_v14 = vpop.xlane.xlu2 %1067  ;;  %1112 = vadd.xlane.f32.xlu0 %v1111_v43  ;;  %1103 = vadd.xlane.f32.xlu2 %v1102_v59  ;;  %v9518_v43 = vmax.f32 %v5342_v21, 0.0  ;;  %v5708_v21 = vld [vmem:[%s9385_s4] sm:$0xff] }
 0x1ab   : > { %v1390_v12 = vmul.f32 0.5, %v1389_v13  ;;  %v1252_v10 = vmul.f32 %v1068_v14, %v5233_v63  ;;  %v1065_v28 = vpop.xlane.xlu1 %1064  ;;  %v728_v39 = vpop.xlane.xlu0 %727  ;;  %v1386_v13 = vsel %vm5679_vm5, %v5605_v15, %v1382_v44  ;;  %v1105_v15 = vsel %vm665_vm1, %v1009_v58, 0.0 }
 0x1ac   : > { %v1251_v52 = vmul.f32 %v1065_v28, %v5233_v63  ;;  %v885_v2 = vmul.f32 %v5233_v63, %v728_v39  ;;  %v2017_v44 = vmul.f32 %v1386_v13, %v5242_v16  ;;  %v5711_v39 = vperm.slane %v5708_v21, 1 }
 0x1ad   : > { %v1391_v32 = vsub.f32 1.5, %v1390_v12  ;;  %v5683_v59 = vadd.f32 1e-05, %v1252_v10  ;;  %v1114_v12 = vsel %vm665_vm1, %v1012_v61, 0.0  ;;  %v5700_v10 = vadd.f32 %v5586_v6, %v5069_v40 }
 0x1ae   : > { %v5690_v3 = vadd.f32 1e-05, %v1251_v52  ;;  %v5695_v14 = vsub.f32 %v9518_v43, %v885_v2  ;;  %v5739_v24 = vadd.f32 %v528_v4, %v5069_v40 }
 0x1af   : > { %v1392_v28 = vmul.f32 %v4713_v54, %v1391_v32  ;;  %4714 = vrsqrt.f32 %v5683_v59  ;;  %vm1413_vm11 = vweird.f32 %v5683_v59 }
 0x1b0   : > { %9519 = vst [vmem:[#allocation14_spill] sm:$0xff] %v5695_v14  ;;  %4716 = vrsqrt.f32 %v5690_v3  ;;  %1115 = vadd.xlane.f32.xlu1 %v1114_v12  ;;  %v1013_v32 = vmul.f32 %v5695_v14, %v5695_v14  ;;  %vm1403_vm13 = vweird.f32 %v5690_v3 }
 0x1b1   : > { %v1396_v45 = vsel %vm1395_vm8, %v4713_v54, %v1392_v28  ;;  %v5725_v28 = vperm.slane %v5708_v21, 2 }
 0x1b2   : > { %v531_v61 = vpop.f32.mrf.mxu0  ;;  %v1071_v6 = vpop.xlane.xlu2 %1070  ;;  %1106 = vadd.xlane.f32.xlu2 %v1105_v15  ;;  %v2018_v52 = vmul.f32 %v1396_v45, %v5288_v29  ;;  %v2082_v45 = vmul.f32 %v5711_v39, %v2017_v44  ;;  %v9521_v44 = vmax.f32 %v5700_v10, 0.0 }
 0x1b3   : > { %v5715_v2 = vadd.f32 %v531_v61, %v5069_v40  ;;  %v1253_v54 = vmul.f32 %v1071_v6, %v5233_v63  ;;  %v5718_v41 = vpop.xlane.xlu1 %838  ;;  %v1074_v16 = vpop.xlane.xlu0 %1073 }
 0x1b4   : > { %9520 = vst [vmem:[#allocation15_spill] sm:$0xff] %v5718_v41  ;;  %v1254_v13 = vmul.f32 %v1074_v16, %v5233_v63  ;;  %v2083_v15 = vmul.f32 %v5711_v39, %v2018_v52  ;;  %v1117_v16 = vsel %vm665_vm1, %v1013_v32, 0.0  ;;  %v762_v52 = vsel %vm665_vm1, %v9521_v44, 0.0 }
 0x1b5   : > { %v4715_v43 = vpop.eup %4714  ;;  %v5728_v12 = vadd.f32 1e-05, %v1253_v54  ;;  %v2147_v19 = vadd.f32 %v5725_v28, %v2082_v45 }
 0x1b6   : > { %v4717_v61 = vpop.eup %4716  ;;  %v1408_v6 = vmul.f32 %v4715_v43, %v5683_v59  ;;  %v5733_v46 = vadd.f32 1e-05, %v1254_v13  ;;  %v9522_v13 = vmax.f32 %v5715_v2, 0.0  ;;  %v2148_v32 = vadd.f32 %v5725_v28, %v2083_v15 }
 0x1b7   : > { %v1398_v58 = vmul.f32 %v4717_v61, %v5690_v3  ;;  %4718 = vrsqrt.f32 %v5728_v12  ;;  %vm1414_vm9 = vweird.f32 %v4715_v43  ;;  %vm1404_vm10 = vweird.f32 %v4717_v61 }
 0x1b8   : > { %v1409_v54 = vmul.f32 %v4715_v43, %v1408_v6  ;;  %4720 = vrsqrt.f32 %v5733_v46  ;;  %1118 = vadd.xlane.f32.xlu1 %v1117_v16  ;;  %v774_v55 = vsel %vm665_vm1, %v9522_v13, 0.0  ;;  %v2211_v44 = vpack.c.bf16 %v2148_v32, %v2147_v19  ;;  %vm1415_vm12 = vmor %vm1413_vm11, %vm1414_vm9 }
 0x1b9   : > { %v1399_v29 = vmul.f32 %v4717_v61, %v1398_v58  ;;  %775 = vadd.xlane.f32.xlu0 %v774_v55  ;;  %v9421_v13 = vmax.f32 %v5739_v24, 0.0  ;;  %vm1405_vm14 = vmor %vm1403_vm13, %vm1404_vm10  ;;  %vm1423_vm3 = vweird.f32 %v5728_v12  ;;  %vm1433_vm5 = vweird.f32 %v5733_v46 }
 0x1ba   : > { %v1410_v49 = vmul.f32 0.5, %v1409_v54  ;;  %v533_v4 = vpop.f32.mrf.mxu0  ;;  %763 = vadd.xlane.f32.xlu2 %v762_v52  ;;  %v5750_v6 = vpop.xlane.xlu2 %1217  ;;  %4615 = vmatmul.msk.bf16.vlgmr.msra.gmra.mxu1 %vm665_vm1, %v2211_v44  ;;  %v9524_v44 = vmax.f32 %v5370_v25, 0.0 }
 0x1bb   : > { %9523 = vst [vmem:[#allocation16_spill] sm:$0xff] %v5750_v6  ;;  %v1400_v16 = vmul.f32 0.5, %v1399_v29  ;;  %v5753_v26 = vadd.f32 %v533_v4, %v5069_v40  ;;  %v731_v58 = vpop.xlane.xlu1 %730  ;;  %v5755_v41 = vpop.xlane.xlu0 %835  ;;  %v771_v59 = vsel %vm665_vm1, %v9421_v13, 0.0 }
 0x1bc   : > { %v1411_v14 = vsub.f32 1.5, %v1410_v49  ;;  %v886_v45 = vmul.f32 %v5233_v63, %v731_v58 }
 0x1bd   : > { %v5759_v15 = vpop.eup %4718  ;;  %v1401_v55 = vsub.f32 1.5, %v1400_v16  ;;  %v9422_v54 = vmax.f32 %v5753_v26, 0.0 }
 0x1be   : > { %v5763_v29 = vpop.eup %4720  ;;  %v1412_v19 = vmul.f32 %v4715_v43, %v1411_v14  ;;  %v1418_v52 = vmul.f32 %v5759_v15, %v5728_v12  ;;  %v5774_v58 = vsub.f32 %v9524_v44, %v886_v45  ;;  %vm1424_vm15 = vweird.f32 %v5759_v15 }
 0x1bf   : > { %v1402_v49 = vmul.f32 %v4717_v61, %v1401_v55  ;;  %v1428_v32 = vmul.f32 %v5763_v29, %v5733_v46  ;;  %v777_v3 = vsel %vm665_vm1, %v9422_v54, 0.0  ;;  %vm1434_vm2 = vweird.f32 %v5763_v29  ;;  %vm5818_vm4 = vmor %vm1423_vm3, %vm1424_vm15 }
 0x1c0   : > { %v1416_v4 = vsel %vm1415_vm12, %v4715_v43, %v1412_v19  ;;  %v1419_v16 = vmul.f32 %v5759_v15, %v1418_v52  ;;  %778 = vadd.xlane.f32.xlu1 %v777_v3  ;;  %vm5826_vm6 = vmor %vm1433_vm5, %vm1434_vm2 }
 0x1c1   : > { %v1406_v14 = vsel %vm1405_vm14, %v4717_v61, %v1402_v49  ;;  %v1429_v55 = vmul.f32 %v5763_v29, %v1428_v32  ;;  %v2020_v43 = vmul.f32 %v1416_v4, %v5330_v38  ;;  %v1014_v4 = vmul.f32 %v5774_v58, %v5774_v58 }
 0x1c2   : > { %v1420_v19 = vmul.f32 0.5, %v1419_v16  ;;  %v536_v52 = vpop.f32.mrf.mxu0  ;;  %772 = vadd.xlane.f32.xlu2 %v771_v59  ;;  %v2019_v25 = vmul.f32 %v1406_v14, %v5326_v42 }
 0x1c3   : > { %v1430_v45 = vmul.f32 0.5, %v1429_v55  ;;  %v5786_v44 = vadd.f32 %v536_v52, %v5069_v40  ;;  %v734_v13 = vpop.xlane.xlu1 %733  ;;  %v737_v61 = vpop.xlane.xlu2 %736  ;;  %v2085_v49 = vmul.f32 %v5711_v39, %v2020_v43  ;;  %v9525_v43 = vmax.f32 %v5409_v31, 0.0 }
 0x1c4   : > { %v1421_v32 = vsub.f32 1.5, %v1420_v19  ;;  %v888_v6 = vmul.f32 %v5233_v63, %v737_v61  ;;  %v1077_v54 = vpop.xlane.xlu0 %1076  ;;  %v2084_v38 = vmul.f32 %v5711_v39, %v2019_v25  ;;  %v887_v59 = vmul.f32 %v5233_v63, %v734_v13 }
 0x1c5   : > { %v1431_v16 = vsub.f32 1.5, %v1430_v45  ;;  %v9423_v42 = vmax.f32 %v5786_v44, 0.0  ;;  %v1255_v14 = vmul.f32 %v1077_v54, %v5233_v63  ;;  %v2150_v55 = vadd.f32 %v5725_v28, %v2085_v49 }
 0x1c6   : > { %v1422_v3 = vmul.f32 %v5759_v15, %v1421_v32  ;;  %v5801_v19 = vsub.f32 %v9525_v43, %v888_v6  ;;  %v2149_v54 = vadd.f32 %v5725_v28, %v2084_v38  ;;  %v9526_v45 = vmax.f32 %v5392_v8, 0.0 }
 0x1c7   : > { %v5803_v52 = vadd.f32 1e-05, %v1255_v14  ;;  %v780_v25 = vsel %vm665_vm1, %v9423_v42, 0.0  ;;  %v1432_v13 = vmul.f32 %v5763_v29, %v1431_v16  ;;  %v1120_v6 = vsel %vm665_vm1, %v1014_v4, 0.0 }
 0x1c8   : > { %781 = vadd.xlane.f32.xlu0 %v780_v25  ;;  %v5814_v31 = vsub.f32 %v9526_v45, %v887_v59  ;;  %v2212_v32 = vpack.c.bf16 %v2150_v55, %v2149_v54  ;;  %v1426_v12 = vsel %vm5818_vm4, %v5759_v15, %v1422_v3  ;;  %v1016_v59 = vmul.f32 %v5801_v19, %v5801_v19 }
 0x1c9   : > { %4722 = vrsqrt.f32 %v5803_v52  ;;  %v1436_v46 = vsel %vm5826_vm6, %v5763_v29, %v1432_v13  ;;  %v2021_v54 = vmul.f32 %v1426_v12, %v5352_v50  ;;  %v9532_v29 = vmax.f32 %v5436_v36, 0.0 }
 0x1ca   : > { %v538_v49 = vpop.f32.mrf.mxu0  ;;  %1121 = vadd.xlane.f32.xlu2 %v1120_v6  ;;  %4616 = vmatmul.msk.bf16.gmra.mxu1 %vm665_vm1, %v2212_v32  ;;  %v1015_v43 = vmul.f32 %v5814_v31, %v5814_v31  ;;  %v1126_v6 = vsel %vm665_vm1, %v1016_v59, 0.0  ;;  %v9535_v42 = vmax.f32 %v5460_v53, 0.0  ;;  %vm1443_vm8 = vweird.f32 %v5803_v52 }
 0x1cb   : > { %v5831_v38 = vadd.f32 %v538_v49, %v5069_v40  ;;  %v740_v4 = vpop.xlane.xlu2 %739  ;;  %v1080_v16 = vpop.xlane.xlu1 %1079  ;;  %v2022_v49 = vmul.f32 %v1436_v46, %v5358_v20  ;;  %v2086_v8 = vmul.f32 %v5711_v39, %v2021_v54 }
 0x1cc   : > { %v889_v14 = vmul.f32 %v5233_v63, %v740_v4  ;;  %v1256_v15 = vmul.f32 %v1080_v16, %v5233_v63  ;;  %v5840_v55 = vpop.xlane.xlu0 %841  ;;  %v1123_v50 = vsel %vm665_vm1, %v1015_v43, 0.0 }
 0x1cd   : > { %9531 = vst [vmem:[#allocation17_spill] sm:$0xff] %v5840_v55  ;;  %v9424_v3 = vmax.f32 %v5831_v38, 0.0  ;;  %v2087_v59 = vmul.f32 %v5711_v39, %v2022_v49 }
 0x1ce   : > { %v5846_v25 = vadd.f32 1e-05, %v1256_v15  ;;  %v5853_v13 = vsub.f32 %v9532_v29, %v889_v14 }
 0x1cf   : > { %v5849_v45 = vpop.eup %4722  ;;  %v783_v61 = vsel %vm665_vm1, %v9424_v3, 0.0 }
 0x1d0   : > { %v1438_v32 = vmul.f32 %v5849_v45, %v5803_v52  ;;  %4724 = vrsqrt.f32 %v5846_v25  ;;  %1127 = vadd.xlane.f32.xlu0 %v1126_v6  ;;  %784 = vadd.xlane.f32.xlu1 %v783_v61  ;;  %v1017_v20 = vmul.f32 %v5853_v13, %v5853_v13  ;;  %vm1444_vm7 = vweird.f32 %v5849_v45 }
 0x1d1   : > { %vm5893_vm9 = vmor %vm1443_vm8, %vm1444_vm7  ;;  %vm1453_vm11 = vweird.f32 %v5846_v25 }
 0x1d2   : > { %v1439_v36 = vmul.f32 %v5849_v45, %v1438_v32  ;;  %1124 = vadd.xlane.f32.xlu2 %v1123_v50  ;;  %v541_v12 = vpop.f32.mrf.mxu0  ;;  %v2151_v32 = vadd.f32 %v5725_v28, %v2086_v8 }
 0x1d3   : > { %v1086_v4 = vpop.xlane.xlu2 %1085  ;;  %v5866_v16 = vpop.xlane.xlu1 %1214  ;;  %v5874_v29 = vadd.f32 %v541_v12, %v5069_v40 }
 0x1d4   : > { %9533 = vst [vmem:[#allocation18_spill] sm:$0xff] %v5866_v16  ;;  %v1440_v46 = vmul.f32 0.5, %v1439_v36  ;;  %v1258_v14 = vmul.f32 %v1086_v4, %v5233_v63  ;;  %v743_v15 = vpop.xlane.xlu0 %742  ;;  %v1129_v36 = vsel %vm665_vm1, %v1017_v20, 0.0  ;;  %v2152_v4 = vadd.f32 %v5725_v28, %v2087_v59 }
 0x1d5   : > { %v890_v43 = vmul.f32 %v5233_v63, %v743_v15  ;;  %9534 = vst [vmem:[#allocation19_spill] sm:$0xff] %v5874_v29 }
 0x1d6   : > { %v4725_v6 = vpop.eup %4724  ;;  %v1441_v61 = vsub.f32 1.5, %v1440_v46  ;;  %v5876_v54 = vadd.f32 1e-05, %v1258_v14  ;;  %v2213_v59 = vpack.c.bf16 %v2152_v4, %v2151_v32  ;;  %v9538_v4 = vmax.f32 %v5874_v29, 0.0 }
 0x1d7   : > { %v1448_v50 = vmul.f32 %v4725_v6, %v5846_v25  ;;  %v5882_v49 = vsub.f32 %v9535_v42, %v890_v43  ;;  %vm1454_vm10 = vweird.f32 %v4725_v6  ;;  %v9544_v29 = vmax.f32 %v5508_v11, 0.0 }
 0x1d8   : > { %v1442_v15 = vmul.f32 %v5849_v45, %v1441_v61  ;;  %4726 = vrsqrt.f32 %v5876_v54  ;;  %1130 = vadd.xlane.f32.xlu0 %v1129_v36  ;;  %vm1455_vm12 = vmor %vm1453_vm11, %vm1454_vm10  ;;  %vm1473_vm14 = vweird.f32 %v5876_v54 }
 0x1d9   : > { %v1449_v12 = vmul.f32 %v4725_v6, %v1448_v50  ;;  %v1018_v46 = vmul.f32 %v5882_v49, %v5882_v49 }
 0x1da   : > { %v543_v53 = vpop.f32.mrf.mxu0  ;;  %v1446_v36 = vsel %vm5893_vm9, %v5849_v45, %v1442_v15  ;;  %4617 = vmatmul.msk.bf16.gmra.mxu1 %vm665_vm1, %v2213_v59  ;;  %v9539_v59 = vmax.f32 %v5484_v5, 0.0 }
 0x1db   : > { %v1450_v20 = vmul.f32 0.5, %v1449_v12  ;;  %v1089_v14 = vpop.xlane.xlu2 %1088  ;;  %v1083_v43 = vpop.xlane.xlu1 %1082  ;;  %v1132_v61 = vsel %vm665_vm1, %v1018_v46, 0.0  ;;  %v5899_v50 = vadd.f32 %v543_v53, %v5069_v40  ;;  %v786_v12 = vsel %vm665_vm1, %v9538_v4, 0.0 }
 0x1dc   : > { %v1259_v52 = vmul.f32 %v1089_v14, %v5233_v63  ;;  %v1257_v3 = vmul.f32 %v1083_v43, %v5233_v63  ;;  %1133 = vadd.xlane.f32.xlu1 %v1132_v61  ;;  %v746_v8 = vpop.xlane.xlu0 %745 }
 0x1dd   : > { %v1451_v16 = vsub.f32 1.5, %v1450_v20  ;;  %v891_v32 = vmul.f32 %v5233_v63, %v746_v8  ;;  %v9425_v53 = vmax.f32 %v5899_v50, 0.0  ;;  %v2023_v8 = vmul.f32 %v1446_v36, %v5401_v60 }
 0x1de   : > { %v4727_v46 = vpop.eup %4726  ;;  %v5912_v45 = vadd.f32 1e-05, %v1259_v52  ;;  %v5914_v15 = vadd.f32 1e-05, %v1257_v3 }
 0x1df   : > { %v1452_v42 = vmul.f32 %v4725_v6, %v1451_v16  ;;  %v1468_v20 = vmul.f32 %v4727_v46, %v5876_v54  ;;  %v5920_v14 = vsub.f32 %v9539_v59, %v891_v32  ;;  %v789_v3 = vsel %vm665_vm1, %v9425_v53, 0.0 }
 0x1e0   : > { %4728 = vrsqrt.f32 %v5912_v45  ;;  %787 = vadd.xlane.f32.xlu0 %v786_v12  ;;  %v2088_v36 = vmul.f32 %v5711_v39, %v2023_v8  ;;  %vm1474_vm13 = vweird.f32 %v4727_v46  ;;  %vm1463_vm3 = vweird.f32 %v5914_v15 }
 0x1e1   : > { %v1456_v25 = vsel %vm1455_vm12, %v4725_v6, %v1452_v42  ;;  %v1469_v43 = vmul.f32 %v4727_v46, %v1468_v20  ;;  %4730 = vrsqrt.f32 %v5914_v15  ;;  %v1019_v60 = vmul.f32 %v5920_v14, %v5920_v14  ;;  %vm5952_vm15 = vmor %vm1473_vm14, %vm1474_vm13 }
 0x1e2   : > { %v546_v16 = vpop.f32.mrf.mxu0  ;;  %v2024_v61 = vmul.f32 %v1456_v25, %v5424_v0  ;;  %v2153_v8 = vadd.f32 %v5725_v28, %v2088_v36  ;;  %vm1483_vm9 = vweird.f32 %v5912_v45 }
 0x1e3   : > { %v1470_v5 = vmul.f32 0.5, %v1469_v43  ;;  %v5929_v52 = vpop.xlane.xlu1 %844  ;;  %v5937_v42 = vadd.f32 %v546_v16, %v5069_v40  ;;  %v1135_v43 = vsel %vm665_vm1, %v1019_v60, 0.0 }
 0x1e4   : > { %9540 = vst [vmem:[#allocation20_spill] sm:$0xff] %v5929_v52  ;;  %790 = vadd.xlane.f32.xlu1 %v789_v3  ;;  %v1092_v6 = vpop.xlane.xlu0 %1091  ;;  %v2089_v32 = vmul.f32 %v5711_v39, %v2024_v61 }
 0x1e5   : > { %v1471_v4 = vsub.f32 1.5, %v1470_v5  ;;  %v1260_v12 = vmul.f32 %v1092_v6, %v5233_v63 }
 0x1e6   : > { %v5939_v20 = vpop.eup %4728  ;;  %v2154_v0 = vadd.f32 %v5725_v28, %v2089_v32 }
 0x1e7   : > { %v4731_v59 = vpop.eup %4730  ;;  %v5942_v25 = vadd.f32 1e-05, %v1260_v12  ;;  %v1472_v3 = vmul.f32 %v4727_v46, %v1471_v4  ;;  %v1478_v6 = vmul.f32 %v5939_v20, %v5912_v45  ;;  %vm1484_vm6 = vweird.f32 %v5939_v20 }
 0x1e8   : > { %v1458_v61 = vmul.f32 %v4731_v59, %v5914_v15  ;;  %1136 = vadd.xlane.f32.xlu0 %v1135_v43  ;;  %v2214_v5 = vpack.c.bf16 %v2154_v0, %v2153_v8  ;;  %v9543_v0 = vmax.f32 %v5937_v42, 0.0  ;;  %vm1464_vm2 = vweird.f32 %v4731_v59  ;;  %vm1485_vm10 = vmor %vm1483_vm9, %vm1484_vm6 }
 0x1e9   : > { %4732 = vrsqrt.f32 %v5942_v25  ;;  %v1476_v4 = vsel %vm5952_vm15, %v4727_v46, %v1472_v3  ;;  %vm1465_vm4 = vmor %vm1463_vm3, %vm1464_vm2  ;;  %vm1493_vm7 = vweird.f32 %v5942_v25 }
 0x1ea   : > { %v1459_v32 = vmul.f32 %v4731_v59, %v1458_v61  ;;  %v548_v12 = vpop.f32.mrf.mxu0  ;;  %4618 = vmatmul.msk.bf16.gmra.mxu1 %vm665_vm1, %v2214_v5  ;;  %v792_v8 = vsel %vm665_vm1, %v9543_v0, 0.0  ;;  %v1479_v61 = vmul.f32 %v5939_v20, %v1478_v6 }
 0x1eb   : > { %v749_v36 = vpop.xlane.xlu1 %748 }
 0x1ec   : > { %v1460_v43 = vmul.f32 0.5, %v1459_v32  ;;  %v892_v53 = vmul.f32 %v5233_v63, %v749_v36  ;;  %v1095_v16 = vpop.xlane.xlu0 %1094  ;;  %v5972_v32 = vadd.f32 %v548_v12, %v5069_v40  ;;  %v1480_v11 = vmul.f32 0.5, %v1479_v61 }
 0x1ed   : > { %v1261_v54 = vmul.f32 %v1095_v16, %v5233_v63  ;;  %v2026_v16 = vmul.f32 %v1476_v4, %v5451_v47 }
 0x1ee   : > { %v1461_v52 = vsub.f32 1.5, %v1460_v43  ;;  %v5967_v60 = vsub.f32 %v9544_v29, %v892_v53  ;;  %9545 = vst [vmem:[#allocation21_spill] sm:$0xff] %v5972_v32  ;;  %v1481_v61 = vsub.f32 1.5, %v1480_v11 }
 0x1ef   : > { %v4733_v46 = vpop.eup %4732  ;;  %v5969_v3 = vadd.f32 1e-05, %v1261_v54  ;;  %v2091_v4 = vmul.f32 %v5711_v39, %v2026_v16 }
 0x1f0   : > { %v1462_v5 = vmul.f32 %v4731_v59, %v1461_v52  ;;  %v1488_v36 = vmul.f32 %v4733_v46, %v5942_v25  ;;  %793 = vadd.xlane.f32.xlu0 %v792_v8  ;;  %v1020_v6 = vmul.f32 %v5967_v60, %v5967_v60  ;;  %vm1494_vm5 = vweird.f32 %v4733_v46 }
 0x1f1   : > { %4734 = vrsqrt.f32 %v5969_v3  ;;  %v2156_v15 = vadd.f32 %v5725_v28, %v2091_v4  ;;  %vm1495_vm8 = vmor %vm1493_vm7, %vm1494_vm5  ;;  %vm1503_vm12 = vweird.f32 %v5969_v3 }
 0x1f2   : > { %v1466_v29 = vsel %vm1465_vm4, %v4731_v59, %v1462_v5  ;;  %v1489_v53 = vmul.f32 %v4733_v46, %v1488_v36  ;;  %v1138_v12 = vsel %vm665_vm1, %v1020_v6, 0.0  ;;  %v5981_v43 = vpop.f32.mrf.mxu0  ;;  %v9546_v5 = vmax.f32 %v5524_v48, 0.0 }
 0x1f3   : > { %v752_v47 = vpop.xlane.xlu1 %751  ;;  %1139 = vadd.xlane.f32.xlu1 %v1138_v12  ;;  %v2025_v52 = vmul.f32 %v1466_v29, %v5470_v9  ;;  %v9547_v9 = vmax.f32 %v5972_v32, 0.0 }
 0x1f4   : > { %v1490_v54 = vmul.f32 0.5, %v1489_v53  ;;  %v893_v0 = vmul.f32 %v5233_v63, %v752_v47  ;;  %v1482_v47 = vmul.f32 %v5939_v20, %v1481_v61 }
 0x1f5   : > { %v2090_v8 = vmul.f32 %v5711_v39, %v2025_v52  ;;  %v795_v16 = vsel %vm665_vm1, %v9547_v9, 0.0 }
 0x1f6   : > { %v1491_v59 = vsub.f32 1.5, %v1490_v54  ;;  %v5990_v36 = vsub.f32 %v9546_v5, %v893_v0  ;;  %v6009_v54 = vpop.xlane.xlu0 %847  ;;  %v1486_v25 = vsel %vm1485_vm10, %v5939_v20, %v1482_v47 }
 0x1f7   : > { %v5992_v6 = vpop.eup %4734  ;;  %v2155_v12 = vadd.f32 %v5725_v28, %v2090_v8  ;;  %v2027_v9 = vmul.f32 %v1486_v25, %v5475_v62 }
 0x1f8   : > { %v1492_v29 = vmul.f32 %v4733_v46, %v1491_v59  ;;  %v1498_v11 = vmul.f32 %v5992_v6, %v5969_v3  ;;  %v1021_v48 = vmul.f32 %v5990_v36, %v5990_v36  ;;  %vm1504_vm11 = vweird.f32 %v5992_v6 }
 0x1f9   : > { %v2215_v53 = vpack.c.bf16 %v2156_v15, %v2155_v12  ;;  %v2092_v20 = vmul.f32 %v5711_v39, %v2027_v9  ;;  %vm1505_vm13 = vmor %vm1503_vm12, %vm1504_vm11 }
 0x1fa   : > { %v1141_v52 = vsel %vm665_vm1, %v1021_v48, 0.0  ;;  %v6007_v4 = vpop.f32.mrf.mxu0  ;;  %v1496_v8 = vsel %vm1495_vm8, %v4733_v46, %v1492_v29  ;;  %v1499_v15 = vmul.f32 %v5992_v6, %v1498_v11 }
 0x1fb   : > { %1142 = vadd.xlane.f32.xlu2 %v1141_v52  ;;  %v1098_v0 = vpop.xlane.xlu1 %1097  ;;  %796 = vadd.xlane.f32.xlu1 %v795_v16  ;;  %v2028_v5 = vmul.f32 %v1496_v8, %v5497_v27  ;;  %v9549_v27 = vmax.f32 %v5555_v35, 0.0  ;;  %v292_v8 = vld [vmem:[%s5027_s26 + $0x1f8] sm:$0xff]  ;;  %v2157_v35 = vadd.f32 %v5725_v28, %v2092_v20 }
 0x1fc   : > { %v1262_v61 = vmul.f32 %v1098_v0, %v5233_v63  ;;  %4619 = vmatmul.msk.bf16.gmra.mxu1 %vm665_vm1, %v2215_v53  ;;  %v1500_v12 = vmul.f32 0.5, %v1499_v15  ;;  %v291_v0 = vld [vmem:[%s5027_s26 + $0x1f0] sm:$0xff] }
 0x1fd   : > { %v2093_v46 = vmul.f32 %v5711_v39, %v2028_v5  ;;  %v324_v5 = vpack.c.bf16 %v292_v8, %v291_v0 }
 0x1fe   : > { %v1326_v59 = vadd.f32 1e-05, %v1262_v61  ;;  %v1501_v16 = vsub.f32 1.5, %v1500_v12 }
 0x1ff   : > { %v2158_v62 = vadd.f32 %v5725_v28, %v2093_v46  ;;  %4606 = vmatmul.msk.bf16.gmra.mxu3 %vm335_vm0, %v324_v5 }
 0x200   : > { %4736 = vrsqrt.f32 %v1326_v59  ;;  %v1502_v15 = vmul.f32 %v5992_v6, %v1501_v16  ;;  %vm1513_vm15 = vweird.f32 %v1326_v59 }
 0x201   : > { %v2216_v46 = vpack.c.bf16 %v2158_v62, %v2157_v35  ;;  %v9552_v62 = vmax.f32 %v5579_v37, 0.0 }
 0x202   : > { %v6020_v11 = vpop.f32.mrf.mxu0  ;;  %v1506_v16 = vsel %vm1505_vm13, %v5992_v6, %v1502_v15 }
 0x203   : > { %v761_v45 = vpop.xlane.xlu0 %760  ;;  %v2029_v8 = vmul.f32 %v1506_v16, %v5517_v17 }
 0x204   : > { %v896_v29 = vmul.f32 %v5233_v63, %v761_v45 }
 0x205   : > { %v6022_v48 = vpop.xlane.xlu2 %1223 }
 0x206   : > { %9548 = vst [vmem:[#allocation22_spill] sm:$0xff] %v6022_v48  ;;  %v4737_v53 = vpop.eup %4736  ;;  %v6027_v47 = vsub.f32 %v9549_v27, %v896_v29 }
 0x207   : > { %v1508_v52 = vmul.f32 %v4737_v53, %v1326_v59  ;;  %vm1514_vm14 = vweird.f32 %v4737_v53 }
 0x208   : > { %v6034_v61 = vpop.xlane.xlu1 %1220  ;;  %v1024_v25 = vmul.f32 %v6027_v47, %v6027_v47  ;;  %vm1515_vm0 = vmor %vm1513_vm15, %vm1514_vm14 }
 0x209   : > { %9550 = vst [vmem:[#allocation23_spill] sm:$0xff] %v6034_v61  ;;  %v1509_v12 = vmul.f32 %v4737_v53, %v1508_v52 }
 0x20a   : > { %v1150_v9 = vsel %vm665_vm1, %v1024_v25, 0.0  ;;  %v6045_v0 = vpop.f32.mrf.mxu0 }
 0x20b   : > { %v1510_v45 = vmul.f32 0.5, %v1509_v12  ;;  %1151 = vadd.xlane.f32.xlu2 %v1150_v9  ;;  %9551 = vst [vmem:[#allocation24_spill] sm:$0xff] %v6045_v0 }
 0x20c   : > { %4620 = vmatmul.msk.bf16.gmra.mxu1 %vm665_vm1, %v2216_v46 }
 0x20d   : > { %v1511_v29 = vsub.f32 1.5, %v1510_v45  ;;  %v755_v27 = vpop.xlane.xlu2 %754  ;;  %v1110_v52 = vpop.xlane.xlu0 %1109  ;;  %v2094_v45 = vmul.f32 %v5711_v39, %v2029_v8  ;;  %v9554_v8 = vmax.f32 %v5623_v30, 0.0 }
 0x20e   : > { %v894_v20 = vmul.f32 %v5233_v63, %v755_v27 }
 0x20f   : > { %v1512_v3 = vmul.f32 %v4737_v53, %v1511_v29  ;;  %v2159_v27 = vadd.f32 %v5725_v28, %v2094_v45 }
 0x210   : > { %v6050_v25 = vsub.f32 %v9552_v62, %v894_v20  ;;  %v1101_v6 = vpop.xlane.xlu1 %1100  ;;  %v9553_v20 = vmax.f32 %v5612_v33, 0.0 }
 0x211   : > { %v1516_v15 = vsel %vm1515_vm0, %v4737_v53, %v1512_v3  ;;  %v1263_v5 = vmul.f32 %v1101_v6, %v5233_v63 }
 0x212   : > { %v1022_v12 = vmul.f32 %v6050_v25, %v6050_v25  ;;  %v2030_v35 = vmul.f32 %v1516_v15, %v5547_v23  ;;  %v1266_v23 = vmul.f32 %v1110_v52, %v5233_v63  ;;  %v561_v6 = vpop.f32.mrf.mxu0 }
 0x213   : > { %v1327_v9 = vadd.f32 1e-05, %v1263_v5  ;;  %v6079_v52 = vadd.f32 %v561_v6, %v5069_v40 }
 0x214   : > { %v1144_v59 = vsel %vm665_vm1, %v1022_v12, 0.0  ;;  %v2095_v17 = vmul.f32 %v5711_v39, %v2030_v35  ;;  %v6081_v33 = vadd.f32 1e-05, %v1266_v23 }
 0x215   : > { %4738 = vrsqrt.f32 %v1327_v9  ;;  %v758_v37 = vpop.xlane.xlu2 %757  ;;  %1145 = vadd.xlane.f32.xlu0 %v1144_v59  ;;  %v767_v46 = vpop.xlane.xlu0 %766  ;;  %vm1523_vm3 = vweird.f32 %v1327_v9 }
 0x216   : > { %v895_v53 = vmul.f32 %v5233_v63, %v758_v37  ;;  %v898_v16 = vmul.f32 %v5233_v63, %v767_v46  ;;  %v2160_v29 = vadd.f32 %v5725_v28, %v2095_v17  ;;  %4740 = vrsqrt.f32 %v6081_v33 }
 0x217   : > { %vm1553_vm12 = vweird.f32 %v6081_v33 }
 0x218   : > { %v6066_v3 = vsub.f32 %v9553_v20, %v895_v53  ;;  %v6070_v62 = vsub.f32 %v9554_v8, %v898_v16  ;;  %v2217_v15 = vpack.c.bf16 %v2160_v29, %v2159_v27  ;;  %v9427_v16 = vmax.f32 %v6079_v52, 0.0 }
 0x21a   : > { %v1023_v5 = vmul.f32 %v6066_v3, %v6066_v3  ;;  %v1026_v12 = vmul.f32 %v6070_v62, %v6070_v62  ;;  %v810_v20 = vsel %vm665_vm1, %v9427_v16, 0.0 }
 0x21b   : > { %v4739_v35 = vpop.eup %4738  ;;  %v6076_v45 = vpop.xlane.xlu1 %769 }
 0x21c   : > { %v1518_v59 = vmul.f32 %v4739_v35, %v1327_v9  ;;  %4621 = vmatmul.msk.bf16.gmra.mxu1 %vm665_vm1, %v2217_v15  ;;  %v1147_v17 = vsel %vm665_vm1, %v1023_v5, 0.0  ;;  %v1156_v37 = vsel %vm665_vm1, %v1026_v12, 0.0  ;;  %v6092_v5 = vpop.eup %4740  ;;  %vm1524_vm2 = vweird.f32 %v4739_v35 }
 0x21d   : > { %v1104_v30 = vpop.xlane.xlu2 %1103  ;;  %1148 = vadd.xlane.f32.xlu1 %v1147_v17  ;;  %1157 = vadd.xlane.f32.xlu0 %v1156_v37  ;;  %v1113_v6 = vpop.xlane.xlu0 %1112  ;;  %vm1525_vm4 = vmor %vm1523_vm3, %vm1524_vm2  ;;  %vm1554_vm8 = vweird.f32 %v6092_v5 }
 0x21e   : > { %v1519_v46 = vmul.f32 %v4739_v35, %v1518_v59  ;;  %v1264_v53 = vmul.f32 %v1104_v30, %v5233_v63  ;;  %v1267_v17 = vmul.f32 %v1113_v6, %v5233_v63  ;;  %vm6175_vm13 = vmor %vm1553_vm12, %vm1554_vm8 }
 0x220   : > { %v1328_v29 = vadd.f32 1e-05, %v1264_v53  ;;  %v1520_v27 = vmul.f32 0.5, %v1519_v46  ;;  %v1548_v46 = vmul.f32 %v6092_v5, %v6081_v33 }
 0x222   : > { %4742 = vrsqrt.f32 %v1328_v29  ;;  %v1521_v8 = vsub.f32 1.5, %v1520_v27  ;;  %vm1533_vm6 = vweird.f32 %v1328_v29 }
 0x223   : > { %v1116_v23 = vpop.xlane.xlu1 %1115 }
 0x224   : > { %v1268_v12 = vmul.f32 %v1116_v23, %v5233_v63  ;;  %v1522_v53 = vmul.f32 %v4739_v35, %v1521_v8  ;;  %v6101_v23 = vadd.f32 1e-05, %v1267_v17 }
 0x225   : > { %v1107_v15 = vpop.xlane.xlu2 %1106  ;;  %811 = vadd.xlane.f32.xlu1 %v810_v20  ;;  %v1549_v20 = vmul.f32 %v6092_v5, %v1548_v46  ;;  %v563_v46 = vpop.f32.mrf.mxu0 }
 0x226   : > { %v1265_v59 = vmul.f32 %v1107_v15, %v5233_v63  ;;  %v6099_v27 = vadd.f32 1e-05, %v1268_v12  ;;  %v1526_v15 = vsel %vm1525_vm4, %v4739_v35, %v1522_v53  ;;  %vm1563_vm3 = vweird.f32 %v6101_v23 }
 0x227   : > { %v2031_v9 = vmul.f32 %v1526_v15, %v5593_v7 }
 0x228   : > { %v4743_v30 = vpop.eup %4742  ;;  %v1329_v37 = vadd.f32 1e-05, %v1265_v59  ;;  %vm1573_vm15 = vweird.f32 %v6099_v27 }
 0x229   : > { %v1528_v16 = vmul.f32 %v4743_v30, %v1328_v29  ;;  %vm1534_vm5 = vweird.f32 %v4743_v30 }
 0x22a   : > { %4744 = vrsqrt.f32 %v1329_v37  ;;  %vm1535_vm7 = vmor %vm1533_vm6, %vm1534_vm5  ;;  %vm1543_vm10 = vweird.f32 %v1329_v37 }
 0x22b   : > { %v1529_v48 = vmul.f32 %v4743_v30, %v1528_v16  ;;  %4746 = vrsqrt.f32 %v6099_v27  ;;  %v1550_v16 = vmul.f32 0.5, %v1549_v20  ;;  %v2096_v20 = vmul.f32 %v5711_v39, %v2031_v9 }
 0x22c   : > { %4748 = vrsqrt.f32 %v6101_v23  ;;  %v6116_v55 = vpop.xlane.xlu0 %775 }
 0x22d   : > { %v1530_v61 = vmul.f32 0.5, %v1529_v48  ;;  %v764_v6 = vpop.xlane.xlu2 %763  ;;  %v9555_v48 = vmax.f32 %v5700_v10, 0.0  ;;  %v6126_v10 = vadd.f32 %v5981_v43, %v5069_v40  ;;  %v1551_v15 = vsub.f32 1.5, %v1550_v16 }
 0x22e   : > { %v897_v59 = vmul.f32 %v5233_v63, %v764_v6  ;;  %v1119_v6 = vpop.xlane.xlu1 %1118  ;;  %v6141_v16 = vperm.slane %v5708_v21, 3  ;;  %v899_v21 = vmul.f32 %v5233_v63, %v6076_v45 }
 0x22f   : > { %v1531_v8 = vsub.f32 1.5, %v1530_v61  ;;  %9556 = vst [vmem:[#allocation25_spill] sm:$0xff] %v6126_v10 }
 0x230   : > { %v6106_v32 = vpop.eup %4744  ;;  %v6113_v35 = vsub.f32 %v9555_v48, %v897_v59 }
 0x231   : > { %v1532_v12 = vmul.f32 %v4743_v30, %v1531_v8  ;;  %v1538_v17 = vmul.f32 %v6106_v32, %v1329_v37  ;;  %v6118_v0 = vpop.eup %4746  ;;  %vm1544_vm9 = vweird.f32 %v6106_v32 }
 0x232   : > { %v1025_v7 = vmul.f32 %v6113_v35, %v6113_v35  ;;  %v6129_v8 = vpop.eup %4748  ;;  %v1568_v43 = vmul.f32 %v6118_v0, %v6099_v27  ;;  %vm6156_vm11 = vmor %vm1543_vm10, %vm1544_vm9  ;;  %vm1574_vm14 = vweird.f32 %v6118_v0 }
 0x233   : > { %v1536_v53 = vsel %vm1535_vm7, %v4743_v30, %v1532_v12  ;;  %v1539_v61 = vmul.f32 %v6106_v32, %v1538_v17  ;;  %v6132_v12 = vadd.f32 %v563_v46, %v5069_v40  ;;  %v9557_v46 = vmax.f32 %v5739_v24, 0.0  ;;  %vm6251_vm2 = vmor %vm1573_vm15, %vm1574_vm14 }
 0x234   : > { %v2032_v29 = vmul.f32 %v1536_v53, %v5636_v18  ;;  %v1153_v18 = vsel %vm665_vm1, %v1025_v7, 0.0  ;;  %v1269_v53 = vmul.f32 %v1119_v6, %v5233_v63  ;;  %v2161_v7 = vadd.f32 %v5725_v28, %v2096_v20 }
 0x235   : > { %v1540_v30 = vmul.f32 0.5, %v1539_v61  ;;  %v773_v59 = vpop.xlane.xlu2 %772  ;;  %1154 = vadd.xlane.f32.xlu2 %v1153_v18  ;;  %v9563_v24 = vmax.f32 %v5642_v22, 0.0  ;;  %vm1564_vm0 = vweird.f32 %v6129_v8 }
 0x236   : > { %v900_v17 = vmul.f32 %v5233_v63, %v773_v59  ;;  %v2097_v9 = vmul.f32 %v5711_v39, %v2032_v29  ;;  %v1552_v59 = vmul.f32 %v6092_v5, %v1551_v15  ;;  %vm6264_vm4 = vmor %vm1563_vm3, %vm1564_vm0 }
 0x237   : > { %v1541_v48 = vsub.f32 1.5, %v1540_v30  ;;  %v1558_v30 = vmul.f32 %v6129_v8, %v6101_v23  ;;  %v2365_v20 = vpop.f32.mrf.mxu1 }
 0x238   : > { %v6146_v61 = vsub.f32 %v9557_v46, %v900_v17  ;;  %v2162_v29 = vadd.f32 %v5725_v28, %v2097_v9  ;;  %v1569_v9 = vmul.f32 %v6118_v0, %v1568_v43  ;;  %v6169_v45 = vadd.f32 %v2365_v20, %v6141_v16  ;;  %v593_v46 = vpop.f32.mrf.mxu3 }
 0x239   : > { %v1542_v18 = vmul.f32 %v6106_v32, %v1541_v48  ;;  %v1559_v43 = vmul.f32 %v6129_v8, %v1558_v30 }
 0x23a   : > { %9558 = vst [vmem:[#allocation26_spill] sm:$0xff] %v6146_v61  ;;  %v2218_v17 = vpack.c.bf16 %v2162_v29, %v2161_v7  ;;  %v1028_v15 = vmul.f32 %v6146_v61, %v6146_v61  ;;  %v6179_v29 = vadd.f32 1e-05, %v1269_v53  ;;  %v9430_v6 = vmax.f32 %v6169_v45, 0.0 }
 0x23b   : > { %v1546_v37 = vsel %vm6156_vm11, %v6106_v32, %v1542_v18  ;;  %v6171_v48 = vpop.xlane.xlu0 %781  ;;  %v1556_v32 = vsel %vm6175_vm13, %v6092_v5, %v1552_v59  ;;  %v779_v18 = vpop.xlane.xlu1 %778  ;;  %v6190_v61 = vsub.f32 %v9563_v24, %v899_v21  ;;  %v6198_v5 = vadd.f32 %v593_v46, %v5069_v40 }
 0x23c   : > { %4622 = vmatmul.msk.bf16.gmra.mxu1 %vm665_vm1, %v2218_v17  ;;  %v1162_v33 = vsel %vm665_vm1, %v1028_v15, 0.0  ;;  %v9564_v17 = vmax.f32 %v6132_v12, 0.0  ;;  %v2033_v7 = vmul.f32 %v1546_v37, %v5667_v57  ;;  %v9431_v59 = vmax.f32 %v6126_v10, 0.0 }
 0x23d   : > { %v1122_v20 = vpop.xlane.xlu2 %1121  ;;  %1163 = vadd.xlane.f32.xlu0 %v1162_v33  ;;  %v1570_v30 = vmul.f32 0.5, %v1569_v9  ;;  %v2589_v22 = vsel %vm665_vm1, %v9430_v6, 0.0  ;;  %4750 = vrsqrt.f32 %v6179_v29  ;;  %v902_v21 = vmul.f32 %v5233_v63, %v779_v18 }
 0x23e   : > { %v1270_v53 = vmul.f32 %v1122_v20, %v5233_v63  ;;  %v813_v15 = vsel %vm665_vm1, %v9564_v17, 0.0  ;;  %2590 = vadd.xlane.f32.xlu1 %v2589_v22  ;;  %v2034_v57 = vmul.f32 %v1556_v32, %v5600_v34  ;;  %v1560_v37 = vmul.f32 0.5, %v1559_v43 }
 0x23f   : > { %814 = vadd.xlane.f32.xlu2 %v813_v15  ;;  %v901_v46 = vmul.f32 %v5233_v63, %v6116_v55  ;;  %v2367_v9 = vpop.f32.mrf.mxu1  ;;  %v1027_v33 = vmul.f32 %v6190_v61, %v6190_v61  ;;  %v2098_v20 = vmul.f32 %v5711_v39, %v2033_v7  ;;  %v1571_v18 = vsub.f32 1.5, %v1570_v30 }
 0x240   : > { %v6206_v24 = vadd.f32 1e-05, %v1270_v53  ;;  %v9565_v53 = vmax.f32 %v5753_v26, 0.0  ;;  %v798_v34 = vsel %vm665_vm1, %v9431_v59, 0.0  ;;  %v2099_v55 = vmul.f32 %v5711_v39, %v2034_v57 }
 0x241   : > { %v1561_v32 = vsub.f32 1.5, %v1560_v37  ;;  %v9566_v7 = vmax.f32 %v5715_v2, 0.0  ;;  %v1159_v30 = vsel %vm665_vm1, %v1027_v33, 0.0  ;;  %v9567_v57 = vmax.f32 %v6198_v5, 0.0 }
 0x242   : > { %4752 = vrsqrt.f32 %v6206_v24  ;;  %v6218_v15 = vsub.f32 %v9565_v53, %v902_v21  ;;  %v2163_v21 = vadd.f32 %v5725_v28, %v2098_v20  ;;  %v1572_v53 = vmul.f32 %v6118_v0, %v1571_v18 }
 0x243   : > { %v1128_v43 = vpop.xlane.xlu0 %1127  ;;  %v6224_v6 = vpop.eup %4750  ;;  %v6228_v17 = vsub.f32 %v9566_v7, %v901_v46  ;;  %v849_v37 = vsel %vm665_vm1, %v9567_v57, 0.0  ;;  %v2164_v46 = vadd.f32 %v5725_v28, %v2099_v55  ;;  %v1562_v20 = vmul.f32 %v6129_v8, %v1561_v32 }
 0x244   : > { %v1272_v2 = vmul.f32 %v1128_v43, %v5233_v63  ;;  %v1030_v33 = vmul.f32 %v6218_v15, %v6218_v15  ;;  %v1578_v18 = vmul.f32 %v6224_v6, %v6179_v29  ;;  %v1576_v32 = vsel %vm6251_vm2, %v6118_v0, %v1572_v53 }
 0x245   : > { %v1125_v22 = vpop.xlane.xlu2 %1124  ;;  %799 = vadd.xlane.f32.xlu0 %v798_v34  ;;  %v2219_v7 = vpack.c.bf16 %v2164_v46, %v2163_v21  ;;  %v1566_v0 = vsel %vm6264_vm4, %v6129_v8, %v1562_v20  ;;  %v6280_v46 = vadd.f32 %v2367_v9, %v6141_v16  ;;  %v903_v9 = vmul.f32 %v5233_v63, %v6171_v48 }
 0x246   : > { %v1271_v26 = vmul.f32 %v1125_v22, %v5233_v63  ;;  %850 = vadd.xlane.f32.xlu1 %v849_v37  ;;  %v785_v37 = vpop.xlane.xlu1 %784  ;;  %v1168_v23 = vsel %vm665_vm1, %v1030_v33, 0.0  ;;  %v1579_v53 = vmul.f32 %v6224_v6, %v1578_v18  ;;  %v2035_v59 = vmul.f32 %v1566_v0, %v5652_v1 }
 0x247   : > { %1160 = vadd.xlane.f32.xlu2 %v1159_v30  ;;  %v2370_v55 = vpop.f32.mrf.mxu1  ;;  %v1029_v30 = vmul.f32 %v6228_v17, %v6228_v17  ;;  %v904_v33 = vmul.f32 %v5233_v63, %v785_v37  ;;  %vm1584_vm6 = vweird.f32 %v6224_v6  ;;  %vm1593_vm7 = vweird.f32 %v6206_v24 }
 0x248   : > { %v6238_v34 = vpop.eup %4752  ;;  %v6255_v43 = vadd.f32 1e-05, %v1271_v26  ;;  %v6268_v26 = vadd.f32 1e-05, %v1272_v2  ;;  %v6271_v21 = vadd.f32 %v2370_v55, %v6141_v16  ;;  %v1580_v20 = vmul.f32 0.5, %v1579_v53 }
 0x249   : > { %v1588_v22 = vmul.f32 %v6238_v34, %v6206_v24  ;;  %v1165_v2 = vsel %vm665_vm1, %v1029_v30, 0.0  ;;  %v9433_v55 = vmax.f32 %v6280_v46, 0.0  ;;  %v2100_v0 = vmul.f32 %v5711_v39, %v2035_v59 }
 0x24a   : > { %4754 = vrsqrt.f32 %v6255_v43  ;;  %v9435_v8 = vmax.f32 %v6271_v21, 0.0  ;;  %v1581_v53 = vsub.f32 1.5, %v1580_v20  ;;  %v6320_v59 = vadd.f32 %v6007_v4, %v5069_v40 }
 0x24b   : > { %v1589_v57 = vmul.f32 %v6238_v34, %v1588_v22  ;;  %v2036_v22 = vmul.f32 %v1576_v32, %v5658_v51  ;;  %4756 = vrsqrt.f32 %v6268_v26  ;;  %v1131_v18 = vpop.xlane.xlu0 %1130  ;;  %vm1594_vm5 = vweird.f32 %v6238_v34 }
 0x24c   : > { %4623 = vmatmul.msk.bf16.gmra.mxu1 %vm665_vm1, %v2219_v7  ;;  %v2595_v48 = vsel %vm665_vm1, %v9435_v8, 0.0  ;;  %vm6338_vm8 = vmor %vm1593_vm7, %vm1594_vm5  ;;  %vm1583_vm9 = vweird.f32 %v6179_v29  ;;  %vm1603_vm13 = vweird.f32 %v6255_v43  ;;  %vm1613_vm15 = vweird.f32 %v6268_v26 }
 0x24d   : > { %1169 = vadd.xlane.f32.xlu0 %v1168_v23  ;;  %v1590_v27 = vmul.f32 0.5, %v1589_v57  ;;  %v2101_v51 = vmul.f32 %v5711_v39, %v2036_v22  ;;  %v9572_v23 = vmax.f32 %v5831_v38, 0.0  ;;  %vm6358_vm10 = vmor %vm1583_vm9, %vm1584_vm6 }
 0x24f   : > { %1166 = vadd.xlane.f32.xlu2 %v1165_v2  ;;  %v2372_v7 = vpop.f32.mrf.mxu1  ;;  %v1591_v30 = vsub.f32 1.5, %v1590_v27  ;;  %v1134_v32 = vpop.xlane.xlu1 %1133  ;;  %v6300_v1 = vsub.f32 %v9572_v23, %v904_v33  ;;  %v9573_v27 = vmax.f32 %v5786_v44, 0.0  ;;  %v2592_v33 = vsel %vm665_vm1, %v9433_v55, 0.0 }
 0x250   : > { %v6294_v57 = vadd.f32 %v2372_v7, %v6141_v16  ;;  %v6296_v37 = vpop.eup %4754  ;;  %v1274_v38 = vmul.f32 %v1134_v32, %v5233_v63  ;;  %v2166_v23 = vadd.f32 %v5725_v28, %v2101_v51  ;;  %v2165_v51 = vadd.f32 %v5725_v28, %v2100_v0 }
 0x251   : > { %v6307_v22 = vpop.eup %4756  ;;  %v6311_v7 = vsub.f32 %v9573_v27, %v903_v9  ;;  %v1592_v20 = vmul.f32 %v6238_v34, %v1591_v30  ;;  %v1598_v44 = vmul.f32 %v6296_v37, %v6255_v43  ;;  %v1273_v9 = vmul.f32 %v1131_v18, %v5233_v63 }
 0x252   : > { %v9432_v2 = vmax.f32 %v6294_v57, 0.0  ;;  %v1032_v4 = vmul.f32 %v6300_v1, %v6300_v1  ;;  %v1608_v30 = vmul.f32 %v6307_v22, %v6268_v26  ;;  %v6342_v27 = vadd.f32 1e-05, %v1274_v38 }
 0x253   : > { %v1596_v24 = vsel %vm6338_vm8, %v6238_v34, %v1592_v20  ;;  %v921_v55 = vmul.f32 %v5233_v63, %v5755_v41  ;;  %v9434_v38 = vmax.f32 %v6320_v59, 0.0  ;;  %v6362_v29 = vadd.f32 1e-05, %v1273_v9 }
 0x254   : > { %v2598_v32 = vsel %vm665_vm1, %v9432_v2, 0.0  ;;  %v1031_v2 = vmul.f32 %v6311_v7, %v6311_v7  ;;  %v1174_v34 = vsel %vm665_vm1, %v1032_v4, 0.0  ;;  %v1609_v41 = vmul.f32 %v6307_v22, %v1608_v30 }
 0x255   : > { %2596 = vadd.xlane.f32.xlu0 %v2595_v48  ;;  %v1582_v48 = vmul.f32 %v6224_v6, %v1581_v53  ;;  %2599 = vadd.xlane.f32.xlu1 %v2598_v32  ;;  %v1599_v53 = vmul.f32 %v6296_v37, %v1598_v44  ;;  %v6351_v32 = vpop.xlane.xlu0 %787  ;;  %4758 = vrsqrt.f32 %v6342_v27  ;;  %v2038_v18 = vmul.f32 %v1596_v24, %v5774_v58 }
 0x256   : > { %v1171_v9 = vsel %vm665_vm1, %v1031_v2, 0.0  ;;  %v9578_v4 = vmax.f32 %v5383_v56, 0.0  ;;  %4760 = vrsqrt.f32 %v6362_v29  ;;  %vm1604_vm11 = vweird.f32 %v6296_v37 }
 0x257   : > { %2593 = vadd.xlane.f32.xlu2 %v2592_v33  ;;  %v2375_v0 = vpop.f32.mrf.mxu1  ;;  %v2220_v33 = vpack.c.bf16 %v2166_v23, %v2165_v51  ;;  %v1586_v20 = vsel %vm6358_vm10, %v6224_v6, %v1582_v48  ;;  %v6371_v44 = vpop.xlane.xlu1 %790  ;;  %v801_v6 = vsel %vm665_vm1, %v9434_v38, 0.0  ;;  %v9580_v48 = vld [vmem:[#allocation14_spill] sm:$0xff]  ;;  %v2103_v58 = vmul.f32 %v5711_v39, %v2038_v18  ;;  %vm1605_vm14 = vmor %vm1603_vm13, %vm1604_vm11 }
 0x258   : > { %v6374_v51 = vadd.f32 %v2375_v0, %v6141_v16  ;;  %v6380_v23 = vsub.f32 %v9578_v4, %v921_v55  ;;  %v2037_v30 = vmul.f32 %v1586_v20, %v9580_v48  ;;  %v1610_v0 = vmul.f32 0.5, %v1609_v41 }
 0x259   : > { %v2168_v48 = vadd.f32 %v5725_v28, %v2103_v58  ;;  %vm1614_vm12 = vweird.f32 %v6307_v22  ;;  %vm1633_vm4 = vweird.f32 %v6342_v27  ;;  %vm1623_vm6 = vweird.f32 %v6362_v29 }
 0x25a   : > { %9579 = vst [vmem:[#allocation27_spill] sm:$0xff] %v6380_v23  ;;  %v9437_v2 = vmax.f32 %v6374_v51, 0.0  ;;  %v1611_v4 = vsub.f32 1.5, %v1610_v0  ;;  %vm1615_vm0 = vmor %vm1613_vm15, %vm1614_vm12 }
 0x25b   : > { %v6392_v55 = vpop.eup %4758 }
 0x25c   : > { %4624 = vmatmul.msk.bf16.gmra.mxu1 %vm665_vm1, %v2220_v33  ;;  %v1600_v33 = vmul.f32 0.5, %v1599_v53  ;;  %v1049_v53 = vmul.f32 %v6380_v23, %v6380_v23  ;;  %v1612_v58 = vmul.f32 %v6307_v22, %v1611_v4  ;;  %vm1634_vm2 = vweird.f32 %v6392_v55 }
 0x25d   : > { %1175 = vadd.xlane.f32.xlu0 %v1174_v34  ;;  %802 = vadd.xlane.f32.xlu1 %v801_v6  ;;  %v1137_v20 = vpop.xlane.xlu0 %1136  ;;  %v6398_v6 = vpop.eup %4760  ;;  %vm1635_vm5 = vmor %vm1633_vm4, %vm1634_vm2 }
 0x25e   : > { %v1601_v24 = vsub.f32 1.5, %v1600_v33  ;;  %v2601_v33 = vsel %vm665_vm1, %v9437_v2, 0.0  ;;  %v1275_v8 = vmul.f32 %v1137_v20, %v5233_v63  ;;  %v1225_v23 = vsel %vm665_vm1, %v1049_v53, 0.0 }
 0x25f   : > { %1172 = vadd.xlane.f32.xlu2 %v1171_v9  ;;  %v2377_v34 = vpop.f32.mrf.mxu1  ;;  %v2102_v9 = vmul.f32 %v5711_v39, %v2037_v30  ;;  %v1628_v30 = vmul.f32 %v6392_v55, %v6342_v27  ;;  %vm1624_vm3 = vweird.f32 %v6398_v6 }
 0x260   : > { %v6390_v56 = vadd.f32 %v2377_v34, %v6141_v16  ;;  %v1602_v34 = vmul.f32 %v6296_v37, %v1601_v24  ;;  %v1618_v24 = vmul.f32 %v6398_v6, %v6362_v29  ;;  %v6430_v43 = vadd.f32 1e-05, %v1275_v8  ;;  %vm1625_vm7 = vmor %vm1623_vm6, %vm1624_vm3 }
 0x261   : > { %v2167_v2 = vadd.f32 %v5725_v28, %v2102_v9  ;;  %v1629_v9 = vmul.f32 %v6392_v55, %v1628_v30 }
 0x262   : > { %v9443_v41 = vmax.f32 %v6390_v56, 0.0  ;;  %vm1643_vm12 = vweird.f32 %v6430_v43 }
 0x263   : > { %v2221_v53 = vpack.c.bf16 %v2168_v48, %v2167_v2 }
 0x264   : > { %v2604_v38 = vsel %vm665_vm1, %v9443_v41, 0.0 }
 0x265   : > { %2605 = vadd.xlane.f32.xlu0 %v2604_v38  ;;  %1226 = vadd.xlane.f32.xlu1 %v1225_v23  ;;  %v1606_v38 = vsel %vm1605_vm14, %v6296_v37, %v1602_v34  ;;  %v1616_v23 = vsel %vm1615_vm0, %v6307_v22, %v1612_v58  ;;  %v1630_v37 = vmul.f32 0.5, %v1629_v9 }
 0x266   : > { %v1140_v18 = vpop.xlane.xlu1 %1139  ;;  %v2039_v26 = vmul.f32 %v1606_v38, %v5814_v31  ;;  %v2040_v8 = vmul.f32 %v1616_v23, %v5801_v19 }
 0x267   : > { %v1276_v0 = vmul.f32 %v1140_v18, %v5233_v63  ;;  %2602 = vadd.xlane.f32.xlu2 %v2601_v33  ;;  %v2380_v20 = vpop.f32.mrf.mxu1  ;;  %v1619_v33 = vmul.f32 %v6398_v6, %v1618_v24 }
 0x268   : > { %v6428_v4 = vadd.f32 %v2380_v20, %v6141_v16  ;;  %v2104_v30 = vmul.f32 %v5711_v39, %v2039_v26  ;;  %v2105_v31 = vmul.f32 %v5711_v39, %v2040_v8 }
 0x269   : > { %v6422_v18 = vadd.f32 1e-05, %v1276_v0  ;;  %v1620_v34 = vmul.f32 0.5, %v1619_v33  ;;  %v1631_v0 = vsub.f32 1.5, %v1630_v37 }
 0x26a   : > { %v9442_v2 = vmax.f32 %v6428_v4, 0.0  ;;  %v2169_v19 = vadd.f32 %v5725_v28, %v2104_v30 }
 0x26b   : > { %4762 = vrsqrt.f32 %v6422_v18  ;;  %v1621_v20 = vsub.f32 1.5, %v1620_v34  ;;  %v1632_v23 = vmul.f32 %v6392_v55, %v1631_v0  ;;  %vm1653_vm10 = vweird.f32 %v6422_v18 }
 0x26c   : > { %4625 = vmatmul.msk.bf16.gmra.mxu1 %vm665_vm1, %v2221_v53  ;;  %v2607_v48 = vsel %vm665_vm1, %v9442_v2, 0.0  ;;  %4764 = vrsqrt.f32 %v6430_v43 }
 0x26d   : > { %v1622_v8 = vmul.f32 %v6398_v6, %v1621_v20  ;;  %v1636_v0 = vsel %vm1635_vm5, %v6392_v55, %v1632_v23 }
 0x26e   : > { %v1143_v53 = vpop.xlane.xlu2 %1142  ;;  %v2042_v29 = vmul.f32 %v1636_v0, %v5882_v49 }
 0x26f   : > { %2608 = vadd.xlane.f32.xlu2 %v2607_v48  ;;  %v2382_v22 = vpop.f32.mrf.mxu1  ;;  %v1277_v37 = vmul.f32 %v1143_v53, %v5233_v63  ;;  %v2170_v48 = vadd.f32 %v5725_v28, %v2105_v31  ;;  %v1626_v27 = vsel %vm1625_vm7, %v6398_v6, %v1622_v8 }
 0x270   : > { %v6445_v58 = vadd.f32 %v2382_v22, %v6141_v16  ;;  %v2041_v23 = vmul.f32 %v1626_v27, %v5853_v13  ;;  %v2107_v8 = vmul.f32 %v5711_v39, %v2042_v29 }
 0x271   : > { %v6447_v24 = vpop.eup %4762  ;;  %v2222_v30 = vpack.c.bf16 %v2170_v48, %v2169_v19  ;;  %v6474_v20 = vadd.f32 1e-05, %v1277_v37 }
 0x272   : > { %v9441_v38 = vmax.f32 %v6445_v58, 0.0  ;;  %v6451_v9 = vpop.eup %4764  ;;  %v1648_v33 = vmul.f32 %v6447_v24, %v6422_v18  ;;  %v2106_v49 = vmul.f32 %v5711_v39, %v2041_v23  ;;  %v2172_v27 = vadd.f32 %v5725_v28, %v2107_v8  ;;  %v6509_v8 = vpop.xlane.xlu1 %796 }
 0x273   : > { %v1638_v34 = vmul.f32 %v6451_v9, %v6430_v43  ;;  %4766 = vrsqrt.f32 %v6474_v20  ;;  %vm1654_vm8 = vweird.f32 %v6447_v24  ;;  %vm1644_vm9 = vweird.f32 %v6451_v9 }
 0x274   : > { %v2610_v26 = vsel %vm665_vm1, %v9441_v38, 0.0  ;;  %v1649_v53 = vmul.f32 %v6447_v24, %v1648_v33  ;;  %v6485_v33 = vpop.xlane.xlu0 %793  ;;  %v2171_v23 = vadd.f32 %v5725_v28, %v2106_v49  ;;  %vm1655_vm11 = vmor %vm1653_vm10, %vm1654_vm8  ;;  %vm1663_vm0 = vweird.f32 %v6474_v20 }
 0x275   : > { %2611 = vadd.xlane.f32.xlu0 %v2610_v26  ;;  %v1639_v26 = vmul.f32 %v6451_v9, %v1638_v34  ;;  %vm1645_vm13 = vmor %vm1643_vm12, %vm1644_vm9 }
 0x276   : > { %v1650_v48 = vmul.f32 0.5, %v1649_v53 }
 0x277   : > { %v1640_v37 = vmul.f32 0.5, %v1639_v26 }
 0x278   : > { %v1651_v34 = vsub.f32 1.5, %v1650_v48 }
 0x279   : > { %v2385_v22 = vpop.f32.mrf.mxu1  ;;  %v6494_v13 = vpop.eup %4766 }
 0x27a   : > { %v6472_v31 = vadd.f32 %v2385_v22, %v6141_v16  ;;  %vm1664_vm14 = vweird.f32 %v6494_v13 }
 0x27b   : > { %vm6558_vm2 = vmor %vm1663_vm0, %vm1664_vm14 }
 0x27c   : > { %4626 = vmatmul.msk.bf16.gmra.mxu1 %vm665_vm1, %v2222_v30  ;;  %v9439_v19 = vmax.f32 %v6472_v31, 0.0  ;;  %v1641_v30 = vsub.f32 1.5, %v1640_v37 }
 0x27e   : > { %v2613_v55 = vsel %vm665_vm1, %v9439_v19, 0.0  ;;  %v1152_v0 = vpop.xlane.xlu2 %1151  ;;  %v1642_v37 = vmul.f32 %v6451_v9, %v1641_v30  ;;  %v2223_v19 = vpack.c.bf16 %v2172_v27, %v2171_v23 }
 0x27f   : > { %2614 = vadd.xlane.f32.xlu2 %v2613_v55  ;;  %v1652_v55 = vmul.f32 %v6447_v24, %v1651_v34  ;;  %v1280_v29 = vmul.f32 %v1152_v0, %v5233_v63 }
 0x281   : > { %v2387_v6 = vpop.f32.mrf.mxu1  ;;  %v1656_v0 = vsel %vm1655_vm11, %v6447_v24, %v1652_v55  ;;  %v6519_v18 = vadd.f32 1e-05, %v1280_v29 }
 0x282   : > { %v6490_v22 = vadd.f32 %v2387_v6, %v6141_v16  ;;  %v1658_v6 = vmul.f32 %v6494_v13, %v6474_v20  ;;  %v2044_v43 = vmul.f32 %v1656_v0, %v5967_v60 }
 0x283   : > { %vm1693_vm9 = vweird.f32 %v6519_v18 }
 0x284   : > { %v9438_v53 = vmax.f32 %v6490_v22, 0.0  ;;  %v2109_v23 = vmul.f32 %v5711_v39, %v2044_v43 }
 0x286   : > { %v2616_v26 = vsel %vm665_vm1, %v9438_v53, 0.0  ;;  %v2174_v43 = vadd.f32 %v5725_v28, %v2109_v23 }
 0x287   : > { %2617 = vadd.xlane.f32.xlu0 %v2616_v26  ;;  %v1646_v26 = vsel %vm1645_vm13, %v6451_v9, %v1642_v37 }
 0x288   : > { %v1146_v48 = vpop.xlane.xlu0 %1145 }
 0x289   : > { %v1278_v34 = vmul.f32 %v1146_v48, %v5233_v63  ;;  %v2390_v53 = vpop.f32.mrf.mxu1  ;;  %v1659_v48 = vmul.f32 %v6494_v13, %v1658_v6 }
 0x28a   : > { %v6515_v49 = vadd.f32 %v2390_v53, %v6141_v16  ;;  %v2043_v53 = vmul.f32 %v1646_v26, %v5920_v14 }
 0x28b   : > { %v1342_v30 = vadd.f32 1e-05, %v1278_v34  ;;  %v1660_v55 = vmul.f32 0.5, %v1659_v48 }
 0x28c   : > { %4627 = vmatmul.msk.bf16.gmra.mxu1 %vm665_vm1, %v2223_v19  ;;  %v9440_v27 = vmax.f32 %v6515_v49, 0.0  ;;  %v2108_v0 = vmul.f32 %v5711_v39, %v2043_v53 }
 0x28d   : > { %4768 = vrsqrt.f32 %v1342_v30  ;;  %v1661_v14 = vsub.f32 1.5, %v1660_v55  ;;  %vm1673_vm3 = vweird.f32 %v1342_v30 }
 0x28e   : > { %v2619_v24 = vsel %vm665_vm1, %v9440_v27, 0.0  ;;  %4770 = vrsqrt.f32 %v6519_v18  ;;  %v2173_v53 = vadd.f32 %v5725_v28, %v2108_v0 }
 0x28f   : > { %2620 = vadd.xlane.f32.xlu2 %v2619_v24  ;;  %v1662_v55 = vmul.f32 %v6494_v13, %v1661_v14 }
 0x290   : > { %v1149_v19 = vpop.xlane.xlu1 %1148  ;;  %v1158_v24 = vpop.xlane.xlu0 %1157 }
 0x291   : > { %v2392_v29 = vpop.f32.mrf.mxu1  ;;  %v1279_v9 = vmul.f32 %v1149_v19, %v5233_v63 }
 0x292   : > { %v6534_v6 = vadd.f32 %v2392_v29, %v6141_v16 }
 0x293   : > { %v4769_v37 = vpop.eup %4768  ;;  %v6536_v34 = vadd.f32 1e-05, %v1279_v9  ;;  %v1282_v9 = vmul.f32 %v1158_v24, %v5233_v63 }
 0x294   : > { %v1668_v60 = vmul.f32 %v4769_v37, %v1342_v30  ;;  %v9444_v26 = vmax.f32 %v6534_v6, 0.0  ;;  %v6540_v48 = vpop.eup %4770  ;;  %vm1674_vm15 = vweird.f32 %v4769_v37 }
 0x295   : > { %4772 = vrsqrt.f32 %v6536_v34  ;;  %vm1675_vm4 = vmor %vm1673_vm3, %vm1674_vm15  ;;  %vm1694_vm6 = vweird.f32 %v6540_v48  ;;  %vm1683_vm7 = vweird.f32 %v6536_v34 }
 0x296   : > { %v1669_v27 = vmul.f32 %v4769_v37, %v1668_v60  ;;  %v2622_v19 = vsel %vm665_vm1, %v9444_v26, 0.0  ;;  %v1688_v60 = vmul.f32 %v6540_v48, %v6519_v18  ;;  %v2224_v26 = vpack.c.bf16 %v2174_v43, %v2173_v53  ;;  %vm1695_vm10 = vmor %vm1693_vm9, %vm1694_vm6 }
 0x297   : > { %2623 = vadd.xlane.f32.xlu0 %v2622_v19  ;;  %v6562_v19 = vadd.f32 1e-05, %v1282_v9 }
 0x298   : > { %v1670_v29 = vmul.f32 0.5, %v1669_v27  ;;  %v812_v38 = vpop.xlane.xlu1 %811  ;;  %v1689_v20 = vmul.f32 %v6540_v48, %v1688_v60 }
 0x299   : > { %v2395_v23 = vpop.f32.mrf.mxu1  ;;  %v913_v41 = vmul.f32 %v5233_v63, %v812_v38  ;;  %v1666_v38 = vsel %vm6558_vm2, %v6494_v13, %v1662_v55  ;;  %4774 = vrsqrt.f32 %v6562_v19  ;;  %vm1713_vm12 = vweird.f32 %v6562_v19 }
 0x29a   : > { %v1671_v2 = vsub.f32 1.5, %v1670_v29  ;;  %v6556_v27 = vadd.f32 %v2395_v23, %v6141_v16  ;;  %v9583_v29 = vmax.f32 %v6079_v52, 0.0  ;;  %v2045_v13 = vmul.f32 %v1666_v38, %v5990_v36  ;;  %v596_v23 = vpop.f32.mrf.mxu3 }
 0x29b   : > { %v4773_v0 = vpop.eup %4772  ;;  %v1690_v55 = vmul.f32 0.5, %v1689_v20  ;;  %v6592_v38 = vadd.f32 %v596_v23, %v5069_v40 }
 0x29c   : > { %v1672_v24 = vmul.f32 %v4769_v37, %v1671_v2  ;;  %v6566_v10 = vsub.f32 %v9583_v29, %v913_v41  ;;  %4628 = vmatmul.msk.bf16.gmra.mxu1 %vm665_vm1, %v2224_v26  ;;  %v1678_v43 = vmul.f32 %v4773_v0, %v6536_v34  ;;  %v9451_v2 = vmax.f32 %v6556_v27, 0.0 }
 0x29d   : > { %v2110_v29 = vmul.f32 %v5711_v39, %v2045_v13  ;;  %vm1684_vm5 = vweird.f32 %v4773_v0 }
 0x29e   : > { %v1676_v30 = vsel %vm1675_vm4, %v4769_v37, %v1672_v24  ;;  %v1041_v52 = vmul.f32 %v6566_v10, %v6566_v10  ;;  %v1679_v9 = vmul.f32 %v4773_v0, %v1678_v43  ;;  %v2625_v26 = vsel %vm665_vm1, %v9451_v2, 0.0  ;;  %vm1685_vm8 = vmor %vm1683_vm7, %vm1684_vm5 }
 0x29f   : > { %v2046_v41 = vmul.f32 %v1676_v30, %v6050_v25  ;;  %2626 = vadd.xlane.f32.xlu2 %v2625_v26  ;;  %v1691_v43 = vsub.f32 1.5, %v1690_v55  ;;  %v6594_v30 = vpop.eup %4774 }
 0x2a0   : > { %v1201_v53 = vsel %vm665_vm1, %v1041_v52, 0.0  ;;  %v1680_v60 = vmul.f32 0.5, %v1679_v9  ;;  %v2175_v9 = vadd.f32 %v5725_v28, %v2110_v29  ;;  %v1708_v13 = vmul.f32 %v6594_v30, %v6562_v19 }
 0x2a1   : > { %1202 = vadd.xlane.f32.xlu1 %v1201_v53  ;;  %v2397_v37 = vpop.f32.mrf.mxu1  ;;  %v2111_v14 = vmul.f32 %v5711_v39, %v2046_v41  ;;  %v1692_v26 = vmul.f32 %v6540_v48, %v1691_v43  ;;  %v9449_v53 = vmax.f32 %v6592_v38, 0.0  ;;  %vm1714_vm11 = vweird.f32 %v6594_v30 }
 0x2a2   : > { %v1681_v25 = vsub.f32 1.5, %v1680_v60  ;;  %v6587_v24 = vadd.f32 %v2397_v37, %v6141_v16  ;;  %v906_v37 = vmul.f32 %v5233_v63, %v6371_v44  ;;  %v9584_v44 = vmax.f32 %v5899_v50, 0.0  ;;  %vm1715_vm13 = vmor %vm1713_vm12, %vm1714_vm11 }
 0x2a3   : > { %v2176_v20 = vadd.f32 %v5725_v28, %v2111_v14  ;;  %v1696_v34 = vsel %vm1695_vm10, %v6540_v48, %v1692_v26  ;;  %v852_v43 = vsel %vm665_vm1, %v9449_v53, 0.0 }
 0x2a4   : > { %v9450_v36 = vmax.f32 %v6587_v24, 0.0  ;;  %v1682_v52 = vmul.f32 %v4773_v0, %v1681_v25  ;;  %v1709_v25 = vmul.f32 %v6594_v30, %v1708_v13  ;;  %v6620_v18 = vsub.f32 %v9584_v44, %v906_v37 }
 0x2a5   : > { %v2225_v60 = vpack.c.bf16 %v2176_v20, %v2175_v9 }
 0x2a6   : > { %v2628_v41 = vsel %vm665_vm1, %v9450_v36, 0.0  ;;  %v1686_v23 = vsel %vm1685_vm8, %v4773_v0, %v1682_v52  ;;  %v2048_v0 = vmul.f32 %v1696_v34, %v6027_v47  ;;  %v1034_v50 = vmul.f32 %v6620_v18, %v6620_v18 }
 0x2a7   : > { %2629 = vadd.xlane.f32.xlu0 %v2628_v41  ;;  %v2047_v20 = vmul.f32 %v1686_v23, %v6066_v3  ;;  %v1710_v41 = vmul.f32 0.5, %v1709_v25  ;;  %v598_v25 = vpop.f32.mrf.mxu3 }
 0x2a8   : > { %v1155_v55 = vpop.xlane.xlu2 %1154  ;;  %v2113_v47 = vmul.f32 %v5711_v39, %v2048_v0  ;;  %v1180_v0 = vsel %vm665_vm1, %v1034_v50, 0.0 }
 0x2a9   : > { %v1281_v14 = vmul.f32 %v1155_v55, %v5233_v63  ;;  %v2112_v26 = vmul.f32 %v5711_v39, %v2047_v20  ;;  %v1711_v23 = vsub.f32 1.5, %v1710_v41  ;;  %v9586_v20 = vmax.f32 %v6169_v45, 0.0 }
 0x2aa   : > { %v6654_v45 = vadd.f32 %v598_v25, %v5069_v40 }
 0x2ab   : > { %v1345_v29 = vadd.f32 1e-05, %v1281_v14  ;;  %v9585_v14 = vmax.f32 %v6132_v12, 0.0 }
 0x2ac   : > { %4629 = vmatmul.msk.bf16.gmra.mxu1 %vm665_vm1, %v2225_v60 }
 0x2ad   : > { %4776 = vrsqrt.f32 %v1345_v29  ;;  %vm1703_vm15 = vweird.f32 %v1345_v29 }
 0x2af   : > { %853 = vadd.xlane.f32.xlu0 %v852_v43 }
 0x2b0   : > { %v1164_v52 = vpop.xlane.xlu0 %1163 }
 0x2b1   : > { %v1284_v48 = vmul.f32 %v1164_v52, %v5233_v63  ;;  %v2591_v13 = vpop.xlane.xlu1 %2590  ;;  %v2177_v52 = vadd.f32 %v5725_v28, %v2112_v26  ;;  %v2178_v26 = vadd.f32 %v5725_v28, %v2113_v47 }
 0x2b2   : > { %v815_v9 = vpop.xlane.xlu2 %814  ;;  %v2781_v3 = vmul.f32 %v2591_v13, %v5233_v63 }
 0x2b3   : > { %v914_v55 = vmul.f32 %v5233_v63, %v815_v9  ;;  %v6626_v60 = vadd.f32 1e-05, %v1284_v48  ;;  %v4777_v37 = vpop.eup %4776  ;;  %v6644_v48 = vadd.f32 %v6020_v11, %v5069_v40  ;;  %v1712_v11 = vmul.f32 %v6594_v30, %v1711_v23 }
 0x2b4   : > { %v1698_v43 = vmul.f32 %v4777_v37, %v1345_v29  ;;  %v6639_v44 = vsub.f32 %v9586_v20, %v2781_v3  ;;  %v2226_v20 = vpack.c.bf16 %v2178_v26, %v2177_v52  ;;  %vm1704_vm14 = vweird.f32 %v4777_v37 }
 0x2b5   : > { %v6634_v34 = vsub.f32 %v9585_v14, %v914_v55  ;;  %4778 = vrsqrt.f32 %v6626_v60  ;;  %v9448_v25 = vmax.f32 %v6644_v48, 0.0  ;;  %v1716_v52 = vsel %vm1715_vm13, %v6594_v30, %v1712_v11  ;;  %vm1705_vm0 = vmor %vm1703_vm15, %vm1704_vm14 }
 0x2b6   : > { %v1699_v41 = vmul.f32 %v4777_v37, %v1698_v43  ;;  %v2909_v9 = vmul.f32 %v6639_v44, %v6639_v44  ;;  %vm1733_vm3 = vweird.f32 %v6626_v60 }
 0x2b7   : > { %v1042_v12 = vmul.f32 %v6634_v34, %v6634_v34  ;;  %1181 = vadd.xlane.f32.xlu0 %v1180_v0 }
 0x2b8   : > { %v6651_v13 = vpop.xlane.xlu0 %799  ;;  %v1700_v3 = vmul.f32 0.5, %v1699_v41  ;;  %v2973_v14 = vsel %vm665_vm1, %v2909_v9, 0.0  ;;  %v9446_v41 = vmax.f32 %v6654_v45, 0.0 }
 0x2b9   : > { %v1204_v55 = vsel %vm665_vm1, %v1042_v12, 0.0  ;;  %v6660_v50 = vpop.f32.mrf.mxu1  ;;  %2974 = vadd.xlane.f32.xlu1 %v2973_v14 }
 0x2ba   : > { %v1161_v43 = vpop.xlane.xlu2 %1160  ;;  %1205 = vadd.xlane.f32.xlu2 %v1204_v55  ;;  %v1701_v23 = vsub.f32 1.5, %v1700_v3  ;;  %v804_v55 = vsel %vm665_vm1, %v9448_v25, 0.0  ;;  %v2050_v3 = vmul.f32 %v1716_v52, %v6070_v62  ;;  %v855_v30 = vsel %vm665_vm1, %v9446_v41, 0.0 }
 0x2bb   : > { %v6663_v0 = vpop.eup %4778  ;;  %v1283_v47 = vmul.f32 %v1161_v43, %v5233_v63  ;;  %v907_v62 = vmul.f32 %v5233_v63, %v6485_v33 }
 0x2bc   : > { %v1728_v12 = vmul.f32 %v6663_v0, %v6626_v60  ;;  %4630 = vmatmul.msk.bf16.gmra.mxu1 %vm665_vm1, %v2226_v20  ;;  %v1702_v26 = vmul.f32 %v4777_v37, %v1701_v23  ;;  %vm1734_vm2 = vweird.f32 %v6663_v0 }
 0x2bd   : > { %v6673_v9 = vadd.f32 1e-05, %v1283_v47  ;;  %vm6734_vm4 = vmor %vm1733_vm3, %vm1734_vm2 }
 0x2be   : > { %v1729_v19 = vmul.f32 %v6663_v0, %v1728_v12  ;;  %v1706_v14 = vsel %vm1705_vm0, %v4777_v37, %v1702_v26 }
 0x2bf   : > { %4780 = vrsqrt.f32 %v6673_v9  ;;  %805 = vadd.xlane.f32.xlu0 %v804_v55  ;;  %v2049_v29 = vmul.f32 %v1706_v14, %v6113_v35  ;;  %vm1723_vm6 = vweird.f32 %v6673_v9 }
 0x2c0   : > { %v1170_v11 = vpop.xlane.xlu0 %1169  ;;  %v1730_v43 = vmul.f32 0.5, %v1729_v19  ;;  %v2115_v19 = vmul.f32 %v5711_v39, %v2050_v3  ;;  %v925_v3 = vmul.f32 %v5233_v63, %v6009_v54 }
 0x2c1   : > { %v1286_v20 = vmul.f32 %v1170_v11, %v5233_v63  ;;  %v2402_v47 = vpop.f32.mrf.mxu1  ;;  %856 = vadd.xlane.f32.xlu1 %v855_v30  ;;  %v2114_v26 = vmul.f32 %v5711_v39, %v2049_v29  ;;  %v9587_v29 = vmax.f32 %v5937_v42, 0.0 }
 0x2c2   : > { %v1167_v23 = vpop.xlane.xlu2 %1166  ;;  %v6687_v12 = vadd.f32 %v2402_v47, %v6141_v16  ;;  %v1731_v14 = vsub.f32 1.5, %v1730_v43 }
 0x2c3   : > { %v1285_v37 = vmul.f32 %v1167_v23, %v5233_v63  ;;  %v6692_v52 = vadd.f32 1e-05, %v1286_v20  ;;  %v2179_v30 = vadd.f32 %v5725_v28, %v2114_v26  ;;  %v6707_v20 = vsub.f32 %v9587_v29, %v907_v62  ;;  %v6718_v62 = vpop.xlane.xlu1 %850 }
 0x2c4   : > { %v9447_v35 = vmax.f32 %v6687_v12, 0.0  ;;  %v1732_v41 = vmul.f32 %v6663_v0, %v1731_v14  ;;  %v9590_v14 = vmax.f32 %v6271_v21, 0.0 }
 0x2c5   : > { %v4781_v55 = vpop.eup %4780  ;;  %v6697_v11 = vadd.f32 1e-05, %v1285_v37  ;;  %4782 = vrsqrt.f32 %v6692_v52  ;;  %9588 = vst [vmem:[#allocation14_spill] sm:$0xff] %v6707_v20  ;;  %v2180_v37 = vadd.f32 %v5725_v28, %v2115_v19  ;;  %vm1753_vm10 = vweird.f32 %v6692_v52 }
 0x2c6   : > { %v1718_v47 = vmul.f32 %v4781_v55, %v6673_v9  ;;  %v2634_v33 = vsel %vm665_vm1, %v9447_v35, 0.0  ;;  %v9589_v35 = vld [vmem:[#allocation15_spill] sm:$0xff]  ;;  %vm1724_vm5 = vweird.f32 %v4781_v55 }
 0x2c7   : > { %4784 = vrsqrt.f32 %v6697_v11  ;;  %2635 = vadd.xlane.f32.xlu0 %v2634_v33  ;;  %v922_v42 = vmul.f32 %v5233_v63, %v9589_v35  ;;  %v2227_v53 = vpack.c.bf16 %v2180_v37, %v2179_v30  ;;  %v1035_v33 = vmul.f32 %v6707_v20, %v6707_v20  ;;  %vm1725_vm7 = vmor %vm1723_vm6, %vm1724_vm5 }
 0x2c8   : > { %v1719_v43 = vmul.f32 %v4781_v55, %v1718_v47  ;;  %v2597_v23 = vpop.xlane.xlu0 %2596  ;;  %vm1743_vm11 = vweird.f32 %v6697_v11 }
 0x2c9   : > { %v2783_v26 = vmul.f32 %v2597_v23, %v5233_v63  ;;  %v9592_v23 = vld [vmem:[#allocation9_spill] sm:$0xff] }
 0x2ca   : > { %v1720_v29 = vmul.f32 0.5, %v1719_v43  ;;  %v2594_v25 = vpop.xlane.xlu2 %2593  ;;  %v9593_v35 = vmax.f32 %v9592_v23, 0.0 }
 0x2cb   : > { %v6720_v54 = vpop.eup %4782  ;;  %v2782_v19 = vmul.f32 %v2594_v25, %v5233_v63  ;;  %v6726_v47 = vsub.f32 %v9590_v14, %v2783_v26  ;;  %v9597_v25 = vld [vmem:[#allocation24_spill] sm:$0xff]  ;;  %v9598_v26 = vmax.f32 %v6280_v46, 0.0 }
 0x2cc   : > { %v6732_v36 = vsub.f32 %v9593_v35, %v925_v3  ;;  %v1721_v30 = vsub.f32 1.5, %v1720_v29  ;;  %v1748_v60 = vmul.f32 %v6720_v54, %v6692_v52  ;;  %4631 = vmatmul.msk.bf16.gmra.mxu1 %vm665_vm1, %v2227_v53  ;;  %v6745_v37 = vadd.f32 %v9597_v25, %v5069_v40 }
 0x2cd   : > { %9591 = vst [vmem:[#allocation15_spill] sm:$0xff] %v6726_v47  ;;  %v6741_v21 = vpop.eup %4784  ;;  %v1736_v3 = vsel %vm6734_vm4, %v6663_v0, %v1732_v41  ;;  %v6752_v14 = vsub.f32 %v9598_v26, %v2782_v19  ;;  %v2911_v29 = vmul.f32 %v6726_v47, %v6726_v47  ;;  %v1183_v35 = vsel %vm665_vm1, %v1035_v33, 0.0  ;;  %v9599_v41 = vld [vmem:[#allocation26_spill] sm:$0xff]  ;;  %v9600_v26 = vld [vmem:[#allocation4_spill] sm:$0xff] }
 0x2ce   : > { %9594 = vst [vmem:[#allocation9_spill] sm:$0xff] %v6732_v36  ;;  %v1722_v23 = vmul.f32 %v4781_v55, %v1721_v30  ;;  %v1738_v53 = vmul.f32 %v6741_v21, %v6697_v11  ;;  %v1749_v40 = vmul.f32 %v6720_v54, %v1748_v60  ;;  %v2052_v19 = vmul.f32 %v1736_v3, %v9599_v41 }
 0x2cf   : > { %v2910_v0 = vmul.f32 %v6752_v14, %v6752_v14  ;;  %v2979_v46 = vsel %vm665_vm1, %v2911_v29, 0.0  ;;  %1184 = vadd.xlane.f32.xlu0 %v1183_v35  ;;  %v9601_v2 = vmax.f32 %v9600_v26, 0.0  ;;  %v9458_v29 = vmax.f32 %v6745_v37, 0.0 }
 0x2d0   : > { %v1726_v43 = vsel %vm1725_vm7, %v4781_v55, %v1722_v23  ;;  %v1739_v30 = vmul.f32 %v6741_v21, %v1738_v53  ;;  %v1750_v25 = vmul.f32 0.5, %v1749_v40  ;;  %2980 = vadd.xlane.f32.xlu1 %v2979_v46  ;;  %v1176_v9 = vpop.xlane.xlu0 %1175  ;;  %v2600_v55 = vpop.xlane.xlu1 %2599  ;;  %v1053_v53 = vmul.f32 %v6732_v36, %v6732_v36 }
 0x2d1   : > { %v6768_v60 = vsub.f32 %v9601_v2, %v922_v42  ;;  %v2051_v33 = vmul.f32 %v1726_v43, %v6190_v61  ;;  %v2976_v20 = vsel %vm665_vm1, %v2910_v0, 0.0  ;;  %v1288_v47 = vmul.f32 %v1176_v9, %v5233_v63 }
 0x2d2   : > { %v1740_v3 = vmul.f32 0.5, %v1739_v30  ;;  %2977 = vadd.xlane.f32.xlu2 %v2976_v20  ;;  %v1173_v23 = vpop.xlane.xlu2 %1172  ;;  %v1751_v40 = vsub.f32 1.5, %v1750_v25  ;;  %v2117_v0 = vmul.f32 %v5711_v39, %v2052_v19  ;;  %v2784_v46 = vmul.f32 %v2600_v55, %v5233_v63 }
 0x2d3   : > { %v1287_v35 = vmul.f32 %v1173_v23, %v5233_v63  ;;  %v6777_v2 = vadd.f32 1e-05, %v1288_v47  ;;  %v2116_v61 = vmul.f32 %v5711_v39, %v2051_v33  ;;  %v1050_v20 = vmul.f32 %v6768_v60, %v6768_v60 }
 0x2d4   : > { %v1741_v42 = vsub.f32 1.5, %v1740_v3  ;;  %vm1754_vm8 = vweird.f32 %v6720_v54  ;;  %v1237_v43 = vsel %vm665_vm1, %v1053_v53, 0.0  ;;  %v807_v47 = vsel %vm665_vm1, %v9458_v29, 0.0 }
 0x2d5   : > { %v6782_v41 = vadd.f32 1e-05, %v1287_v35  ;;  %4786 = vrsqrt.f32 %v6777_v2  ;;  %v2181_v30 = vadd.f32 %v5725_v28, %v2116_v61  ;;  %vm1744_vm9 = vweird.f32 %v6741_v21  ;;  %vm6800_vm12 = vmor %vm1753_vm10, %vm1754_vm8  ;;  %v9607_v61 = vld [vmem:[#allocation17_spill] sm:$0xff] }
 0x2d6   : > { %v1742_v19 = vmul.f32 %v6741_v21, %v1741_v42  ;;  %v1752_v25 = vmul.f32 %v6720_v54, %v1751_v40  ;;  %v2182_v9 = vadd.f32 %v5725_v28, %v2117_v0  ;;  %v9604_v33 = vmax.f32 %v6294_v57, 0.0  ;;  %vm6809_vm13 = vmor %vm1743_vm11, %vm1744_vm9  ;;  %v6822_v0 = vpop.f32.mrf.mxu1 }
 0x2d7   : > { %4788 = vrsqrt.f32 %v6782_v41  ;;  %1238 = vadd.xlane.f32.xlu0 %v1237_v43  ;;  %v1228_v55 = vsel %vm665_vm1, %v1050_v20, 0.0  ;;  %v923_v42 = vmul.f32 %v5233_v63, %v9607_v61  ;;  %v905_v43 = vmul.f32 %v5233_v63, %v6351_v32 }
 0x2d8   : > { %808 = vadd.xlane.f32.xlu1 %v807_v47  ;;  %v6806_v3 = vsub.f32 %v9604_v33, %v2784_v46  ;;  %v2228_v53 = vpack.c.bf16 %v2182_v9, %v2181_v30  ;;  %v1746_v11 = vsel %vm6809_vm13, %v6741_v21, %v1742_v19  ;;  %v1756_v57 = vsel %vm6800_vm12, %v6720_v54, %v1752_v25  ;;  %v9609_v33 = vld [vmem:[#allocation6_spill] sm:$0xff] }
 0x2d9   : > { %v9608_v21 = vmax.f32 %v6374_v51, 0.0  ;;  %v2053_v30 = vmul.f32 %v1746_v11, %v6228_v17  ;;  %v2054_v19 = vmul.f32 %v1756_v57, %v6218_v15  ;;  %v2606_v57 = vpop.xlane.xlu0 %2605  ;;  %vm1773_vm0 = vweird.f32 %v6777_v2 }
 0x2da   : > { %1229 = vadd.xlane.f32.xlu2 %v1228_v55  ;;  %v2603_v52 = vpop.xlane.xlu2 %2602  ;;  %v2912_v54 = vmul.f32 %v6806_v3, %v6806_v3  ;;  %v9610_v55 = vmax.f32 %v9609_v33, 0.0  ;;  %vm1763_vm2 = vweird.f32 %v6782_v41 }
 0x2db   : > { %v4787_v40 = vpop.eup %4786  ;;  %v2785_v35 = vmul.f32 %v2603_v52, %v5233_v63  ;;  %v9612_v52 = vld [vmem:[#allocation19_spill] sm:$0xff]  ;;  %v2118_v61 = vmul.f32 %v5711_v39, %v2053_v30 }
 0x2dc   : > { %v1768_v46 = vmul.f32 %v4787_v40, %v6777_v2  ;;  %4632 = vmatmul.msk.bf16.gmra.mxu1 %vm665_vm1, %v2228_v53  ;;  %v6841_v32 = vsub.f32 %v9610_v55, %v923_v42  ;;  %v9613_v53 = vmax.f32 %v9612_v52, 0.0  ;;  %v2982_v17 = vsel %vm665_vm1, %v2912_v54, 0.0 }
 0x2dd   : > { %v4789_v20 = vpop.eup %4788  ;;  %v6830_v47 = vsub.f32 %v9608_v21, %v2785_v35  ;;  %vm1774_vm14 = vweird.f32 %v4787_v40  ;;  %v2183_v30 = vadd.f32 %v5725_v28, %v2118_v61  ;;  %v9614_v52 = vmax.f32 %v6390_v56, 0.0 }
 0x2de   : > { %v1758_v25 = vmul.f32 %v4789_v20, %v6782_v41  ;;  %v1769_v9 = vmul.f32 %v4787_v40, %v1768_v46  ;;  %9611 = vst [vmem:[#allocation24_spill] sm:$0xff] %v6841_v32  ;;  %v6845_v35 = vsub.f32 %v9613_v53, %v905_v43  ;;  %v2119_v46 = vmul.f32 %v5711_v39, %v2054_v19  ;;  %v6857_v33 = vpop.f32.mrf.mxu1  ;;  %vm1775_vm3 = vmor %vm1773_vm0, %vm1774_vm14 }
 0x2df   : > { %v2913_v26 = vmul.f32 %v6830_v47, %v6830_v47  ;;  %v2786_v43 = vmul.f32 %v2606_v57, %v5233_v63  ;;  %vm1764_vm15 = vweird.f32 %v4789_v20  ;;  %v908_v41 = vmul.f32 %v5233_v63, %v6509_v8 }
 0x2e0   : > { %v1759_v51 = vmul.f32 %v4789_v20, %v1758_v25  ;;  %v1770_v23 = vmul.f32 0.5, %v1769_v9  ;;  %v1051_v9 = vmul.f32 %v6841_v32, %v6841_v32  ;;  %v2184_v19 = vadd.f32 %v5725_v28, %v2119_v46  ;;  %vm1765_vm4 = vmor %vm1763_vm2, %vm1764_vm15 }
 0x2e1   : > { %v2985_v15 = vsel %vm665_vm1, %v2913_v26, 0.0  ;;  %v1033_v26 = vmul.f32 %v6845_v35, %v6845_v35  ;;  %v6866_v53 = vsub.f32 %v9614_v52, %v2786_v43  ;;  %v9618_v52 = vmax.f32 %v6445_v58, 0.0 }
 0x2e2   : > { %v1760_v11 = vmul.f32 0.5, %v1759_v51  ;;  %2983 = vadd.xlane.f32.xlu2 %v2982_v17  ;;  %2986 = vadd.xlane.f32.xlu1 %v2985_v15  ;;  %v1771_v42 = vsub.f32 1.5, %v1770_v23  ;;  %v2609_v21 = vpop.xlane.xlu2 %2608  ;;  %v1231_v23 = vsel %vm665_vm1, %v1051_v9, 0.0  ;;  %v9615_v17 = vmax.f32 %v6428_v4, 0.0 }
 0x2e3   : > { %v2787_v54 = vmul.f32 %v2609_v21, %v5233_v63  ;;  %v2229_v57 = vpack.c.bf16 %v2184_v19, %v2183_v30  ;;  %v2914_v4 = vmul.f32 %v6866_v53, %v6866_v53  ;;  %v6890_v9 = vadd.f32 %v6660_v50, %v6141_v16 }
 0x2e4   : > { %v1761_v25 = vsub.f32 1.5, %v1760_v11  ;;  %v1772_v51 = vmul.f32 %v4787_v40, %v1771_v42  ;;  %v1177_v11 = vsel %vm665_vm1, %v1033_v26, 0.0 }
 0x2e5   : > { %v6870_v15 = vsub.f32 %v9615_v17, %v2787_v54  ;;  %v2988_v43 = vsel %vm665_vm1, %v2914_v4, 0.0  ;;  %v9457_v30 = vmax.f32 %v6890_v9, 0.0  ;;  %v9622_v4 = vld [vmem:[#allocation20_spill] sm:$0xff] }
 0x2e6   : > { %v1762_v55 = vmul.f32 %v4789_v20, %v1761_v25  ;;  %v1776_v61 = vsel %vm1775_vm3, %v4787_v40, %v1772_v51  ;;  %v6882_v21 = vpop.f32.mrf.mxu1  ;;  %v9616_v25 = vld [vmem:[#allocation21_spill] sm:$0xff]  ;;  %v924_v58 = vmul.f32 %v5233_v63, %v9622_v4 }
 0x2e7   : > { %v2915_v56 = vmul.f32 %v6870_v15, %v6870_v15  ;;  %v2056_v42 = vmul.f32 %v1776_v61, %v6300_v1  ;;  %v2631_v61 = vsel %vm665_vm1, %v9457_v30, 0.0 }
 0x2e8   : > { %v1766_v2 = vsel %vm1765_vm4, %v4789_v20, %v1762_v55  ;;  %v9617_v20 = vmax.f32 %v9616_v25, 0.0  ;;  %v2612_v54 = vpop.xlane.xlu0 %2611 }
 0x2e9   : > { %v2055_v46 = vmul.f32 %v1766_v2, %v6311_v7  ;;  %v2991_v8 = vsel %vm665_vm1, %v2915_v56, 0.0  ;;  %v2121_v1 = vmul.f32 %v5711_v39, %v2056_v42  ;;  %v2788_v19 = vmul.f32 %v2612_v54, %v5233_v63  ;;  %v9623_v42 = vld [vmem:[#allocation8_spill] sm:$0xff] }
 0x2ea   : > { %1178 = vadd.xlane.f32.xlu2 %v1177_v11  ;;  %1232 = vadd.xlane.f32.xlu1 %v1231_v23  ;;  %v6886_v40 = vsub.f32 %v9617_v20, %v908_v41  ;;  %v9620_v11 = vmax.f32 %v6472_v31, 0.0  ;;  %v9624_v25 = vmax.f32 %v9623_v42, 0.0 }
 0x2eb   : > { %v2120_v7 = vmul.f32 %v5711_v39, %v2055_v46  ;;  %v2186_v23 = vadd.f32 %v5725_v28, %v2121_v1  ;;  %v6905_v17 = vsub.f32 %v9618_v52, %v2788_v19  ;;  %v803_v1 = vpop.xlane.xlu1 %802  ;;  %v926_v19 = vmul.f32 %v5233_v63, %v6718_v62 }
 0x2ec   : > { %4633 = vmatmul.msk.bf16.gmra.mxu1 %vm665_vm1, %v2229_v57  ;;  %v1036_v50 = vmul.f32 %v6886_v40, %v6886_v40  ;;  %v6924_v20 = vsub.f32 %v9624_v25, %v924_v58  ;;  %v9628_v52 = vmax.f32 %v6490_v22, 0.0  ;;  %v910_v42 = vmul.f32 %v5233_v63, %v803_v1 }
 0x2ed   : > { %v2185_v51 = vadd.f32 %v5725_v28, %v2120_v7  ;;  %9619 = vst [vmem:[#allocation26_spill] sm:$0xff] %v6905_v17  ;;  %v2916_v46 = vmul.f32 %v6905_v17, %v6905_v17 }
 0x2ee   : > { %v1186_v2 = vsel %vm665_vm1, %v1036_v50, 0.0  ;;  %v2412_v41 = vpop.f32.mrf.mxu1  ;;  %9625 = vst [vmem:[#allocation17_spill] sm:$0xff] %v6924_v20 }
 0x2ef   : > { %v2230_v56 = vpack.c.bf16 %v2186_v23, %v2185_v51  ;;  %v2994_v54 = vsel %vm665_vm1, %v2916_v46, 0.0  ;;  %v9626_v51 = vmax.f32 %v6198_v5, 0.0  ;;  %v6979_v1 = vadd.f32 %v2412_v41, %v6141_v16 }
 0x2f1   : > { %v6942_v23 = vsub.f32 %v9626_v51, %v926_v19  ;;  %v9633_v19 = vld [vmem:[#allocation13_spill] sm:$0xff]  ;;  %v6976_v51 = vadd.f32 %v6857_v33, %v6141_v16  ;;  %9635 = vst [vmem:[#allocation8_spill] sm:$0xff] %v6979_v1 }
 0x2f2   : > { %2992 = vadd.xlane.f32.xlu1 %v2991_v8  ;;  %2989 = vadd.xlane.f32.xlu2 %v2988_v43  ;;  %v2615_v26 = vpop.xlane.xlu2 %2614  ;;  %v6928_v8 = vadd.f32 %v6822_v0, %v6141_v16  ;;  %v1052_v0 = vmul.f32 %v6924_v20, %v6924_v20 }
 0x2f3   : > { %v2789_v55 = vmul.f32 %v2615_v26, %v5233_v63  ;;  %9627 = vst [vmem:[#allocation6_spill] sm:$0xff] %v6942_v23  ;;  %v1054_v22 = vmul.f32 %v6942_v23, %v6942_v23  ;;  %v9454_v41 = vmax.f32 %v6976_v51, 0.0 }
 0x2f4   : > { %v1234_v62 = vsel %vm665_vm1, %v1052_v0, 0.0  ;;  %9634 = vst [vmem:[#allocation20_spill] sm:$0xff] %v6976_v51 }
 0x2f5   : > { %v6909_v57 = vsub.f32 %v9620_v11, %v2789_v55  ;;  %v9456_v55 = vmax.f32 %v6928_v8, 0.0 }
 0x2f6   : > { %v6932_v26 = vpop.f32.mrf.mxu1 }
 0x2f7   : > { %9621 = vst [vmem:[#allocation4_spill] sm:$0xff] %v6909_v57  ;;  %v2917_v31 = vmul.f32 %v6909_v57, %v6909_v57 }
 0x2f9   : > { %v2997_v43 = vsel %vm665_vm1, %v2917_v31, 0.0  ;;  %v6955_v31 = vpop.xlane.xlu1 %1226 }
 0x2fa   : > { %1187 = vadd.xlane.f32.xlu1 %v1186_v2  ;;  %2632 = vadd.xlane.f32.xlu2 %v2631_v61  ;;  %v2618_v7 = vpop.xlane.xlu0 %2617  ;;  %v2637_v2 = vsel %vm665_vm1, %v9456_v55, 0.0  ;;  %v9630_v61 = vld [vmem:[#allocation12_spill] sm:$0xff]  ;;  %v9647_v55 = vld [vmem:[#allocation25_spill] sm:$0xff] }
 0x2fb   : > { %v2790_v50 = vmul.f32 %v2618_v7, %v5233_v63  ;;  %v9648_v30 = vmax.f32 %v9647_v55, 0.0 }
 0x2fc   : > { %4634 = vmatmul.msk.bf16.gmra.mxu1 %vm665_vm1, %v2230_v56  ;;  %v1300_v56 = vmul.f32 %v9630_v61, %v5233_v63 }
 0x2fd   : > { %v6946_v11 = vsub.f32 %v9628_v52, %v2790_v50  ;;  %v1299_v50 = vmul.f32 %v9633_v19, %v5233_v63  ;;  %v1240_v52 = vsel %vm665_vm1, %v1054_v22, 0.0 }
 0x2fe   : > { %v6962_v25 = vpop.f32.mrf.mxu1  ;;  %v6968_v7 = vadd.f32 1e-05, %v1300_v56 }
 0x2ff   : > { %9629 = vst [vmem:[#allocation19_spill] sm:$0xff] %v6946_v11  ;;  %v2918_v46 = vmul.f32 %v6946_v11, %v6946_v11  ;;  %v6989_v33 = vadd.f32 1e-05, %v1299_v50 }
 0x300   : > { %4790 = vrsqrt.f32 %v6968_v7  ;;  %vm1893_vm5 = vweird.f32 %v6968_v7 }
 0x301   : > { %4792 = vrsqrt.f32 %v6989_v33  ;;  %vm1883_vm9 = vweird.f32 %v6989_v33 }
 0x302   : > { %2998 = vadd.xlane.f32.xlu1 %v2997_v43  ;;  %2995 = vadd.xlane.f32.xlu2 %v2994_v54  ;;  %v2621_v4 = vpop.xlane.xlu2 %2620  ;;  %v9631_v43 = vmax.f32 %v6534_v6, 0.0  ;;  %v3000_v6 = vsel %vm665_vm1, %v2918_v46, 0.0 }
 0x306   : > { %v7000_v19 = vpop.f32.mrf.mxu1 }
 0x30a   : > { %2638 = vadd.xlane.f32.xlu1 %v2637_v2  ;;  %1235 = vadd.xlane.f32.xlu2 %v1234_v62  ;;  %v2624_v58 = vpop.xlane.xlu0 %2623  ;;  %v9636_v2 = vmax.f32 %v6320_v59, 0.0 }
 0x30b   : > { %v2792_v5 = vmul.f32 %v2624_v58, %v5233_v63  ;;  %v9455_v58 = vmax.f32 %v6979_v1, 0.0 }
 0x30c   : > { %v6985_v62 = vsub.f32 %v9636_v2, %v910_v42  ;;  %v9638_v42 = vld [vmem:[#allocation16_spill] sm:$0xff] }
 0x30d   : > { %v6966_v54 = vsub.f32 %v9631_v43, %v2792_v5  ;;  %v2791_v5 = vmul.f32 %v2621_v4, %v5233_v63  ;;  %v1302_v43 = vmul.f32 %v9638_v42, %v5233_v63 }
 0x30e   : > { %9637 = vst [vmem:[#allocation12_spill] sm:$0xff] %v6985_v62  ;;  %v1038_v46 = vmul.f32 %v6985_v62, %v6985_v62  ;;  %v7060_v62 = vpop.f32.mrf.mxu1 }
 0x30f   : > { %9632 = vst [vmem:[#allocation21_spill] sm:$0xff] %v6966_v54  ;;  %v2920_v0 = vmul.f32 %v6966_v54, %v6966_v54 }
 0x311   : > { %v3006_v61 = vsel %vm665_vm1, %v2920_v0, 0.0  ;;  %v7003_v0 = vpop.eup %4790 }
 0x312   : > { %1241 = vadd.xlane.f32.xlu1 %v1240_v52  ;;  %3001 = vadd.xlane.f32.xlu2 %v3000_v6  ;;  %v2627_v56 = vpop.xlane.xlu2 %2626  ;;  %v9639_v52 = vmax.f32 %v6515_v49, 0.0  ;;  %v9641_v6 = vmax.f32 %v6556_v27, 0.0  ;;  %v1192_v49 = vsel %vm665_vm1, %v1038_v46, 0.0  ;;  %v9644_v27 = vld [vmem:[#allocation18_spill] sm:$0xff]  ;;  %v909_v46 = vmul.f32 %v5233_v63, %v6651_v13 }
 0x313   : > { %3007 = vadd.xlane.f32.xlu0 %v3006_v61  ;;  %v2793_v59 = vmul.f32 %v2627_v56, %v5233_v63  ;;  %v2646_v61 = vsel %vm665_vm1, %v9455_v58, 0.0  ;;  %v2640_v56 = vsel %vm665_vm1, %v9454_v41, 0.0  ;;  %v9645_v41 = vld [vmem:[#allocation23_spill] sm:$0xff]  ;;  %vm1894_vm6 = vweird.f32 %v7003_v0 }
 0x314   : > { %v1203_v22 = vpop.xlane.xlu1 %1202  ;;  %v7007_v4 = vsub.f32 %v9639_v52, %v2791_v5  ;;  %v7024_v5 = vadd.f32 1e-05, %v1302_v43  ;;  %v1888_v52 = vmul.f32 %v7003_v0, %v6968_v7  ;;  %v7054_v29 = vsub.f32 %v9648_v30, %v909_v46  ;;  %vm7116_vm7 = vmor %vm1893_vm5, %vm1894_vm6 }
 0x315   : > { %v1297_v50 = vmul.f32 %v1203_v22, %v5233_v63  ;;  %v7011_v2 = vsub.f32 %v9641_v6, %v2793_v59  ;;  %v7021_v22 = vadd.f32 %v6882_v21, %v6141_v16  ;;  %v1301_v59 = vmul.f32 %v9644_v27, %v5233_v63  ;;  %v9646_v27 = vld [vmem:[#allocation22_spill] sm:$0xff] }
 0x316   : > { %9640 = vst [vmem:[#allocation13_spill] sm:$0xff] %v7007_v4  ;;  %v1303_v21 = vmul.f32 %v9645_v41, %v5233_v63  ;;  %4794 = vrsqrt.f32 %v7024_v5  ;;  %v1304_v41 = vmul.f32 %v9646_v27, %v5233_v63  ;;  %v1889_v58 = vmul.f32 %v7003_v0, %v1888_v52 }
 0x317   : > { %9642 = vst [vmem:[#allocation16_spill] sm:$0xff] %v7011_v2  ;;  %v7030_v6 = vadd.f32 1e-05, %v1297_v50  ;;  %v2921_v43 = vmul.f32 %v7011_v2, %v7011_v2  ;;  %v7044_v50 = vadd.f32 1e-05, %v1301_v59  ;;  %v9650_v27 = vmax.f32 %v7021_v22, 0.0 }
 0x318   : > { %9643 = vst [vmem:[#allocation28_spill] sm:$0xff] %v7021_v22  ;;  %v7050_v13 = vadd.f32 1e-05, %v1303_v21  ;;  %v7066_v55 = vadd.f32 1e-05, %v1304_v41  ;;  %v1890_v21 = vmul.f32 0.5, %v1889_v58  ;;  %v1305_v58 = vmul.f32 %v6955_v31, %v5233_v63 }
 0x319   : > { %4796 = vrsqrt.f32 %v7030_v6  ;;  %9649 = vst [vmem:[#allocation18_spill] sm:$0xff] %v7054_v29  ;;  %v3009_v2 = vsel %vm665_vm1, %v2921_v43, 0.0  ;;  %v2643_v52 = vsel %vm665_vm1, %v9650_v27, 0.0  ;;  %v9655_v7 = vmax.f32 %v6592_v38, 0.0 }
 0x31a   : > { %2647 = vadd.xlane.f32.xlu1 %v2646_v61  ;;  %2641 = vadd.xlane.f32.xlu2 %v2640_v56  ;;  %v2630_v42 = vpop.xlane.xlu0 %2629  ;;  %v2919_v61 = vmul.f32 %v7007_v4, %v7007_v4  ;;  %v7040_v56 = vpop.eup %4792  ;;  %4798 = vrsqrt.f32 %v7044_v50  ;;  %vm1913_vm11 = vweird.f32 %v7024_v5  ;;  %vm1863_vm14 = vweird.f32 %v7030_v6 }
 0x31b   : > { %1193 = vadd.xlane.f32.xlu0 %v1192_v49  ;;  %v1878_v59 = vmul.f32 %v7040_v56, %v6989_v33  ;;  %4800 = vrsqrt.f32 %v7050_v13  ;;  %v2794_v43 = vmul.f32 %v2630_v42, %v5233_v63  ;;  %v9651_v42 = vmax.f32 %v6587_v24, 0.0 }
 0x31c   : > { %v3003_v49 = vsel %vm665_vm1, %v2919_v61, 0.0  ;;  %v7068_v46 = vpop.eup %4794  ;;  %v1037_v61 = vmul.f32 %v7054_v29, %v7054_v29  ;;  %4802 = vrsqrt.f32 %v7066_v55  ;;  %vm1884_vm8 = vweird.f32 %v7040_v56 }
 0x31d   : > { %vm7146_vm10 = vmor %vm1883_vm9, %vm1884_vm8  ;;  %vm1914_vm12 = vweird.f32 %v7068_v46  ;;  %vm1903_vm15 = vweird.f32 %v7044_v50  ;;  %vm1923_vm5 = vweird.f32 %v7050_v13  ;;  %vm1933_vm9 = vweird.f32 %v7066_v55 }
 0x31e   : > { %v1189_v29 = vsel %vm665_vm1, %v1037_v61, 0.0  ;;  %vm7222_vm4 = vmor %vm1913_vm11, %vm1914_vm12 }
 0x31f   : > { %v7074_v4 = vpop.eup %4796 }
 0x320   : > { %v7078_v41 = vpop.eup %4798  ;;  %v1858_v27 = vmul.f32 %v7074_v4, %v7030_v6  ;;  %vm1864_vm13 = vweird.f32 %v7074_v4 }
 0x321   : > { %v1898_v24 = vmul.f32 %v7078_v41, %v7044_v50  ;;  %vm1904_vm0 = vweird.f32 %v7078_v41  ;;  %vm7200_vm2 = vmor %vm1863_vm14, %vm1864_vm13 }
 0x322   : > { %3010 = vadd.xlane.f32.xlu1 %v3009_v2  ;;  %3004 = vadd.xlane.f32.xlu2 %v3003_v49  ;;  %v854_v30 = vpop.xlane.xlu0 %853  ;;  %v1879_v2 = vmul.f32 %v7040_v56, %v1878_v59  ;;  %v1891_v49 = vsub.f32 1.5, %v1890_v21  ;;  %v1908_v59 = vmul.f32 %v7068_v46, %v7024_v5  ;;  %v7091_v21 = vpop.eup %4800 }
 0x323   : > { %2644 = vadd.xlane.f32.xlu0 %v2643_v52  ;;  %v7086_v52 = vsub.f32 %v9651_v42, %v2794_v43  ;;  %v7100_v43 = vpop.f32.mrf.mxu1  ;;  %v7102_v61 = vpop.eup %4802  ;;  %v927_v42 = vmul.f32 %v5233_v63, %v854_v30  ;;  %v1918_v57 = vmul.f32 %v7091_v21, %v7050_v13  ;;  %v1899_v30 = vmul.f32 %v7078_v41, %v1898_v24 }
 0x324   : > { %v1880_v54 = vmul.f32 0.5, %v1879_v2  ;;  %v1892_v31 = vmul.f32 %v7003_v0, %v1891_v49  ;;  %v7104_v2 = vadd.f32 1e-05, %v1305_v58  ;;  %v1909_v11 = vmul.f32 %v7068_v46, %v1908_v59 }
 0x325   : > { %9652 = vst [vmem:[#allocation23_spill] sm:$0xff] %v7086_v52  ;;  %v2922_v49 = vmul.f32 %v7086_v52, %v7086_v52  ;;  %v7132_v52 = vsub.f32 %v9655_v7, %v927_v42  ;;  %vm1924_vm3 = vweird.f32 %v7091_v21  ;;  %vm1934_vm8 = vweird.f32 %v7102_v61 }
 0x326   : > { %v1881_v22 = vsub.f32 1.5, %v1880_v54  ;;  %v1896_v54 = vsel %vm7116_vm7, %v7003_v0, %v1892_v31  ;;  %4804 = vrsqrt.f32 %v7104_v2  ;;  %v1910_v0 = vmul.f32 0.5, %v1909_v11  ;;  %vm7233_vm7 = vmor %vm1903_vm15, %vm1904_vm0 }
 0x327   : > { %9656 = vst [vmem:[#allocation22_spill] sm:$0xff] %v7132_v52  ;;  %v3012_v1 = vsel %vm665_vm1, %v2922_v49, 0.0  ;;  %v1919_v31 = vmul.f32 %v7091_v21, %v1918_v57  ;;  %v1055_v11 = vmul.f32 %v7132_v52, %v7132_v52  ;;  %v9662_v52 = vmax.f32 %v6654_v45, 0.0  ;;  %vm7252_vm11 = vmor %vm1923_vm5, %vm1924_vm3 }
 0x328   : > { %v7136_v17 = vmul.f32 %v7040_v56, %v1881_v22  ;;  %v1911_v49 = vsub.f32 1.5, %v1910_v0  ;;  %vm7276_vm14 = vmor %vm1933_vm9, %vm1934_vm8  ;;  %v9679_v22 = vld [vmem:[#allocation5_spill] sm:$0xff]  ;;  %vm1943_vm15 = vweird.f32 %v7104_v2 }
 0x329   : > { %v1920_v58 = vmul.f32 0.5, %v1919_v31 }
 0x32a   : > { %1190 = vadd.xlane.f32.xlu2 %v1189_v29  ;;  %v7093_v36 = vpop.xlane.xlu0 %1181  ;;  %v1859_v29 = vmul.f32 %v7074_v4, %v1858_v27  ;;  %v1928_v27 = vmul.f32 %v7102_v61, %v7066_v55  ;;  %v7186_v32 = vmul.f32 %v7068_v46, %v1911_v49 }
 0x32c   : > { %v2975_v20 = vpop.xlane.xlu1 %2974  ;;  %v1929_v38 = vmul.f32 %v7102_v61, %v1928_v27  ;;  %v9660_v27 = vmax.f32 %v6644_v48, 0.0 }
 0x32d   : > { %v1206_v23 = vpop.xlane.xlu2 %1205 }
 0x32e   : > { %v1298_v51 = vmul.f32 %v1206_v23, %v5233_v63  ;;  %v1860_v23 = vmul.f32 0.5, %v1859_v29  ;;  %v1900_v29 = vmul.f32 0.5, %v1899_v30  ;;  %v7159_v30 = vpop.f32.mrf.mxu1  ;;  %v1930_v31 = vmul.f32 0.5, %v1929_v38 }
 0x330   : > { %v7127_v59 = vadd.f32 1e-05, %v1298_v51  ;;  %v3165_v51 = vmul.f32 %v2975_v20, %v5233_v63  ;;  %v1861_v57 = vsub.f32 1.5, %v1860_v23  ;;  %v1901_v0 = vsub.f32 1.5, %v1900_v29 }
 0x331   : > { %v1921_v29 = vsub.f32 1.5, %v1920_v58 }
 0x332   : > { %4806 = vrsqrt.f32 %v7127_v59  ;;  %3013 = vadd.xlane.f32.xlu2 %v3012_v1  ;;  %v806_v24 = vpop.xlane.xlu0 %805  ;;  %v9659_v1 = vld [vmem:[#allocation2_spill] sm:$0xff]  ;;  %v1902_v58 = vmul.f32 %v7078_v41, %v1901_v0  ;;  %vm1873_vm12 = vweird.f32 %v7127_v59 }
 0x333   : > { %v911_v42 = vmul.f32 %v5233_v63, %v806_v24  ;;  %v7153_v20 = vmul.f32 %v1896_v54, %v9659_v1  ;;  %v7165_v24 = vpop.eup %4804  ;;  %v7169_v54 = vadd.f32 1e-05, %v3165_v51 }
 0x334   : > { %v857_v23 = vpop.xlane.xlu1 %856  ;;  %v1938_v38 = vmul.f32 %v7165_v24, %v7104_v2  ;;  %v1906_v50 = vsel %vm7233_vm7, %v7078_v41, %v1902_v58  ;;  %v7369_v2 = vadd.f32 %v6962_v25, %v6141_v16 }
 0x335   : > { %v7163_v7 = vsub.f32 %v9660_v27, %v911_v42  ;;  %v928_v1 = vmul.f32 %v5233_v63, %v857_v23  ;;  %v1862_v42 = vmul.f32 %v7074_v4, %v1861_v57  ;;  %v1243_v23 = vsel %vm665_vm1, %v1055_v11, 0.0 }
 0x336   : > { %4808 = vrsqrt.f32 %v7169_v54  ;;  %v1931_v11 = vsub.f32 1.5, %v1930_v31  ;;  %v1290_v31 = vmul.f32 %v7093_v36, %v5233_v63  ;;  %v1939_v0 = vmul.f32 %v7165_v24, %v1938_v38  ;;  %v7240_v13 = vpop.f32.mrf.mxu1 }
 0x337   : > { %9661 = vst [vmem:[#allocation25_spill] sm:$0xff] %v7163_v7  ;;  %v1039_v48 = vmul.f32 %v7163_v7, %v7163_v7  ;;  %v7182_v51 = vsub.f32 %v9662_v52, %v928_v1  ;;  %v2133_v58 = vmul.f32 %v5711_v39, %v7153_v20  ;;  %v9676_v20 = vsel %vm7146_vm10, %v7040_v56, %v7136_v17 }
 0x338   : > { %v7172_v33 = vpop.eup %4806  ;;  %v7265_v41 = vadd.f32 1e-05, %v1290_v31  ;;  %vm1944_vm10 = vweird.f32 %v7165_v24  ;;  %vm3299_vm3 = vweird.f32 %v7169_v54 }
 0x339   : > { %v1868_v27 = vmul.f32 %v7172_v33, %v7127_v59  ;;  %v1195_v7 = vsel %vm665_vm1, %v1039_v48, 0.0  ;;  %v1056_v52 = vmul.f32 %v7182_v51, %v7182_v51  ;;  %vm1874_vm6 = vweird.f32 %v7172_v33  ;;  %vm7363_vm0 = vmor %vm1943_vm15, %vm1944_vm10 }
 0x33a   : > { %1244 = vadd.xlane.f32.xlu2 %v1243_v23  ;;  %1196 = vadd.xlane.f32.xlu1 %v1195_v7  ;;  %v2636_v57 = vpop.xlane.xlu0 %2635  ;;  %v1866_v7 = vsel %vm7200_vm2, %v7074_v4, %v1862_v42  ;;  %v9665_v23 = vmax.f32 %v6687_v12, 0.0  ;;  %v1932_v12 = vmul.f32 %v7102_v61, %v1931_v11  ;;  %v7263_v11 = vadd.f32 %v7060_v62, %v6141_v16  ;;  %vm1875_vm13 = vmor %vm1873_vm12, %vm1874_vm6 }
 0x33b   : > { %v1869_v45 = vmul.f32 %v7172_v33, %v1868_v27  ;;  %v2796_v6 = vmul.f32 %v2636_v57, %v5233_v63  ;;  %v1246_v48 = vsel %vm665_vm1, %v1056_v52, 0.0  ;;  %v1922_v27 = vmul.f32 %v7091_v21, %v1921_v29 }
 0x33c   : > { %1247 = vadd.xlane.f32.xlu0 %v1246_v48  ;;  %v2065_v5 = vmul.f32 %v1866_v7, %v6566_v10  ;;  %v7244_v38 = vpop.eup %4808  ;;  %v1916_v59 = vsel %vm7222_vm4, %v7068_v46, %v7186_v32  ;;  %v1940_v62 = vmul.f32 0.5, %v1939_v0  ;;  %v1936_v7 = vsel %vm7276_vm14, %v7102_v61, %v1932_v12  ;;  %v9678_v61 = vld [vmem:[#allocation11_spill] sm:$0xff] }
 0x33d   : > { %v1870_v1 = vmul.f32 0.5, %v1869_v45  ;;  %v7216_v57 = vsub.f32 %v9665_v23, %v2796_v6  ;;  %v1926_v52 = vsel %vm7252_vm11, %v7091_v21, %v1922_v27  ;;  %v3294_v32 = vmul.f32 %v7244_v38, %v7169_v54  ;;  %v9677_v23 = vld [vmem:[#allocation7_spill] sm:$0xff]  ;;  %v9680_v45 = vld [vmem:[#allocation10_spill] sm:$0xff] }
 0x33e   : > { %v2069_v4 = vmul.f32 %v1906_v50, %v9677_v23  ;;  %v2071_v0 = vmul.f32 %v1926_v52, %v9678_v61  ;;  %4810 = vrsqrt.f32 %v7265_v41  ;;  %v1941_v12 = vsub.f32 1.5, %v1940_v62  ;;  %v4692_v23 = vld [vmem:[%s9384_s3] sm:$0xff]  ;;  %9685 = vst [vmem:[#allocation7_spill] sm:$0xff] %v7369_v2 }
 0x33f   : > { %9666 = vst [vmem:[#allocation2_spill] sm:$0xff] %v7216_v57  ;;  %v1871_v42 = vsub.f32 1.5, %v1870_v1  ;;  %v2924_v29 = vmul.f32 %v7216_v57, %v7216_v57  ;;  %v2130_v1 = vmul.f32 %v5711_v39, %v2065_v5  ;;  %v2072_v17 = vmul.f32 %v1936_v7, %v9680_v45 }
 0x340   : > { %v3295_v56 = vmul.f32 %v7244_v38, %v3294_v32  ;;  %v2136_v62 = vmul.f32 %v5711_v39, %v2071_v0  ;;  %v7344_v0 = vadd.f32 %v5725_v28, %v2133_v58  ;;  %vm3300_vm2 = vweird.f32 %v7244_v38 }
 0x341   : > { %v1872_v10 = vmul.f32 %v7172_v33, %v1871_v42  ;;  %v3018_v55 = vsel %vm665_vm1, %v2924_v29, 0.0  ;;  %v9481_v42 = vmax.f32 %v7263_v11, 0.0  ;;  %v2070_v29 = vmul.f32 %v1916_v59, %v9679_v22  ;;  %vm7424_vm4 = vmor %vm3299_vm3, %vm3300_vm2 }
 0x342   : > { %3019 = vadd.xlane.f32.xlu1 %v3018_v55  ;;  %v4693_v55 = vld [vmem:[%s9384_s3 + $0x8] sm:$0xff]  ;;  %v2134_v59 = vmul.f32 %v5711_v39, %v2069_v4  ;;  %vm1793_vm11 = vweird.f32 %v7265_v41 }
 0x343   : > { %v1876_v49 = vsel %vm1875_vm13, %v7172_v33, %v1872_v10  ;;  %v2981_v6 = vpop.xlane.xlu1 %2980  ;;  %v9675_v33 = vld [vmem:[#allocation3_spill] sm:$0xff]  ;;  %v2195_v10 = vadd.f32 %v5725_v28, %v2130_v1  ;;  %v2658_v32 = vsel %vm665_vm1, %v9481_v42, 0.0  ;;  %4278 = vmatpush.bf16.msra.mxu2 %v4693_v55  ;;  %4697 = vmatpush.bf16.msra.mxu3 %v4693_v55 }
 0x344   : > { %v2066_v46 = vmul.f32 %v1876_v49, %v6634_v34  ;;  %v3167_v27 = vmul.f32 %v2981_v6, %v5233_v63  ;;  %v2067_v31 = vmul.f32 %v9676_v20, %v9675_v33  ;;  %v7321_v49 = vadd.f32 %v6932_v26, %v6141_v16  ;;  %v7323_v6 = vpop.f32.mrf.mxu1  ;;  %v7331_v26 = vpop.eup %4810 }
 0x345   : > { %v2978_v48 = vpop.xlane.xlu2 %2977  ;;  %v1942_v33 = vmul.f32 %v7165_v24, %v1941_v12  ;;  %v3296_v20 = vmul.f32 0.5, %v3295_v56  ;;  %v1788_v56 = vmul.f32 %v7331_v26, %v7265_v41  ;;  %vm1794_vm8 = vweird.f32 %v7331_v26 }
 0x346   : > { %v3166_v34 = vmul.f32 %v2978_v48, %v5233_v63  ;;  %v2131_v36 = vmul.f32 %v5711_v39, %v2066_v46  ;;  %v7303_v5 = vadd.f32 1e-05, %v3167_v27  ;;  %v2132_v21 = vmul.f32 %v5711_v39, %v2067_v31  ;;  %v1185_v46 = vpop.xlane.xlu0 %1184  ;;  %vm7507_vm12 = vmor %vm1793_vm11, %vm1794_vm8 }
 0x347   : > { %v2135_v48 = vmul.f32 %v5711_v39, %v2070_v29  ;;  %v2137_v27 = vmul.f32 %v5711_v39, %v2072_v17  ;;  %v9477_v12 = vmax.f32 %v7321_v49, 0.0  ;;  %v1291_v22 = vmul.f32 %v1185_v46, %v5233_v63  ;;  %4279 = vmatpush.bf16.msra.mxu2 %v4692_v23  ;;  %4698 = vmatpush.bf16.msra.mxu3 %v4692_v23 }
 0x348   : > { %v7308_v50 = vadd.f32 1e-05, %v3166_v34  ;;  %v2196_v52 = vadd.f32 %v5725_v28, %v2131_v36  ;;  %4812 = vrsqrt.f32 %v7303_v5  ;;  %v7341_v61 = vadd.f32 %v5725_v28, %v2132_v21 }
 0x349   : > { %v7347_v34 = vadd.f32 %v5725_v28, %v2134_v59  ;;  %v7350_v36 = vadd.f32 %v5725_v28, %v2136_v62  ;;  %v9681_v29 = vmax.f32 %v6745_v37, 0.0  ;;  %v7374_v37 = vadd.f32 %v5725_v28, %v2135_v48 }
 0x34a   : > { %4814 = vrsqrt.f32 %v7308_v50  ;;  %v2235_v7 = vpack.c.bf16 %v2196_v52, %v2195_v10  ;;  %2659 = vadd.xlane.f32.xlu1 %v2658_v32  ;;  %v7377_v10 = vadd.f32 %v5725_v28, %v2137_v27  ;;  %v1946_v55 = vsel %vm7363_vm0, %v7165_v24, %v1942_v33  ;;  %v9686_v27 = vld [vmem:[#allocation27_spill] sm:$0xff] }
 0x34b   : > { %v809_v1 = vpop.xlane.xlu1 %808  ;;  %v3297_v21 = vsub.f32 1.5, %v3296_v20  ;;  %v2236_v62 = vpack.c.bf16 %v7344_v0, %v7341_v61  ;;  %v7391_v46 = vadd.f32 1e-05, %v1291_v22  ;;  %v2649_v48 = vsel %vm665_vm1, %v9477_v12, 0.0 }
 0x34c   : > { %4639 = vmatmul.msk.bf16.vlgmr.msrb.gmra.mxu3 %vm665_vm1, %v2235_v7  ;;  %v912_v31 = vmul.f32 %v5233_v63, %v809_v1  ;;  %v2073_v33 = vmul.f32 %v1946_v55, %v9686_v27  ;;  %v9478_v20 = vmax.f32 %v7369_v2, 0.0  ;;  %v7402_v61 = vpop.f32.mrf.mxu1  ;;  %v7414_v17 = vadd.f32 %v7100_v43, %v6141_v16  ;;  %v9697_v2 = vld [vmem:[#allocation15_spill] sm:$0xff] }
 0x34d   : > { %v1230_v4 = vpop.xlane.xlu2 %1229  ;;  %v3298_v0 = vmul.f32 %v7244_v38, %v3297_v21  ;;  %4816 = vrsqrt.f32 %v7391_v46  ;;  %vm3309_vm6 = vweird.f32 %v7308_v50  ;;  %vm3319_vm13 = vweird.f32 %v7303_v5 }
 0x34e   : > { %v7357_v45 = vsub.f32 %v9681_v29, %v912_v31  ;;  %v7359_v58 = vpop.eup %4812  ;;  %v1306_v1 = vmul.f32 %v1230_v4, %v5233_v63  ;;  %v1789_v31 = vmul.f32 %v7331_v26, %v1788_v56  ;;  %v7410_v29 = vadd.f32 %v7000_v19, %v6141_v16  ;;  %9688 = vst [vmem:[#allocation5_spill] sm:$0xff] %v7414_v17 }
 0x34f   : > { %v3314_v59 = vmul.f32 %v7359_v58, %v7303_v5  ;;  %v2138_v27 = vmul.f32 %v5711_v39, %v2073_v33  ;;  %v7445_v33 = vadd.f32 %v7323_v6, %v6141_v16  ;;  %vm3320_vm9 = vweird.f32 %v7359_v58 }
 0x350   : > { %9682 = vst [vmem:[#allocation3_spill] sm:$0xff] %v7357_v45  ;;  %v4815_v52 = vpop.eup %4814  ;;  %v1040_v24 = vmul.f32 %v7357_v45, %v7357_v45  ;;  %v7418_v21 = vadd.f32 1e-05, %v1306_v1  ;;  %v1790_v19 = vmul.f32 0.5, %v1789_v31  ;;  %v3302_v1 = vsel %vm7424_vm4, %v7244_v38, %v3298_v0  ;;  %v1239_v38 = vpop.xlane.xlu0 %1238  ;;  %vm7523_vm14 = vmor %vm3319_vm13, %vm3320_vm9 }
 0x351   : > { %v3304_v25 = vmul.f32 %v4815_v52, %v7308_v50  ;;  %v3315_v4 = vmul.f32 %v7359_v58, %v3314_v59  ;;  %9687 = vst [vmem:[#allocation11_spill] sm:$0xff] %v7410_v29  ;;  %vm3310_vm5 = vweird.f32 %v4815_v52  ;;  %v9479_v31 = vmax.f32 %v7410_v29, 0.0 }
 0x352   : > { %v1198_v22 = vsel %vm665_vm1, %v1040_v24, 0.0  ;;  %9691 = vst [vmem:[#allocation10_spill] sm:$0xff] %v7445_v33  ;;  %vm3311_vm7 = vmor %vm3309_vm6, %vm3310_vm5  ;;  %4818 = vrsqrt.f32 %v7418_v21  ;;  %v7451_v0 = vsel %vm665_vm1, %v9478_v20, 0.0  ;;  %v7472_v20 = vadd.f32 %v5725_v28, %v2138_v27 }
 0x353   : > { %v3305_v23 = vmul.f32 %v4815_v52, %v3304_v25  ;;  %1199 = vadd.xlane.f32.xlu2 %v1198_v22  ;;  %vm1803_vm2 = vweird.f32 %v7391_v46  ;;  %vm1953_vm4 = vweird.f32 %v7418_v21 }
 0x355   : > { %v3306_v56 = vmul.f32 0.5, %v3305_v23  ;;  %v2984_v55 = vpop.xlane.xlu2 %2983  ;;  %v2987_v25 = vpop.xlane.xlu1 %2986  ;;  %v3316_v23 = vmul.f32 0.5, %v3315_v4  ;;  %v3933_v4 = vmul.f32 %v3302_v1, %v6639_v44  ;;  %v1309_v44 = vmul.f32 %v1239_v38, %v5233_v63 }
 0x356   : > { %v3168_v59 = vmul.f32 %v2984_v55, %v5233_v63  ;;  %v3169_v24 = vmul.f32 %v2987_v25, %v5233_v63  ;;  %v9480_v25 = vmax.f32 %v7414_v17, 0.0  ;;  %v7469_v1 = vsel %vm665_vm1, %v9479_v31, 0.0 }
 0x357   : > { %v3307_v54 = vsub.f32 1.5, %v3306_v56  ;;  %v7441_v56 = vadd.f32 %v7159_v30, %v6141_v16  ;;  %v4967_v30 = vld [vmem:[%s9385_s4] sm:$0xff]  ;;  %v7499_v32 = vadd.f32 1e-05, %v1309_v44 }
 0x358   : > { %v7432_v22 = vadd.f32 1e-05, %v3168_v59  ;;  %v7434_v55 = vadd.f32 1e-05, %v3169_v24  ;;  %v7458_v6 = vperm.slane %v4967_v30, 4  ;;  %v7460_v59 = vpop.eup %4816  ;;  %v1791_v24 = vsub.f32 1.5, %v1790_v19 }
 0x359   : > { %v3308_v12 = vmul.f32 %v4815_v52, %v3307_v54  ;;  %v3317_v54 = vsub.f32 1.5, %v3316_v23  ;;  %v9482_v19 = vmax.f32 %v7445_v33, 0.0  ;;  %v2437_v23 = vpop.f32.mrf.mxu1  ;;  %v1798_v27 = vmul.f32 %v7460_v59, %v7391_v46 }
 0x35a   : > { %4820 = vrsqrt.f32 %v7432_v22  ;;  %v7487_v31 = vperm.slane %v4967_v30, 5  ;;  %v1792_v42 = vmul.f32 %v7331_v26, %v1791_v24  ;;  %vm3329_vm15 = vweird.f32 %v7432_v22 }
 0x35b   : > { %v3312_v50 = vsel %vm3311_vm7, %v4815_v52, %v3308_v12  ;;  %4822 = vrsqrt.f32 %v7434_v55  ;;  %2650 = vadd.xlane.f32.xlu2 %v2649_v48  ;;  %v7520_v44 = vsel %vm665_vm1, %v9482_v19, 0.0  ;;  %v7536_v19 = vadd.f32 %v7402_v61, %v6141_v16 }
 0x35c   : > { %v3934_v43 = vmul.f32 %v3312_v50, %v6752_v14  ;;  %4640 = vmatmul.msk.bf16.gmra.mxu3 %vm665_vm1, %v2236_v62  ;;  %v7477_v14 = vsel %vm665_vm1, %v9480_v25, 0.0  ;;  %v3998_v50 = vmul.f32 %v7458_v6, %v3933_v4  ;;  %v7489_v25 = vpop.eup %4818  ;;  %v3318_v62 = vmul.f32 %v7359_v58, %v3317_v54 }
 0x35d   : > { %v1179_v12 = vpop.xlane.xlu2 %1178  ;;  %v1233_v52 = vpop.xlane.xlu1 %1232  ;;  %v7512_v54 = vadd.f32 %v2437_v23, %v6141_v16  ;;  %v1948_v33 = vmul.f32 %v7489_v25, %v7418_v21  ;;  %vm1804_vm3 = vweird.f32 %v7460_v59  ;;  %vm3339_vm9 = vweird.f32 %v7434_v55 }
 0x35e   : > { %v1289_v48 = vmul.f32 %v1179_v12, %v5233_v63  ;;  %v3999_v38 = vmul.f32 %v7458_v6, %v3934_v43  ;;  %v1307_v4 = vmul.f32 %v1233_v52, %v5233_v63  ;;  %v1799_v52 = vmul.f32 %v7460_v59, %v1798_v27  ;;  %vm7624_vm7 = vmor %vm1803_vm2, %vm1804_vm3 }
 0x35f   : > { %9694 = vst [vmem:[#allocation27_spill] sm:$0xff] %v7512_v54  ;;  %v4063_v5 = vadd.f32 %v7487_v31, %v3998_v50  ;;  %v3322_v27 = vsel %vm7523_vm14, %v7359_v58, %v3318_v62  ;;  %v9489_v62 = vmax.f32 %v7512_v54, 0.0 }
 0x360   : > { %v7494_v12 = vadd.f32 1e-05, %v1289_v48  ;;  %v7496_v43 = vpop.eup %4820  ;;  %v4064_v30 = vadd.f32 %v7487_v31, %v3999_v38  ;;  %v1796_v38 = vsel %vm7507_vm12, %v7331_v26, %v1792_v42  ;;  %v7545_v50 = vadd.f32 1e-05, %v1307_v4 }
 0x361   : > { %v7503_v7 = vpop.eup %4822  ;;  %v3324_v41 = vmul.f32 %v7496_v43, %v7432_v22  ;;  %v2058_v58 = vmul.f32 %v1796_v38, %v6620_v18  ;;  %v3935_v45 = vmul.f32 %v3322_v27, %v9697_v2  ;;  %v2440_v4 = vpop.f32.mrf.mxu1  ;;  %vm3330_vm10 = vweird.f32 %v7496_v43 }
 0x362   : > { %v3334_v23 = vmul.f32 %v7503_v7, %v7434_v55  ;;  %4824 = vrsqrt.f32 %v7494_v12  ;;  %v4127_v29 = vpack.c.bf16 %v4064_v30, %v4063_v5  ;;  %v1949_v18 = vmul.f32 %v7489_v25, %v1948_v33  ;;  %vm3331_vm0 = vmor %vm3329_vm15, %vm3330_vm10 }
 0x363   : > { %v3325_v17 = vmul.f32 %v7496_v43, %v3324_v41  ;;  %4826 = vrsqrt.f32 %v7499_v32  ;;  %v1800_v41 = vmul.f32 0.5, %v1799_v52  ;;  %v7572_v38 = vadd.f32 %v2440_v4, %v6141_v16 }
 0x364   : > { %v3335_v61 = vmul.f32 %v7503_v7, %v3334_v23  ;;  %4655 = vmatmul.msk.bf16.vlgmr.msra.gmra.mxu2 %vm665_vm1, %v4127_v29  ;;  %4828 = vrsqrt.f32 %v7545_v50  ;;  %v4000_v22 = vmul.f32 %v7458_v6, %v3935_v45  ;;  %v7580_v33 = vsel %vm665_vm1, %v9489_v62, 0.0 }
 0x365   : > { %v2993_v24 = vpop.xlane.xlu1 %2992  ;;  %v2990_v42 = vpop.xlane.xlu2 %2989  ;;  %v3326_v26 = vmul.f32 0.5, %v3325_v17  ;;  %v1801_v27 = vsub.f32 1.5, %v1800_v41  ;;  %v1950_v45 = vmul.f32 0.5, %v1949_v18  ;;  %vm3340_vm6 = vweird.f32 %v7503_v7 }
 0x366   : > { %v3171_v57 = vmul.f32 %v2993_v24, %v5233_v63  ;;  %v3170_v48 = vmul.f32 %v2990_v42, %v5233_v63  ;;  %v3336_v29 = vmul.f32 0.5, %v3335_v61  ;;  %v9698_v61 = vpack.c.bf16 %v7374_v37, %v7347_v34  ;;  %vm7650_vm13 = vmor %vm3339_vm9, %vm3340_vm6 }
 0x367   : > { %v3327_v30 = vsub.f32 1.5, %v3326_v26  ;;  %v4065_v18 = vadd.f32 %v7487_v31, %v4000_v22  ;;  %vm1783_vm8 = vweird.f32 %v7494_v12  ;;  %vm1954_vm12 = vweird.f32 %v7489_v25 }
 0x368   : > { %v7555_v17 = vadd.f32 1e-05, %v3171_v57  ;;  %v7557_v23 = vadd.f32 1e-05, %v3170_v48  ;;  %v7559_v5 = vpop.eup %4824  ;;  %v7590_v48 = vmul.f32 %v5711_v39, %v2058_v58  ;;  %v1802_v58 = vmul.f32 %v7460_v59, %v1801_v27  ;;  %vm7675_vm14 = vmor %vm1953_vm4, %vm1954_vm12 }
 0x369   : > { %v3328_v2 = vmul.f32 %v7496_v43, %v3327_v30  ;;  %v1778_v52 = vmul.f32 %v7559_v5, %v7494_v12  ;;  %v7569_v57 = vpop.eup %4826  ;;  %v3337_v30 = vsub.f32 1.5, %v3336_v29  ;;  %vm1784_vm5 = vweird.f32 %v7559_v5 }
 0x36a   : > { %4830 = vrsqrt.f32 %v7555_v17  ;;  %v7597_v37 = vpop.eup %4828  ;;  %v1951_v27 = vsub.f32 1.5, %v1950_v45  ;;  %vm1785_vm11 = vmor %vm1783_vm8, %vm1784_vm5  ;;  %vm3349_vm15 = vweird.f32 %v7557_v23  ;;  %v2188_v21 = vadd.f32 %v5725_v28, %v7590_v48 }
 0x36b   : > { %v3332_v42 = vsel %vm3331_vm0, %v7496_v43, %v3328_v2  ;;  %v1779_v26 = vmul.f32 %v7559_v5, %v1778_v52  ;;  %4832 = vrsqrt.f32 %v7557_v23  ;;  %v1958_v46 = vmul.f32 %v7597_v37, %v7545_v50 }
 0x36c   : > { %4641 = vmatmul.msk.bf16.gmra.mxu3 %vm665_vm1, %v9698_v61  ;;  %v3936_v41 = vmul.f32 %v3332_v42, %v6806_v3  ;;  %v1978_v61 = vmul.f32 %v7569_v57, %v7499_v32  ;;  %vm1964_vm5 = vweird.f32 %v7597_v37  ;;  %vm3359_vm6 = vweird.f32 %v7555_v17 }
 0x36d   : > { %v1188_v43 = vpop.xlane.xlu1 %1187  ;;  %v2633_v4 = vpop.xlane.xlu2 %2632  ;;  %v1780_v2 = vmul.f32 0.5, %v1779_v26  ;;  %v9699_v26 = vmax.f32 %v6890_v9, 0.0  ;;  %v3338_v9 = vmul.f32 %v7503_v7, %v3337_v30  ;;  %vm1963_vm9 = vweird.f32 %v7545_v50 }
 0x36e   : > { %v1292_v52 = vmul.f32 %v1188_v43, %v5233_v63  ;;  %v2795_v34 = vmul.f32 %v2633_v4, %v5233_v63  ;;  %v4001_v62 = vmul.f32 %v7458_v6, %v3936_v41  ;;  %v1979_v54 = vmul.f32 %v7569_v57, %v1978_v61 }
 0x36f   : > { %v1781_v29 = vsub.f32 1.5, %v1780_v2 }
 0x370   : > { %v7604_v3 = vpop.eup %4830  ;;  %v7608_v42 = vadd.f32 1e-05, %v1292_v52  ;;  %v7612_v43 = vsub.f32 %v9699_v26, %v2795_v34  ;;  %v4066_v22 = vadd.f32 %v7487_v31, %v4001_v62  ;;  %v1806_v62 = vsel %vm7624_vm7, %v7460_v59, %v1802_v58 }
 0x371   : > { %v3354_v41 = vmul.f32 %v7604_v3, %v7555_v17  ;;  %v7618_v4 = vpop.eup %4832  ;;  %v1782_v45 = vmul.f32 %v7559_v5, %v1781_v29  ;;  %v1952_v59 = vmul.f32 %v7489_v25, %v1951_v27  ;;  %vm3360_vm2 = vweird.f32 %v7604_v3 }
 0x372   : > { %9700 = vst [vmem:[#allocation15_spill] sm:$0xff] %v7612_v43  ;;  %4834 = vrsqrt.f32 %v7608_v42  ;;  %v3344_v30 = vmul.f32 %v7618_v4, %v7557_v23  ;;  %v4128_v34 = vpack.c.bf16 %v4066_v22, %v4065_v18  ;;  %v2923_v29 = vmul.f32 %v7612_v43, %v7612_v43  ;;  %vm7735_vm8 = vmor %vm3359_vm6, %vm3360_vm2 }
 0x373   : > { %v1786_v52 = vsel %vm1785_vm11, %v7559_v5, %v1782_v45  ;;  %v3355_v12 = vmul.f32 %v7604_v3, %v3354_v41  ;;  %v3342_v18 = vsel %vm7650_vm13, %v7503_v7, %v3338_v9  ;;  %v9705_v45 = vld [vmem:[#allocation14_spill] sm:$0xff]  ;;  %vm3350_vm10 = vweird.f32 %v7618_v4  ;;  %vm7753_vm11 = vmor %vm1963_vm9, %vm1964_vm5 }
 0x374   : > { %v2057_v58 = vmul.f32 %v1786_v52, %v6845_v35  ;;  %v3345_v5 = vmul.f32 %v7618_v4, %v3344_v30  ;;  %v3015_v2 = vsel %vm665_vm1, %v2923_v29, 0.0  ;;  %v2059_v24 = vmul.f32 %v1806_v62, %v9705_v45  ;;  %4656 = vmatmul.msk.bf16.gmra.mxu2 %vm665_vm1, %v4128_v34  ;;  %vm3351_vm0 = vmor %vm3349_vm15, %vm3350_vm10 }
 0x375   : > { %v2999_v26 = vpop.xlane.xlu1 %2998  ;;  %v2996_v41 = vpop.xlane.xlu2 %2995  ;;  %v1959_v35 = vmul.f32 %v7597_v37, %v1958_v46  ;;  %3016 = vadd.xlane.f32.xlu0 %v3015_v2  ;;  %v3356_v43 = vmul.f32 0.5, %v3355_v12  ;;  %v3937_v62 = vmul.f32 %v3342_v18, %v6830_v47  ;;  %v1956_v34 = vsel %vm7675_vm14, %v7489_v25, %v1952_v59 }
 0x376   : > { %v3173_v27 = vmul.f32 %v2999_v26, %v5233_v63  ;;  %v3172_v22 = vmul.f32 %v2996_v41, %v5233_v63  ;;  %v3346_v52 = vmul.f32 0.5, %v3345_v5  ;;  %v2122_v9 = vmul.f32 %v5711_v39, %v2057_v58 }
 0x377   : > { %v1960_v29 = vmul.f32 0.5, %v1959_v35  ;;  %v7691_v5 = vmul.f32 0.5, %v1979_v54  ;;  %v3357_v26 = vsub.f32 1.5, %v3356_v43  ;;  %v9708_v25 = vpack.c.bf16 %v7377_v10, %v7350_v36 }
 0x378   : > { %v4835_v30 = vpop.eup %4834  ;;  %v7666_v55 = vadd.f32 1e-05, %v3173_v27  ;;  %v7668_v7 = vadd.f32 1e-05, %v3172_v22  ;;  %v3347_v46 = vsub.f32 1.5, %v3346_v52  ;;  %v2187_v41 = vadd.f32 %v5725_v28, %v2122_v9 }
 0x379   : > { %v1808_v12 = vmul.f32 %v4835_v30, %v7608_v42  ;;  %v7699_v23 = vmul.f32 %v5711_v39, %v2059_v24  ;;  %v2074_v48 = vmul.f32 %v1956_v34, %v6768_v60  ;;  %v4002_v43 = vmul.f32 %v7458_v6, %v3937_v62 }
 0x37a   : > { %4836 = vrsqrt.f32 %v7666_v55  ;;  %v3348_v58 = vmul.f32 %v7618_v4, %v3347_v46  ;;  %v2231_v2 = vpack.c.bf16 %v2188_v21, %v2187_v41  ;;  %v1961_v10 = vsub.f32 1.5, %v1960_v29 }
 0x37b   : > { %v1809_v47 = vmul.f32 %v4835_v30, %v1808_v12  ;;  %4838 = vrsqrt.f32 %v7668_v7  ;;  %vm1814_vm3 = vweird.f32 %v4835_v30  ;;  %vm1813_vm4 = vweird.f32 %v7608_v42 }
 0x37c   : > { %4642 = vmatmul.msk.bf16.gmra.mxu3 %vm665_vm1, %v9708_v25  ;;  %v3352_v59 = vsel %vm3351_vm0, %v7618_v4, %v3348_v58  ;;  %v3358_v4 = vmul.f32 %v7604_v3, %v3357_v26  ;;  %4635 = vmatmul.msk.bf16.gmra.mxu1 %vm665_vm1, %v2231_v2  ;;  %v2139_v46 = vmul.f32 %v5711_v39, %v2074_v48  ;;  %vm1815_vm7 = vmor %vm1813_vm4, %vm1814_vm3  ;;  %vm3369_vm13 = vweird.f32 %v7668_v7 }
 0x37d   : > { %v1810_v18 = vmul.f32 0.5, %v1809_v47  ;;  %v2639_v27 = vpop.xlane.xlu1 %2638  ;;  %v1236_v54 = vpop.xlane.xlu2 %1235  ;;  %v3938_v22 = vmul.f32 %v3352_v59, %v6866_v53  ;;  %2653 = vadd.xlane.f32.xlu0 %v7451_v0  ;;  %v9709_v53 = vmax.f32 %v6928_v8, 0.0  ;;  %v1962_v12 = vmul.f32 %v7597_v37, %v1961_v10 }
 0x37e   : > { %v2797_v45 = vmul.f32 %v2639_v27, %v5233_v63  ;;  %v1308_v36 = vmul.f32 %v1236_v54, %v5233_v63  ;;  %v4067_v21 = vadd.f32 %v7487_v31, %v4002_v43  ;;  %v3362_v29 = vsel %vm7735_vm8, %v7604_v3, %v3358_v4 }
 0x37f   : > { %v1811_v24 = vsub.f32 1.5, %v1810_v18  ;;  %v4003_v9 = vmul.f32 %v7458_v6, %v3938_v22  ;;  %v2204_v59 = vadd.f32 %v5725_v28, %v2139_v46  ;;  %v1966_v43 = vsel %vm7753_vm11, %v7597_v37, %v1962_v12 }
 0x380   : > { %v7709_v60 = vpop.eup %4836  ;;  %v7715_v35 = vsub.f32 %v9709_v53, %v2797_v45  ;;  %v7717_v52 = vadd.f32 1e-05, %v1308_v36  ;;  %v3939_v22 = vmul.f32 %v3362_v29, %v6870_v15  ;;  %v1981_v15 = vsub.f32 1.5, %v7691_v5 }
 0x381   : > { %v7720_v61 = vpop.eup %4838  ;;  %v1812_v62 = vmul.f32 %v4835_v30, %v1811_v24  ;;  %v3374_v0 = vmul.f32 %v7709_v60, %v7666_v55  ;;  %v4068_v17 = vadd.f32 %v7487_v31, %v4003_v9  ;;  %v2239_v9 = vpack.c.bf16 %v2204_v59, %v7472_v20 }
 0x382   : > { %v3364_v8 = vmul.f32 %v7720_v61, %v7668_v7  ;;  %4840 = vrsqrt.f32 %v7717_v52  ;;  %v2925_v26 = vmul.f32 %v7715_v35, %v7715_v35  ;;  %vm3370_vm12 = vweird.f32 %v7720_v61 }
 0x383   : > { %v1816_v34 = vsel %vm1815_vm7, %v4835_v30, %v1812_v62  ;;  %v3375_v41 = vmul.f32 %v7709_v60, %v3374_v0  ;;  %v4129_v30 = vpack.c.bf16 %v4068_v17, %v4067_v21  ;;  %v9714_v0 = vld [vmem:[#allocation24_spill] sm:$0xff]  ;;  %vm3371_vm14 = vmor %vm3369_vm13, %vm3370_vm12  ;;  %v4004_v12 = vmul.f32 %v7458_v6, %v3939_v22  ;;  %v9715_v21 = vld [vmem:[#allocation26_spill] sm:$0xff] }
 0x384   : > { %v2060_v58 = vmul.f32 %v1816_v34, %v6886_v40  ;;  %v3365_v47 = vmul.f32 %v7720_v61, %v3364_v8  ;;  %v3021_v50 = vsel %vm665_vm1, %v2925_v26, 0.0  ;;  %v2075_v46 = vmul.f32 %v1966_v43, %v9714_v0 }
 0x385   : > { %v1242_v25 = vpop.xlane.xlu1 %1241  ;;  %v3002_v48 = vpop.xlane.xlu2 %3001  ;;  %4657 = vmatmul.msk.bf16.gmra.mxu2 %vm665_vm1, %v4129_v30  ;;  %2656 = vadd.xlane.f32.xlu0 %v7469_v1  ;;  %v3376_v1 = vmul.f32 0.5, %v3375_v41  ;;  %v2189_v8 = vadd.f32 %v5725_v28, %v7699_v23  ;;  %v2555_v42 = vmax.f32 %v7572_v38, 0.0  ;;  %v7798_v34 = vmul.f32 %v7569_v57, %v1981_v15 }
 0x386   : > { %v3366_v40 = vmul.f32 0.5, %v3365_v47  ;;  %v3008_v18 = vpop.xlane.xlu0 %3007  ;;  %v1310_v27 = vmul.f32 %v1242_v25, %v5233_v63  ;;  %v3174_v54 = vmul.f32 %v3002_v48, %v5233_v63  ;;  %3022 = vadd.xlane.f32.xlu1 %v3021_v50  ;;  %v2125_v37 = vmul.f32 %v5711_v39, %v2060_v58 }
 0x387   : > { %v3176_v2 = vmul.f32 %v3008_v18, %v5233_v63  ;;  %v3377_v47 = vsub.f32 1.5, %v3376_v1  ;;  %vm3380_vm15 = vweird.f32 %v7709_v60  ;;  %v2140_v50 = vmul.f32 %v5711_v39, %v2075_v46 }
 0x388   : > { %v7768_v45 = vpop.eup %4840  ;;  %v3367_v36 = vsub.f32 1.5, %v3366_v40  ;;  %v7770_v10 = vadd.f32 1e-05, %v1310_v27  ;;  %v7772_v24 = vadd.f32 1e-05, %v3174_v54  ;;  %v2190_v7 = vadd.f32 %v5725_v28, %v2125_v37  ;;  %v9716_v40 = vld [vmem:[#allocation8_spill] sm:$0xff] }
 0x389   : > { %v1968_v4 = vmul.f32 %v7768_v45, %v7717_v52  ;;  %v7778_v53 = vadd.f32 1e-05, %v3176_v2  ;;  %vm1974_vm10 = vweird.f32 %v7768_v45  ;;  %v9717_v18 = vmax.f32 %v9716_v40, 0.0 }
 0x38a   : > { %v3368_v62 = vmul.f32 %v7720_v61, %v3367_v36  ;;  %4842 = vrsqrt.f32 %v7770_v10  ;;  %v4069_v54 = vadd.f32 %v7487_v31, %v4004_v12  ;;  %vm1973_vm0 = vweird.f32 %v7717_v52 }
 0x38b   : > { %v1969_v5 = vmul.f32 %v7768_v45, %v1968_v4  ;;  %4844 = vrsqrt.f32 %v7778_v53  ;;  %v3378_v37 = vmul.f32 %v7709_v60, %v3377_v47  ;;  %vm1975_vm2 = vmor %vm1973_vm0, %vm1974_vm10  ;;  %vm1984_vm3 = vweird.f32 %v7569_v57 }
 0x38c   : > { %v3372_v20 = vsel %vm3371_vm14, %v7720_v61, %v3368_v62  ;;  %4846 = vrsqrt.f32 %v7772_v24  ;;  %4643 = vmatmul.msk.bf16.gmra.mxu3 %vm665_vm1, %v2239_v9  ;;  %v2232_v61 = vpack.c.bf16 %v2190_v7, %v2189_v8  ;;  %vm3379_vm4 = vweird.f32 %v7666_v55 }
 0x38d   : > { %v3940_v17 = vmul.f32 %v3372_v20, %v9715_v21  ;;  %v1970_v29 = vmul.f32 0.5, %v1969_v5  ;;  %v2648_v58 = vpop.xlane.xlu1 %2647  ;;  %v2642_v23 = vpop.xlane.xlu2 %2641  ;;  %2671 = vadd.xlane.f32.xlu0 %v7520_v44  ;;  %v9720_v5 = vld [vmem:[#allocation17_spill] sm:$0xff]  ;;  %v2205_v20 = vadd.f32 %v5725_v28, %v2140_v50  ;;  %vm7851_vm5 = vmor %vm3379_vm4, %vm3380_vm15  ;;  %vm1993_vm8 = vweird.f32 %v7770_v10 }
 0x38e   : > { %v1194_v26 = vpop.xlane.xlu0 %1193  ;;  %v2800_v41 = vmul.f32 %v2648_v58, %v5233_v63  ;;  %v2798_v30 = vmul.f32 %v2642_v23, %v5233_v63  ;;  %4636 = vmatmul.msk.bf16.gmra.mxu1 %vm665_vm1, %v2232_v61  ;;  %2662 = vadd.xlane.f32.xlu1 %v7477_v14  ;;  %v9718_v14 = vld [vmem:[#allocation20_spill] sm:$0xff]  ;;  %v3382_v58 = vsel %vm7851_vm5, %v7709_v60, %v3378_v37  ;;  %vm3389_vm9 = vweird.f32 %v7772_v24 }
 0x38f   : > { %v1971_v25 = vsub.f32 1.5, %v1970_v29  ;;  %v1294_v48 = vmul.f32 %v1194_v26, %v5233_v63  ;;  %v4005_v59 = vmul.f32 %v7458_v6, %v3940_v17  ;;  %v9719_v15 = vmax.f32 %v9718_v14, 0.0 }
 0x390   : > { %v7807_v3 = vpop.eup %4842  ;;  %v7813_v27 = vsub.f32 %v9717_v18, %v2800_v41  ;;  %vm1983_vm13 = vweird.f32 %v7499_v32  ;;  %vm3409_vm15 = vweird.f32 %v7778_v53 }
 0x391   : > { %v7818_v43 = vpop.eup %4844  ;;  %v1972_v44 = vmul.f32 %v7768_v45, %v1971_v25  ;;  %v1988_v22 = vmul.f32 %v7807_v3, %v7770_v10  ;;  %v7824_v2 = vadd.f32 1e-05, %v1294_v48  ;;  %v7833_v4 = vsub.f32 %v9719_v15, %v2798_v30  ;;  %vm7905_vm14 = vmor %vm1983_vm13, %vm1984_vm3 }
 0x392   : > { %v7826_v36 = vpop.eup %4846  ;;  %v4070_v9 = vadd.f32 %v7487_v31, %v4005_v59  ;;  %v2928_v52 = vmul.f32 %v7813_v27, %v7813_v27  ;;  %v3404_v62 = vmul.f32 %v7818_v43, %v7778_v53  ;;  %vm1994_vm6 = vweird.f32 %v7807_v3 }
 0x393   : > { %v1976_v1 = vsel %vm1975_vm2, %v7768_v45, %v1972_v44  ;;  %v1989_v0 = vmul.f32 %v7807_v3, %v1988_v22  ;;  %v3384_v46 = vmul.f32 %v7826_v36, %v7772_v24  ;;  %4848 = vrsqrt.f32 %v7824_v2  ;;  %v9723_v22 = vld [vmem:[#allocation4_spill] sm:$0xff]  ;;  %vm7885_vm11 = vmor %vm1993_vm8, %vm1994_vm6 }
 0x394   : > { %v2076_v8 = vmul.f32 %v1976_v1, %v9720_v5  ;;  %v4130_v21 = vpack.c.bf16 %v4070_v9, %v4069_v54  ;;  %v3030_v55 = vsel %vm665_vm1, %v2928_v52, 0.0  ;;  %v2926_v61 = vmul.f32 %v7833_v4, %v7833_v4 }
 0x395   : > { %v1990_v7 = vmul.f32 0.5, %v1989_v0  ;;  %v3385_v12 = vmul.f32 %v7826_v36, %v3384_v46  ;;  %v3011_v17 = vpop.xlane.xlu1 %3010  ;;  %v3005_v29 = vpop.xlane.xlu2 %3004  ;;  %v3405_v26 = vmul.f32 %v7818_v43, %v3404_v62  ;;  %3031 = vadd.xlane.f32.xlu0 %v3030_v55  ;;  %vm3390_vm7 = vweird.f32 %v7826_v36 }
 0x396   : > { %v3177_v23 = vmul.f32 %v3011_v17, %v5233_v63  ;;  %v3175_v47 = vmul.f32 %v3005_v29, %v5233_v63  ;;  %4658 = vmatmul.msk.bf16.gmra.mxu2 %vm665_vm1, %v4130_v21  ;;  %v2141_v25 = vmul.f32 %v5711_v39, %v2076_v8  ;;  %v2645_v48 = vpop.xlane.xlu0 %2644  ;;  %v3024_v40 = vsel %vm665_vm1, %v2926_v61, 0.0  ;;  %2677 = vadd.xlane.f32.xlu1 %v7580_v33  ;;  %vm3391_vm12 = vmor %vm3389_vm9, %vm3390_vm7  ;;  %v9731_v17 = vld [vmem:[#allocation28_spill] sm:$0xff] }
 0x397   : > { %v1991_v41 = vsub.f32 1.5, %v1990_v7  ;;  %v3386_v30 = vmul.f32 0.5, %v3385_v12  ;;  %3025 = vadd.xlane.f32.xlu2 %v3024_v40  ;;  %v3941_v37 = vmul.f32 %v3382_v58, %v9723_v22  ;;  %v3406_v14 = vmul.f32 0.5, %v3405_v26 }
 0x398   : > { %v7868_v60 = vadd.f32 1e-05, %v3177_v23  ;;  %v7870_v59 = vadd.f32 1e-05, %v3175_v47  ;;  %v2206_v50 = vadd.f32 %v5725_v28, %v2141_v25  ;;  %v2799_v52 = vmul.f32 %v2645_v48, %v5233_v63  ;;  %v9733_v47 = vld [vmem:[#allocation6_spill] sm:$0xff]  ;;  %v9734_v25 = vld [vmem:[#allocation9_spill] sm:$0xff] }
 0x399   : > { %v1992_v18 = vmul.f32 %v7807_v3, %v1991_v41  ;;  %v3387_v54 = vsub.f32 1.5, %v3386_v30  ;;  %v7877_v44 = vpop.eup %4848  ;;  %v9726_v24 = vmax.f32 %v7441_v56, 0.0  ;;  %v9730_v7 = vmax.f32 %v7536_v19, 0.0 }
 0x39a   : > { %4850 = vrsqrt.f32 %v7868_v60  ;;  %v1828_v9 = vmul.f32 %v7877_v44, %v7824_v2  ;;  %v2240_v10 = vpack.c.bf16 %v2206_v50, %v2205_v20  ;;  %v9729_v20 = vld [vmem:[#allocation19_spill] sm:$0xff]  ;;  %v1986_v12 = vsel %vm7905_vm14, %v7569_v57, %v7798_v34 }
 0x39b   : > { %v3388_v15 = vmul.f32 %v7826_v36, %v3387_v54  ;;  %4852 = vrsqrt.f32 %v7870_v59  ;;  %v2664_v1 = vsel %vm665_vm1, %v9726_v24, 0.0  ;;  %v1996_v62 = vsel %vm7885_vm11, %v7807_v3, %v1992_v18 }
 0x39c   : > { %v1829_v46 = vmul.f32 %v7877_v44, %v1828_v9  ;;  %4644 = vmatmul.msk.bf16.gmra.mxu3 %vm665_vm1, %v2240_v10  ;;  %v2673_v3 = vsel %vm665_vm1, %v9730_v7, 0.0  ;;  %v3407_v21 = vsub.f32 1.5, %v3406_v14  ;;  %v9732_v29 = vmax.f32 %v9731_v17, 0.0 }
 0x39d   : > { %v3392_v0 = vsel %vm3391_vm12, %v7826_v36, %v3388_v15  ;;  %v1191_v5 = vpop.xlane.xlu2 %1190  ;;  %v4006_v36 = vmul.f32 %v7458_v6, %v3941_v37  ;;  %2674 = vadd.xlane.f32.xlu0 %v2673_v3  ;;  %v2679_v58 = vsel %vm665_vm1, %v2555_v42, 0.0  ;;  %v2078_v61 = vmul.f32 %v1996_v62, %v9733_v47 }
 0x39e   : > { %v3942_v45 = vmul.f32 %v3392_v0, %v9729_v20  ;;  %v1293_v32 = vmul.f32 %v1191_v5, %v5233_v63  ;;  %v7922_v55 = vsub.f32 %v9732_v29, %v2799_v52  ;;  %v1830_v26 = vmul.f32 0.5, %v1829_v46  ;;  %2680 = vadd.xlane.f32.xlu1 %v2679_v58  ;;  %v2442_v0 = vpop.f32.mrf.mxu1 }
 0x39f   : > { %2665 = vadd.xlane.f32.xlu2 %v2664_v1  ;;  %v2077_v48 = vmul.f32 %v1986_v12, %v9734_v25  ;;  %v4071_v40 = vadd.f32 %v7487_v31, %v4006_v36  ;;  %v7941_v54 = vadd.f32 %v7240_v13, %v6141_v16  ;;  %v3408_v50 = vmul.f32 %v7818_v43, %v3407_v21 }
 0x3a0   : > { %v7927_v23 = vpop.eup %4850  ;;  %v7930_v41 = vadd.f32 1e-05, %v1293_v32  ;;  %v4007_v57 = vmul.f32 %v7458_v6, %v3942_v45  ;;  %vm3410_vm10 = vweird.f32 %v7818_v43  ;;  %v1831_v37 = vsub.f32 1.5, %v1830_v26 }
 0x3a1   : > { %v3414_v34 = vmul.f32 %v7927_v23, %v7868_v60  ;;  %v4853_v30 = vpop.eup %4852  ;;  %v2927_v33 = vmul.f32 %v7922_v55, %v7922_v55  ;;  %v2143_v15 = vmul.f32 %v5711_v39, %v2078_v61  ;;  %vm7951_vm0 = vmor %vm3409_vm15, %vm3410_vm10  ;;  %v2142_v1 = vmul.f32 %v5711_v39, %v2077_v48  ;;  %v9740_v48 = vld [vmem:[#allocation13_spill] sm:$0xff] }
 0x3a2   : > { %4854 = vrsqrt.f32 %v7930_v41  ;;  %v4072_v18 = vadd.f32 %v7487_v31, %v4007_v57  ;;  %v3394_v22 = vmul.f32 %v4853_v30, %v7870_v59  ;;  %v2551_v62 = vmax.f32 %v7941_v54, 0.0 }
 0x3a3   : > { %v3415_v9 = vmul.f32 %v7927_v23, %v3414_v34  ;;  %v3412_v46 = vsel %vm7951_vm0, %v7818_v43, %v3408_v50  ;;  %vm1834_vm2 = vweird.f32 %v7877_v44  ;;  %v1832_v8 = vmul.f32 %v7877_v44, %v1831_v37  ;;  %v9737_v43 = vld [vmem:[#allocation21_spill] sm:$0xff] }
 0x3a4   : > { %v4131_v14 = vpack.c.bf16 %v4072_v18, %v4071_v40  ;;  %v3395_v52 = vmul.f32 %v4853_v30, %v3394_v22  ;;  %v3027_v45 = vsel %vm665_vm1, %v2927_v33, 0.0  ;;  %v2208_v32 = vadd.f32 %v5725_v28, %v2143_v15 }
 0x3a5   : > { %v3014_v13 = vpop.xlane.xlu2 %3013  ;;  %v3416_v7 = vmul.f32 0.5, %v3415_v9  ;;  %vm3400_vm3 = vweird.f32 %v4853_v30  ;;  %v3944_v12 = vmul.f32 %v3412_v46, %v9737_v43  ;;  %vm1833_vm4 = vweird.f32 %v7824_v2 }
 0x3a6   : > { %v3178_v24 = vmul.f32 %v3014_v13, %v5233_v63  ;;  %v3396_v53 = vmul.f32 0.5, %v3395_v52  ;;  %4659 = vmatmul.msk.bf16.gmra.mxu2 %vm665_vm1, %v4131_v14  ;;  %v2207_v21 = vadd.f32 %v5725_v28, %v2142_v1  ;;  %v7974_v17 = vadd.f32 %v2442_v0, %v6141_v16  ;;  %vm7978_vm5 = vmor %vm1833_vm4, %vm1834_vm2  ;;  %v9741_v14 = vld [vmem:[#allocation12_spill] sm:$0xff]  ;;  %v2445_v52 = vpop.f32.mrf.mxu1 }
 0x3a7   : > { %3028 = vadd.xlane.f32.xlu2 %v3027_v45  ;;  %vm3399_vm6 = vweird.f32 %v7870_v59  ;;  %v1836_v2 = vsel %vm7978_vm5, %v7877_v44, %v1832_v8  ;;  %v3417_v26 = vsub.f32 1.5, %v3416_v7  ;;  %v4009_v59 = vmul.f32 %v7458_v6, %v3944_v12  ;;  %v9744_v7 = vld [vmem:[#allocation18_spill] sm:$0xff] }
 0x3a8   : > { %v4855_v5 = vpop.eup %4854  ;;  %v7964_v20 = vadd.f32 1e-05, %v3178_v24  ;;  %v3397_v3 = vsub.f32 1.5, %v3396_v53  ;;  %vm3401_vm7 = vmor %vm3399_vm6, %vm3400_vm3  ;;  %v2241_v61 = vpack.c.bf16 %v2208_v32, %v2207_v21  ;;  %v2556_v22 = vmax.f32 %v7974_v17, 0.0 }
 0x3a9   : > { %v1818_v36 = vmul.f32 %v4855_v5, %v7930_v41  ;;  %vm1824_vm8 = vweird.f32 %v4855_v5  ;;  %v2667_v44 = vsel %vm665_vm1, %v2551_v62, 0.0  ;;  %v2062_v33 = vmul.f32 %v1836_v2, %v9741_v14 }
 0x3aa   : > { %4856 = vrsqrt.f32 %v7964_v20  ;;  %v3398_v58 = vmul.f32 %v4853_v30, %v3397_v3  ;;  %vm3420_vm9 = vweird.f32 %v7927_v23  ;;  %v3418_v13 = vmul.f32 %v7927_v23, %v3417_v26 }
 0x3ab   : > { %v1819_v47 = vmul.f32 %v4855_v5, %v1818_v36  ;;  %vm1823_vm11 = vweird.f32 %v7930_v41  ;;  %v4074_v53 = vadd.f32 %v7487_v31, %v4009_v59  ;;  %vm3419_vm13 = vweird.f32 %v7868_v60 }
 0x3ac   : > { %v3402_v57 = vsel %vm3401_vm7, %v4853_v30, %v3398_v58  ;;  %4645 = vmatmul.msk.bf16.gmra.mxu3 %vm665_vm1, %v2241_v61  ;;  %vm1825_vm12 = vmor %vm1823_vm11, %vm1824_vm8  ;;  %v2127_v12 = vmul.f32 %v5711_v39, %v2062_v33  ;;  %v2682_v61 = vsel %vm665_vm1, %v2556_v22, 0.0  ;;  %v8029_v26 = vadd.f32 %v2445_v52, %v6141_v16  ;;  %v9746_v33 = vld [vmem:[#allocation23_spill] sm:$0xff] }
 0x3ad   : > { %v1820_v34 = vmul.f32 0.5, %v1819_v47  ;;  %v1245_v25 = vpop.xlane.xlu2 %1244  ;;  %v3943_v40 = vmul.f32 %v3402_v57, %v9740_v48  ;;  %v1197_v18 = vpop.xlane.xlu1 %1196  ;;  %vm8010_vm14 = vmor %vm3419_vm13, %vm3420_vm9  ;;  %vm3429_vm15 = vweird.f32 %v7964_v20  ;;  %v9765_v54 = vmax.f32 %v7536_v19, 0.0 }
 0x3ae   : > { %v1311_v50 = vmul.f32 %v1245_v25, %v5233_v63  ;;  %v1295_v32 = vmul.f32 %v1197_v18, %v5233_v63  ;;  %v3422_v60 = vsel %vm8010_vm14, %v7927_v23, %v3418_v13  ;;  %v9745_v23 = vld [vmem:[#allocation16_spill] sm:$0xff]  ;;  %v2192_v25 = vadd.f32 %v5725_v28, %v2127_v12 }
 0x3af   : > { %v1821_v37 = vsub.f32 1.5, %v1820_v34  ;;  %v4008_v9 = vmul.f32 %v7458_v6, %v3943_v40  ;;  %2668 = vadd.xlane.f32.xlu2 %v2667_v44  ;;  %v1248_v1 = vpop.xlane.xlu0 %1247  ;;  %v3945_v57 = vmul.f32 %v3422_v60, %v9745_v23  ;;  %v2557_v14 = vmax.f32 %v8029_v26, 0.0 }
 0x3b0   : > { %v4857_v30 = vpop.eup %4856  ;;  %v7996_v15 = vadd.f32 1e-05, %v1311_v50  ;;  %v1312_v0 = vmul.f32 %v1248_v1, %v5233_v63  ;;  %v8022_v47 = vadd.f32 1e-05, %v1295_v32  ;;  %v8036_v50 = vpop.f32.mrf.mxu1 }
 0x3b1   : > { %v1822_v10 = vmul.f32 %v4855_v5, %v1821_v37  ;;  %v3424_v24 = vmul.f32 %v4857_v30, %v7964_v20  ;;  %v4073_v46 = vadd.f32 %v7487_v31, %v4008_v9  ;;  %vm3430_vm10 = vweird.f32 %v4857_v30 }
 0x3b2   : > { %4858 = vrsqrt.f32 %v7996_v15  ;;  %v1376_v36 = vadd.f32 1e-05, %v1312_v0  ;;  %vm3431_vm0 = vmor %vm3429_vm15, %vm3430_vm10  ;;  %v4010_v20 = vmul.f32 %v7458_v6, %v3945_v57  ;;  %vm2003_vm3 = vweird.f32 %v7996_v15 }
 0x3b3   : > { %v1826_v8 = vsel %vm1825_vm12, %v4855_v5, %v1822_v10  ;;  %v3425_v45 = vmul.f32 %v4857_v30, %v3424_v24  ;;  %v4132_v43 = vpack.c.bf16 %v4074_v53, %v4073_v46  ;;  %v2685_v46 = vsel %vm665_vm1, %v2557_v14, 0.0 }
 0x3b4   : > { %v2061_v3 = vmul.f32 %v1826_v8, %v9744_v7  ;;  %4860 = vrsqrt.f32 %v1376_v36  ;;  %v4075_v53 = vadd.f32 %v7487_v31, %v4010_v20  ;;  %v9747_v7 = vmax.f32 %v7263_v11, 0.0 }
 0x3b5   : > { %v3426_v5 = vmul.f32 0.5, %v3425_v45  ;;  %v8019_v21 = vpop.xlane.xlu1 %3019  ;;  %4862 = vrsqrt.f32 %v8022_v47  ;;  %vm2013_vm6 = vweird.f32 %v1376_v36  ;;  %vm1843_vm9 = vweird.f32 %v8022_v47 }
 0x3b6   : > { %v2126_v29 = vmul.f32 %v5711_v39, %v2061_v3  ;;  %4660 = vmatmul.msk.bf16.gmra.mxu2 %vm665_vm1, %v4132_v43  ;;  %vm4441_vm10 = vcmask 31744  }
 0x3b7   : > { %v3427_v58 = vsub.f32 1.5, %v3426_v5  ;;  %2683 = vadd.xlane.f32.xlu2 %v2682_v61 }
 0x3b8   : > { %v4859_v2 = vpop.eup %4858  ;;  %v2191_v34 = vadd.f32 %v5725_v28, %v2126_v29 }
 0x3b9   : > { %v3428_v48 = vmul.f32 %v4857_v30, %v3427_v58  ;;  %v1998_v40 = vmul.f32 %v4859_v2, %v7996_v15  ;;  %vm2004_vm2 = vweird.f32 %v4859_v2  ;;  %v9748_v58 = vld [vmem:[#allocation22_spill] sm:$0xff]  ;;  %v2450_v15 = vpop.f32.mrf.mxu1 }
 0x3ba   : > { %v2233_v18 = vpack.c.bf16 %v2192_v25, %v2191_v34  ;;  %v4861_v44 = vpop.eup %4860  ;;  %vm2005_vm4 = vmor %vm2003_vm3, %vm2004_vm2 }
 0x3bb   : > { %v3432_v59 = vsel %vm3431_vm0, %v4857_v30, %v3428_v48  ;;  %v1999_v37 = vmul.f32 %v4859_v2, %v1998_v40  ;;  %v2008_v13 = vmul.f32 %v4861_v44, %v1376_v36  ;;  %v8050_v45 = vpop.eup %4862  ;;  %vm2014_vm5 = vweird.f32 %v4861_v44 }
 0x3bc   : > { %v3946_v9 = vmul.f32 %v3432_v59, %v9746_v33  ;;  %4637 = vmatmul.msk.bf16.gmra.mxu1 %vm665_vm1, %v2233_v18  ;;  %v1838_v29 = vmul.f32 %v8050_v45, %v8022_v47  ;;  %vm2015_vm7 = vmor %vm2013_vm6, %vm2014_vm5  ;;  %vm1844_vm8 = vweird.f32 %v8050_v45  ;;  %v9750_v47 = vld [vmem:[#allocation25_spill] sm:$0xff] }
 0x3bd   : > { %v2000_v52 = vmul.f32 0.5, %v1999_v37  ;;  %v2660_v10 = vpop.xlane.xlu1 %2659  ;;  %v2009_v30 = vmul.f32 %v4861_v44, %v2008_v13  ;;  %vm1845_vm11 = vmor %vm1843_vm9, %vm1844_vm8 }
 0x3be   : > { %v4011_v24 = vmul.f32 %v7458_v6, %v3946_v9  ;;  %v2804_v0 = vmul.f32 %v2660_v10, %v5233_v63  ;;  %v1839_v34 = vmul.f32 %v8050_v45, %v1838_v29 }
 0x3bf   : > { %v2001_v1 = vsub.f32 1.5, %v2000_v52  ;;  %v2010_v41 = vmul.f32 0.5, %v2009_v30  ;;  %2686 = vadd.xlane.f32.xlu2 %v2685_v46  ;;  %v9749_v30 = vmax.f32 %v7321_v49, 0.0 }
 0x3c0   : > { %v4076_v8 = vadd.f32 %v7487_v31, %v4011_v24  ;;  %v8055_v3 = vsub.f32 %v9747_v7, %v2804_v0  ;;  %v8093_v7 = vadd.f32 %v8036_v50, %v6141_v16 }
 0x3c1   : > { %v2002_v32 = vmul.f32 %v4859_v2, %v2001_v1  ;;  %v2011_v12 = vsub.f32 1.5, %v2010_v41  ;;  %v2452_v52 = vpop.f32.mrf.mxu1 }
 0x3c2   : > { %v4133_v60 = vpack.c.bf16 %v4076_v8, %v4075_v53  ;;  %v2932_v5 = vmul.f32 %v8055_v3, %v8055_v3  ;;  %v3180_v8 = vmul.f32 %v8019_v21, %v5233_v63  ;;  %v2558_v29 = vmax.f32 %v8093_v7, 0.0 }
 0x3c3   : > { %v2006_v43 = vsel %vm2005_vm4, %v4859_v2, %v2002_v32  ;;  %v2012_v23 = vmul.f32 %v4861_v44, %v2011_v12  ;;  %v8065_v2 = vadd.f32 %v2450_v15, %v6141_v16  ;;  %v8102_v15 = vadd.f32 %v2452_v52, %v6141_v16 }
 0x3c4   : > { %v2079_v61 = vmul.f32 %v2006_v43, %v9748_v58  ;;  %v3042_v11 = vsel %vm665_vm1, %v2932_v5, 0.0 }
 0x3c5   : > { %v2016_v57 = vsel %vm2015_vm7, %v4861_v44, %v2012_v23  ;;  %v2559_v37 = vmax.f32 %v8065_v2, 0.0  ;;  %v1840_v44 = vmul.f32 0.5, %v1839_v34 }
 0x3c6   : > { %4661 = vmatmul.msk.bf16.gmra.mxu2 %vm665_vm1, %v4133_v60  ;;  %v2080_v25 = vmul.f32 %v2016_v57, %v7182_v51  ;;  %v1200_v48 = vpop.xlane.xlu2 %1199  ;;  %v2144_v40 = vmul.f32 %v5711_v39, %v2079_v61  ;;  %v3244_v60 = vadd.f32 1e-05, %v3180_v8 }
 0x3c7   : > { %3043 = vadd.xlane.f32.xlu2 %v3042_v11  ;;  %v1296_v18 = vmul.f32 %v1200_v48, %v5233_v63  ;;  %v1841_v51 = vsub.f32 1.5, %v1840_v44  ;;  %v2691_v13 = vsel %vm665_vm1, %v2559_v37, 0.0  ;;  %v2688_v11 = vsel %vm665_vm1, %v2558_v29, 0.0 }
 0x3c8   : > { %v2145_v36 = vmul.f32 %v5711_v39, %v2080_v25  ;;  %v2209_v33 = vadd.f32 %v5725_v28, %v2144_v40  ;;  %v2560_v48 = vmax.f32 %v8102_v15, 0.0  ;;  %vm3449_vm0 = vweird.f32 %v3244_v60 }
 0x3c9   : > { %v1360_v59 = vadd.f32 1e-05, %v1296_v18  ;;  %v1842_v46 = vmul.f32 %v8050_v45, %v1841_v51  ;;  %v8097_v5 = vpop.f32.mrf.mxu1 }
 0x3ca   : > { %v2210_v9 = vadd.f32 %v5725_v28, %v2145_v36 }
 0x3cb   : > { %4864 = vrsqrt.f32 %v1360_v59  ;;  %v1846_v43 = vsel %vm1845_vm11, %v8050_v45, %v1842_v46  ;;  %vm1853_vm13 = vweird.f32 %v1360_v59  ;;  %v9751_v45 = vld [vmem:[#allocation3_spill] sm:$0xff] }
 0x3cc   : > { %v2242_v20 = vpack.c.bf16 %v2210_v9, %v2209_v33  ;;  %v2063_v58 = vmul.f32 %v1846_v43, %v9750_v47  ;;  %4866 = vrsqrt.f32 %v3244_v60  ;;  %v4968_v9 = vld [vmem:[%s9385_s4] sm:$0xff] }
 0x3ce   : > { %4646 = vmatmul.msk.bf16.gmra.mxu3 %vm665_vm1, %v2242_v20  ;;  %v2651_v10 = vpop.xlane.xlu2 %2650  ;;  %v2128_v57 = vmul.f32 %v5711_v39, %v2063_v58  ;;  %v2694_v20 = vsel %vm665_vm1, %v2560_v48, 0.0 }
 0x3cf   : > { %2692 = vadd.xlane.f32.xlu2 %v2691_v13  ;;  %v2801_v24 = vmul.f32 %v2651_v10, %v5233_v63 }
 0x3d0   : > { %v2193_v40 = vadd.f32 %v5725_v28, %v2128_v57 }
 0x3d1   : > { %v4865_v1 = vpop.eup %4864  ;;  %v8082_v0 = vsub.f32 %v9749_v30, %v2801_v24  ;;  %v2457_v36 = vpop.f32.mrf.mxu1 }
 0x3d2   : > { %v1848_v53 = vmul.f32 %v4865_v1, %v1360_v59  ;;  %vm1854_vm12 = vweird.f32 %v4865_v1  ;;  %v4867_v25 = vpop.eup %4866  ;;  %v8114_v33 = vadd.f32 %v2457_v36, %v6141_v16 }
 0x3d3   : > { %v2929_v32 = vmul.f32 %v8082_v0, %v8082_v0  ;;  %vm1855_vm14 = vmor %vm1853_vm13, %vm1854_vm12  ;;  %v3444_v44 = vmul.f32 %v4867_v25, %v3244_v60  ;;  %vm3450_vm15 = vweird.f32 %v4867_v25  ;;  %v9754_v60 = vld [vmem:[#allocation2_spill] sm:$0xff] }
 0x3d4   : > { %v1849_v41 = vmul.f32 %v4865_v1, %v1848_v53  ;;  %v2562_v13 = vmax.f32 %v8114_v33, 0.0  ;;  %vm3451_vm2 = vmor %vm3449_vm0, %vm3450_vm15 }
 0x3d5   : > { %v3033_v49 = vsel %vm665_vm1, %v2929_v32, 0.0 }
 0x3d6   : > { %v1850_v12 = vmul.f32 0.5, %v1849_v41  ;;  %3034 = vadd.xlane.f32.xlu0 %v3033_v49  ;;  %v2700_v46 = vsel %vm665_vm1, %v2562_v13, 0.0 }
 0x3d8   : > { %v1851_v21 = vsub.f32 1.5, %v1850_v12  ;;  %v9752_v12 = vld [vmem:[#allocation7_spill] sm:$0xff] }
 0x3da   : > { %v1852_v61 = vmul.f32 %v4865_v1, %v1851_v21  ;;  %v9753_v21 = vmax.f32 %v9752_v12, 0.0 }
 0x3dc   : > { %v1856_v50 = vsel %vm1855_vm14, %v4865_v1, %v1852_v61 }
 0x3dd   : > { %v2064_v23 = vmul.f32 %v1856_v50, %v9751_v45 }
 0x3de   : > { %2689 = vadd.xlane.f32.xlu0 %v2688_v11 }
 0x3df   : > { %v2129_v34 = vmul.f32 %v5711_v39, %v2064_v23  ;;  %v8120_v39 = vperm.slane %v4968_v9, 6 }
 0x3e1   : > { %v2194_v18 = vadd.f32 %v5725_v28, %v2129_v34  ;;  %v3445_v28 = vmul.f32 %v4867_v25, %v3444_v44 }
 0x3e3   : > { %v2234_v59 = vpack.c.bf16 %v2194_v18, %v2193_v40  ;;  %v3446_v30 = vmul.f32 0.5, %v3445_v28  ;;  %v9755_v28 = vld [vmem:[#allocation11_spill] sm:$0xff] }
 0x3e5   : > { %4638 = vmatmul.msk.bf16.gmra.mxu1 %vm665_vm1, %v2234_v59  ;;  %v3447_v53 = vsub.f32 1.5, %v3446_v30 }
 0x3e6   : > { %2695 = vadd.xlane.f32.xlu0 %v2694_v20 }
 0x3e7   : > { %v4281_v52 = vpop.f32.mrf.mxu2  ;;  %v3448_v58 = vmul.f32 %v4867_v25, %v3447_v53 }
 0x3e8   : > { %v3017_v51 = vpop.xlane.xlu0 %3016  ;;  %v4282_v10 = vadd.f32 %v4281_v52, %v8120_v39  ;;  %v9756_v52 = vmax.f32 %v9755_v28, 0.0 }
 0x3e9   : > { %v3179_v24 = vmul.f32 %v3017_v51, %v5233_v63  ;;  %v3452_v11 = vsel %vm3451_vm2, %v4867_v25, %v3448_v58 }
 0x3ea   : > { %4442 = vst.msk [vmem:[%s8130_s21] sm:$0xff] %vm4441_vm10, %v4282_v10  ;;  %v3948_v20 = vmul.f32 %v3452_v11, %v9754_v60 }
 0x3eb   : > { %v3243_v1 = vadd.f32 1e-05, %v3179_v24 }
 0x3ed   : > { %4868 = vrsqrt.f32 %v3243_v1  ;;  %vm3439_vm4 = vweird.f32 %v3243_v1 }
 0x3ee   : > { %2701 = vadd.xlane.f32.xlu0 %v2700_v46  ;;  %v9757_v46 = vld [vmem:[#allocation15_spill] sm:$0xff] }
 0x3ef   : > { %v4283_v8 = vpop.f32.mrf.mxu2 }
 0x3f0   : > { %v2654_v32 = vpop.xlane.xlu0 %2653  ;;  %v4284_v41 = vadd.f32 %v4283_v8, %v8120_v39 }
 0x3f1   : > { %v2802_v49 = vmul.f32 %v2654_v32, %v5233_v63  ;;  %v4013_v32 = vmul.f32 %v7458_v6, %v3948_v20 }
 0x3f2   : > { %4443 = vst.msk [vmem:[%s8130_s21 + $0x8] sm:$0xff] %vm4441_vm10, %v4284_v41 }
 0x3f3   : > { %v4869_v43 = vpop.eup %4868  ;;  %v8146_v47 = vsub.f32 %v9753_v21, %v2802_v49 }
 0x3f4   : > { %v3434_v61 = vmul.f32 %v4869_v43, %v3243_v1  ;;  %vm3440_vm3 = vweird.f32 %v4869_v43 }
 0x3f5   : > { %v2930_v50 = vmul.f32 %v8146_v47, %v8146_v47  ;;  %vm3441_vm5 = vmor %vm3439_vm4, %vm3440_vm3 }
 0x3f6   : > { %v3435_v45 = vmul.f32 %v4869_v43, %v3434_v61  ;;  %v8173_v61 = vpop.f32.mrf.mxu1 }
 0x3f7   : > { %v3036_v23 = vsel %vm665_vm1, %v2930_v50, 0.0  ;;  %v4286_v34 = vpop.f32.mrf.mxu2  ;;  %v9758_v50 = vld [vmem:[#allocation10_spill] sm:$0xff] }
 0x3f8   : > { %v3436_v57 = vmul.f32 0.5, %v3435_v45  ;;  %3037 = vadd.xlane.f32.xlu1 %v3036_v23  ;;  %v2657_v40 = vpop.xlane.xlu0 %2656  ;;  %v4287_v18 = vadd.f32 %v4286_v34, %v8120_v39  ;;  %v9759_v45 = vmax.f32 %v9758_v50, 0.0 }
 0x3f9   : > { %v3023_v36 = vpop.xlane.xlu1 %3022  ;;  %v2803_v59 = vmul.f32 %v2657_v40, %v5233_v63  ;;  %v9760_v40 = vld [vmem:[#allocation5_spill] sm:$0xff] }
 0x3fa   : > { %v3437_v44 = vsub.f32 1.5, %v3436_v57  ;;  %v3181_v9 = vmul.f32 %v3023_v36, %v5233_v63  ;;  %4444 = vst.msk [vmem:[%s8130_s21 + $0x10] sm:$0xff] %vm4441_vm10, %v4287_v18  ;;  %v4078_v57 = vadd.f32 %v7487_v31, %v4013_v32  ;;  %v9761_v18 = vmax.f32 %v9760_v40, 0.0 }
 0x3fb   : > { %v8159_v25 = vsub.f32 %v9756_v52, %v2803_v59  ;;  %v8201_v52 = vadd.f32 %v8097_v5, %v6141_v16 }
 0x3fc   : > { %v3438_v51 = vmul.f32 %v4869_v43, %v3437_v44  ;;  %v8161_v10 = vadd.f32 1e-05, %v3181_v9  ;;  %v8191_v9 = vpop.f32.mrf.mxu3 }
 0x3fd   : > { %v2931_v24 = vmul.f32 %v8159_v25, %v8159_v25 }
 0x3fe   : > { %v3442_v30 = vsel %vm3441_vm5, %v4869_v43, %v3438_v51  ;;  %4870 = vrsqrt.f32 %v8161_v10  ;;  %v2462_v50 = vpop.f32.mrf.mxu1  ;;  %vm3459_vm7 = vweird.f32 %v8161_v10 }
 0x3ff   : > { %v3947_v53 = vmul.f32 %v3442_v30, %v9757_v46  ;;  %v3039_v8 = vsel %vm665_vm1, %v2931_v24, 0.0  ;;  %v4288_v41 = vpop.f32.mrf.mxu2  ;;  %v8222_v40 = vadd.f32 %v2462_v50, %v6141_v16 }
 0x400   : > { %3040 = vadd.xlane.f32.xlu1 %v3039_v8  ;;  %v2672_v49 = vpop.xlane.xlu0 %2671  ;;  %v4289_v1 = vadd.f32 %v4288_v41, %v8120_v39 }
 0x401   : > { %v2663_v12 = vpop.xlane.xlu1 %2662  ;;  %v2808_v21 = vmul.f32 %v2672_v49, %v5233_v63  ;;  %v4012_v58 = vmul.f32 %v7458_v6, %v3947_v53 }
 0x402   : > { %v2805_v43 = vmul.f32 %v2663_v12, %v5233_v63  ;;  %4445 = vst.msk [vmem:[%s8130_s21 + $0x18] sm:$0xff] %vm4441_vm10, %v4289_v1  ;;  %v2561_v12 = vmax.f32 %v8201_v52, 0.0 }
 0x403   : > { %v8179_v23 = vsub.f32 %v9759_v45, %v2808_v21  ;;  %v4077_v11 = vadd.f32 %v7487_v31, %v4012_v58  ;;  %v9762_v21 = vld [vmem:[#allocation27_spill] sm:$0xff] }
 0x404   : > { %v8183_v34 = vpop.eup %4870  ;;  %v8187_v36 = vsub.f32 %v9761_v18, %v2805_v43  ;;  %v9763_v58 = vmax.f32 %v9762_v21, 0.0  ;;  %v2487_v18 = vpop.f32.mrf.mxu3 }
 0x405   : > { %v4134_v59 = vpack.c.bf16 %v4078_v57, %v4077_v11  ;;  %v2936_v44 = vmul.f32 %v8179_v23, %v8179_v23  ;;  %v3454_v60 = vmul.f32 %v8183_v34, %v8161_v10  ;;  %vm3460_vm6 = vweird.f32 %v8183_v34 }
 0x406   : > { %v2933_v20 = vmul.f32 %v8187_v36, %v8187_v36  ;;  %vm3461_vm8 = vmor %vm3459_vm7, %vm3460_vm6 }
 0x407   : > { %4662 = vmatmul.msk.bf16.gmra.mxu2 %vm665_vm1, %v4134_v59  ;;  %v3054_v28 = vsel %vm665_vm1, %v2936_v44, 0.0  ;;  %v3455_v32 = vmul.f32 %v8183_v34, %v3454_v60  ;;  %v2697_v44 = vsel %vm665_vm1, %v2561_v12, 0.0 }
 0x408   : > { %v4291_v51 = vpop.f32.mrf.mxu2  ;;  %v3045_v24 = vsel %vm665_vm1, %v2933_v20, 0.0  ;;  %3055 = vadd.xlane.f32.xlu1 %v3054_v28  ;;  %v3032_v30 = vpop.xlane.xlu0 %3031 }
 0x409   : > { %v4292_v46 = vadd.f32 %v4291_v51, %v8120_v39  ;;  %v2678_v53 = vpop.xlane.xlu1 %2677  ;;  %3046 = vadd.xlane.f32.xlu2 %v3045_v24  ;;  %v3184_v8 = vmul.f32 %v3032_v30, %v5233_v63  ;;  %v3456_v11 = vmul.f32 0.5, %v3455_v32 }
 0x40a   : > { %v3026_v41 = vpop.xlane.xlu2 %3025  ;;  %v2810_v49 = vmul.f32 %v2678_v53, %v5233_v63 }
 0x40b   : > { %4446 = vst.msk [vmem:[%s8130_s21 + $0x20] sm:$0xff] %vm4441_vm10, %v4292_v46  ;;  %v3182_v5 = vmul.f32 %v3026_v41, %v5233_v63  ;;  %v8211_v1 = vadd.f32 1e-05, %v3184_v8  ;;  %v3457_v28 = vsub.f32 1.5, %v3456_v11  ;;  %v9496_v46 = vmax.f32 %v8222_v40, 0.0 }
 0x40c   : > { %v8216_v43 = vsub.f32 %v9763_v58, %v2810_v49  ;;  %v9764_v8 = vmax.f32 %v7441_v56, 0.0  ;;  %v8246_v58 = vadd.f32 %v2487_v18, %v6141_v16 }
 0x40d   : > { %v3246_v45 = vadd.f32 1e-05, %v3182_v5  ;;  %4872 = vrsqrt.f32 %v8211_v1  ;;  %v3458_v41 = vmul.f32 %v8183_v34, %v3457_v28  ;;  %v2706_v11 = vsel %vm665_vm1, %v9496_v46, 0.0 }
 0x40e   : > { %v2938_v57 = vmul.f32 %v8216_v43, %v8216_v43  ;;  %vm3489_vm14 = vweird.f32 %v8211_v1 }
 0x40f   : > { %4874 = vrsqrt.f32 %v3246_v45  ;;  %vm3469_vm11 = vweird.f32 %v3246_v45 }
 0x410   : > { %v4293_v59 = vpop.f32.mrf.mxu2  ;;  %v3060_v60 = vsel %vm665_vm1, %v2938_v57, 0.0 }
 0x411   : > { %v4294_v20 = vadd.f32 %v4293_v59, %v8120_v39  ;;  %2698 = vadd.xlane.f32.xlu2 %v2697_v44  ;;  %3061 = vadd.xlane.f32.xlu1 %v3060_v60  ;;  %v8254_v44 = vpop.f32.mrf.mxu3  ;;  %v3462_v60 = vsel %vm3461_vm8, %v8183_v34, %v3458_v41 }
 0x412   : > { %v2666_v51 = vpop.xlane.xlu2 %2665 }
 0x413   : > { %v8229_v24 = vpop.eup %4872  ;;  %4447 = vst.msk [vmem:[%s8130_s21 + $0x28] sm:$0xff] %vm4441_vm10, %v4294_v20  ;;  %v2806_v30 = vmul.f32 %v2666_v51, %v5233_v63  ;;  %v2574_v51 = vmax.f32 %v8246_v58, 0.0 }
 0x414   : > { %v3484_v5 = vmul.f32 %v8229_v24, %v8211_v1  ;;  %vm3490_vm13 = vweird.f32 %v8229_v24 }
 0x415   : > { %v4875_v53 = vpop.eup %4874  ;;  %v8237_v32 = vsub.f32 %v9764_v8, %v2806_v30  ;;  %v3949_v8 = vmul.f32 %v3462_v60, %v7715_v35  ;;  %vm3491_vm15 = vmor %vm3489_vm14, %vm3490_vm13 }
 0x416   : > { %v3464_v49 = vmul.f32 %v4875_v53, %v3246_v45  ;;  %v3485_v20 = vmul.f32 %v8229_v24, %v3484_v5  ;;  %vm3470_vm9 = vweird.f32 %v4875_v53 }
 0x417   : > { %v2934_v21 = vmul.f32 %v8237_v32, %v8237_v32  ;;  %vm3471_vm12 = vmor %vm3469_vm11, %vm3470_vm9  ;;  %v4014_v35 = vmul.f32 %v7458_v6, %v3949_v8 }
 0x418   : > { %v3465_v56 = vmul.f32 %v4875_v53, %v3464_v49  ;;  %v3486_v34 = vmul.f32 0.5, %v3485_v20 }
 0x419   : > { %v4296_v50 = vpop.f32.mrf.mxu2  ;;  %v3048_v59 = vsel %vm665_vm1, %v2934_v21, 0.0  ;;  %2707 = vadd.xlane.f32.xlu2 %v2706_v11  ;;  %v2675_v11 = vpop.xlane.xlu0 %2674 }
 0x41a   : > { %v4297_v57 = vadd.f32 %v4296_v50, %v8120_v39  ;;  %v3466_v18 = vmul.f32 0.5, %v3465_v56  ;;  %3049 = vadd.xlane.f32.xlu0 %v3048_v59  ;;  %v3029_v10 = vpop.xlane.xlu2 %3028  ;;  %v2736_v56 = vsel %vm665_vm1, %v2574_v51, 0.0  ;;  %v3487_v59 = vsub.f32 1.5, %v3486_v34 }
 0x41b   : > { %v3183_v28 = vmul.f32 %v3029_v10, %v5233_v63  ;;  %v2809_v20 = vmul.f32 %v2675_v11, %v5233_v63 }
 0x41c   : > { %4448 = vst.msk [vmem:[%s8130_s21 + $0x30] sm:$0xff] %vm4441_vm10, %v4297_v57  ;;  %v3467_v30 = vsub.f32 1.5, %v3466_v18  ;;  %v8273_v18 = vpop.f32.mrf.mxu3  ;;  %v3488_v8 = vmul.f32 %v8229_v24, %v3487_v59 }
 0x41d   : > { %v3247_v49 = vadd.f32 1e-05, %v3183_v28  ;;  %v4079_v28 = vadd.f32 %v7487_v31, %v4014_v35 }
 0x41e   : > { %v3468_v21 = vmul.f32 %v4875_v53, %v3467_v30  ;;  %v3492_v35 = vsel %vm3491_vm15, %v8229_v24, %v3488_v8 }
 0x41f   : > { %4876 = vrsqrt.f32 %v3247_v49  ;;  %vm3479_vm2 = vweird.f32 %v3247_v49 }
 0x420   : > { %v3472_v41 = vsel %vm3471_vm12, %v4875_v53, %v3468_v21 }
 0x421   : > { %v4298_v5 = vpop.f32.mrf.mxu2  ;;  %v3950_v50 = vmul.f32 %v3472_v41, %v7833_v4  ;;  %2737 = vadd.xlane.f32.xlu2 %v2736_v56 }
 0x422   : > { %v4299_v57 = vadd.f32 %v4298_v5, %v8120_v39  ;;  %v2669_v60 = vpop.xlane.xlu2 %2668 }
 0x423   : > { %v2807_v45 = vmul.f32 %v2669_v60, %v5233_v63  ;;  %v4015_v53 = vmul.f32 %v7458_v6, %v3950_v50  ;;  %v2681_v50 = vpop.xlane.xlu1 %2680 }
 0x424   : > { %4449 = vst.msk [vmem:[%s8130_s21 + $0x38] sm:$0xff] %vm4441_vm10, %v4299_v57  ;;  %v2811_v1 = vmul.f32 %v2681_v50, %v5233_v63  ;;  %v8306_v24 = vpop.f32.mrf.mxu3 }
 0x425   : > { %v4877_v10 = vpop.eup %4876  ;;  %v8278_v4 = vsub.f32 %v2551_v62, %v2807_v45  ;;  %v4080_v30 = vadd.f32 %v7487_v31, %v4015_v53  ;;  %v8289_v62 = vsub.f32 %v9765_v54, %v2809_v20  ;;  %v3952_v20 = vmul.f32 %v3492_v35, %v7813_v27 }
 0x426   : > { %v3474_v21 = vmul.f32 %v4877_v10, %v3247_v49  ;;  %vm3480_vm0 = vweird.f32 %v4877_v10 }
 0x427   : > { %v4135_v34 = vpack.c.bf16 %v4080_v30, %v4079_v28  ;;  %v2935_v41 = vmul.f32 %v8278_v4, %v8278_v4  ;;  %v2937_v53 = vmul.f32 %v8289_v62, %v8289_v62  ;;  %vm3481_vm3 = vmor %vm3479_vm2, %vm3480_vm0  ;;  %v4017_v49 = vmul.f32 %v7458_v6, %v3952_v20 }
 0x428   : > { %v3475_v5 = vmul.f32 %v4877_v10, %v3474_v21  ;;  %v8312_v21 = vsub.f32 %v2555_v42, %v2811_v1 }
 0x429   : > { %v4301_v56 = vpop.f32.mrf.mxu2  ;;  %4663 = vmatmul.msk.bf16.gmra.mxu2 %vm665_vm1, %v4135_v34  ;;  %v3051_v57 = vsel %vm665_vm1, %v2935_v41, 0.0  ;;  %v3057_v27 = vsel %vm665_vm1, %v2937_v53, 0.0 }
 0x42a   : > { %v4302_v11 = vadd.f32 %v4301_v56, %v8120_v39  ;;  %v3476_v59 = vmul.f32 0.5, %v3475_v5  ;;  %3052 = vadd.xlane.f32.xlu0 %v3051_v57  ;;  %v2684_v60 = vpop.xlane.xlu2 %2683  ;;  %v2939_v56 = vmul.f32 %v8312_v21, %v8312_v21 }
 0x42b   : > { %v2812_v19 = vmul.f32 %v2684_v60, %v5233_v63 }
 0x42c   : > { %4450 = vst.msk [vmem:[%s8130_s21 + $0x40] sm:$0xff] %vm4441_vm10, %v4302_v11  ;;  %v3477_v45 = vsub.f32 1.5, %v3476_v59  ;;  %v2497_v11 = vpop.f32.mrf.mxu3  ;;  %v3063_v60 = vsel %vm665_vm1, %v2939_v56, 0.0 }
 0x42d   : > { %v8304_v28 = vsub.f32 %v2556_v22, %v2812_v19 }
 0x42e   : > { %v3478_v30 = vmul.f32 %v4877_v10, %v3477_v45  ;;  %v2465_v45 = vpop.f32.mrf.mxu1 }
 0x42f   : > { %v2940_v8 = vmul.f32 %v8304_v28, %v8304_v28  ;;  %v8341_v26 = vadd.f32 %v2465_v45, %v6141_v16 }
 0x430   : > { %v3482_v34 = vsel %vm3481_vm3, %v4877_v10, %v3478_v30 }
 0x431   : > { %v4303_v41 = vpop.f32.mrf.mxu2  ;;  %v3951_v17 = vmul.f32 %v3482_v34, %v7922_v55  ;;  %v3066_v54 = vsel %vm665_vm1, %v2940_v8, 0.0  ;;  %v4082_v55 = vadd.f32 %v7487_v31, %v4017_v49 }
 0x432   : > { %v4304_v22 = vadd.f32 %v4303_v41, %v8120_v39  ;;  %v2687_v5 = vpop.xlane.xlu2 %2686  ;;  %3067 = vadd.xlane.f32.xlu1 %v3066_v54  ;;  %3058 = vadd.xlane.f32.xlu0 %v3057_v27  ;;  %v9493_v41 = vmax.f32 %v8341_v26, 0.0  ;;  %v8357_v54 = vadd.f32 %v8273_v18, %v6141_v16 }
 0x433   : > { %v4016_v38 = vmul.f32 %v7458_v6, %v3951_v17  ;;  %v2813_v42 = vmul.f32 %v2687_v5, %v5233_v63 }
 0x434   : > { %4451 = vst.msk [vmem:[%s8130_s21 + $0x48] sm:$0xff] %vm4441_vm10, %v4304_v22  ;;  %v2500_v30 = vpop.f32.mrf.mxu3  ;;  %v2709_v5 = vsel %vm665_vm1, %v9493_v41, 0.0 }
 0x435   : > { %v4081_v10 = vadd.f32 %v7487_v31, %v4016_v38  ;;  %v8329_v35 = vsub.f32 %v2557_v14, %v2813_v42  ;;  %v9498_v42 = vmax.f32 %v8357_v54, 0.0 }
 0x437   : > { %v4136_v50 = vpack.c.bf16 %v4082_v55, %v4081_v10  ;;  %v2941_v1 = vmul.f32 %v8329_v35, %v8329_v35  ;;  %v8370_v10 = vadd.f32 %v2497_v11, %v6141_v16  ;;  %v2742_v56 = vsel %vm665_vm1, %v9498_v42, 0.0 }
 0x439   : > { %v4306_v57 = vpop.f32.mrf.mxu2  ;;  %4664 = vmatmul.msk.bf16.gmra.mxu2 %vm665_vm1, %v4136_v50  ;;  %v3069_v20 = vsel %vm665_vm1, %v2941_v1, 0.0 }
 0x43a   : > { %v4307_v59 = vadd.f32 %v4306_v57, %v8120_v39  ;;  %3064 = vadd.xlane.f32.xlu0 %v3063_v60  ;;  %v8334_v19 = vpop.xlane.xlu2 %3043  ;;  %v9495_v60 = vmax.f32 %v8370_v10, 0.0 }
 0x43c   : > { %4452 = vst.msk [vmem:[%s8130_s21 + $0x50] sm:$0xff] %vm4441_vm10, %v4307_v59  ;;  %v2748_v7 = vsel %vm665_vm1, %v9495_v60, 0.0 }
 0x441   : > { %v4308_v53 = vpop.f32.mrf.mxu2 }
 0x442   : > { %v4309_v14 = vadd.f32 %v4308_v53, %v8120_v39  ;;  %3070 = vadd.xlane.f32.xlu0 %v3069_v20  ;;  %v2693_v8 = vpop.xlane.xlu2 %2692  ;;  %v8389_v53 = vadd.f32 %v8191_v9, %v6141_v16 }
 0x443   : > { %v2815_v34 = vmul.f32 %v2693_v8, %v5233_v63 }
 0x444   : > { %4453 = vst.msk [vmem:[%s8130_s21 + $0x58] sm:$0xff] %vm4441_vm10, %v4309_v14 }
 0x445   : > { %v8351_v27 = vsub.f32 %v2559_v37, %v2815_v34  ;;  %v8366_v37 = vpop.f32.mrf.mxu3 }
 0x447   : > { %v2943_v17 = vmul.f32 %v8351_v27, %v8351_v27 }
 0x449   : > { %v4311_v22 = vpop.f32.mrf.mxu2  ;;  %v3075_v38 = vsel %vm665_vm1, %v2943_v17, 0.0  ;;  %v3035_v2 = vpop.xlane.xlu0 %3034  ;;  %v2573_v17 = vmax.f32 %v8389_v53, 0.0 }
 0x44a   : > { %v4312_v49 = vadd.f32 %v4311_v22, %v8120_v39  ;;  %2710 = vadd.xlane.f32.xlu0 %v2709_v5  ;;  %3076 = vadd.xlane.f32.xlu2 %v3075_v38  ;;  %v3185_v1 = vmul.f32 %v3035_v2, %v5233_v63  ;;  %v8409_v5 = vadd.f32 %v8173_v61, %v6141_v16 }
 0x44b   : > { %v8412_v38 = vadd.f32 %v2500_v30, %v6141_v16  ;;  %v2733_v2 = vsel %vm665_vm1, %v2573_v17, 0.0  ;;  %v3188_v30 = vmul.f32 %v8334_v19, %v5233_v63 }
 0x44c   : > { %4454 = vst.msk [vmem:[%s8130_s21 + $0x60] sm:$0xff] %vm4441_vm10, %v4312_v49  ;;  %v3249_v8 = vadd.f32 1e-05, %v3185_v1  ;;  %v2563_v61 = vmax.f32 %v8409_v5, 0.0 }
 0x44d   : > { %v2505_v11 = vpop.f32.mrf.mxu3  ;;  %v8435_v1 = vadd.f32 1e-05, %v3188_v30 }
 0x44e   : > { %v8393_v20 = vadd.f32 %v2505_v11, %v6141_v16  ;;  %4878 = vrsqrt.f32 %v3249_v8  ;;  %vm3499_vm5 = vweird.f32 %v3249_v8 }
 0x44f   : > { %4880 = vrsqrt.f32 %v8435_v1  ;;  %vm3529_vm15 = vweird.f32 %v8435_v1 }
 0x450   : > { %v9492_v22 = vmax.f32 %v8393_v20, 0.0 }
 0x451   : > { %v4313_v18 = vpop.f32.mrf.mxu2  ;;  %v2690_v50 = vpop.xlane.xlu0 %2689 }
 0x452   : > { %v4314_v55 = vadd.f32 %v4313_v18, %v8120_v39  ;;  %2743 = vadd.xlane.f32.xlu2 %v2742_v56  ;;  %v2814_v57 = vmul.f32 %v2690_v50, %v5233_v63  ;;  %v8427_v50 = vadd.f32 %v8254_v44, %v6141_v16  ;;  %v2467_v44 = vpop.f32.mrf.mxu1 }
 0x454   : > { %4455 = vst.msk [vmem:[%s8130_s21 + $0x68] sm:$0xff] %vm4441_vm10, %v4314_v55  ;;  %v8381_v59 = vsub.f32 %v2558_v29, %v2814_v57  ;;  %v4879_v18 = vpop.eup %4878  ;;  %v9494_v55 = vmax.f32 %v8412_v38, 0.0  ;;  %v2703_v57 = vsel %vm665_vm1, %v2563_v61, 0.0  ;;  %v9497_v19 = vmax.f32 %v8427_v50, 0.0 }
 0x455   : > { %v3494_v56 = vmul.f32 %v4879_v18, %v3249_v8  ;;  %vm3500_vm4 = vweird.f32 %v4879_v18 }
 0x456   : > { %v2942_v45 = vmul.f32 %v8381_v59, %v8381_v59  ;;  %v2751_v11 = vsel %vm665_vm1, %v9494_v55, 0.0  ;;  %vm3501_vm6 = vmor %vm3499_vm5, %vm3500_vm4 }
 0x458   : > { %v3072_v14 = vsel %vm665_vm1, %v2942_v45, 0.0  ;;  %v3495_v45 = vmul.f32 %v4879_v18, %v3494_v56 }
 0x459   : > { %3073 = vadd.xlane.f32.xlu1 %v3072_v14  ;;  %v2696_v29 = vpop.xlane.xlu0 %2695 }
 0x45a   : > { %2749 = vadd.xlane.f32.xlu2 %v2748_v7  ;;  %v2816_v34 = vmul.f32 %v2696_v29, %v5233_v63 }
 0x45c   : > { %v8402_v9 = vsub.f32 %v2560_v48, %v2816_v34  ;;  %v2757_v48 = vsel %vm665_vm1, %v9492_v22, 0.0  ;;  %v3496_v34 = vmul.f32 0.5, %v3495_v45  ;;  %v8454_v22 = vadd.f32 %v8306_v24, %v6141_v16 }
 0x45e   : > { %v2944_v49 = vmul.f32 %v8402_v9, %v8402_v9 }
 0x460   : > { %v3078_v15 = vsel %vm665_vm1, %v2944_v49, 0.0  ;;  %v8441_v49 = vadd.f32 %v2467_v44, %v6141_v16 }
 0x461   : > { %2734 = vadd.xlane.f32.xlu1 %v2733_v2  ;;  %3079 = vadd.xlane.f32.xlu0 %v3078_v15  ;;  %v2739_v2 = vsel %vm665_vm1, %v9497_v19, 0.0  ;;  %v8446_v15 = vpop.eup %4880 }
 0x462   : > { %2758 = vadd.xlane.f32.xlu2 %v2757_v48  ;;  %v3497_v48 = vsub.f32 1.5, %v3496_v34  ;;  %v9499_v56 = vmax.f32 %v8441_v49, 0.0  ;;  %v3524_v45 = vmul.f32 %v8446_v15, %v8435_v1  ;;  %vm3530_vm12 = vweird.f32 %v8446_v15 }
 0x463   : > { %vm3531_vm0 = vmor %vm3529_vm15, %vm3530_vm12 }
 0x464   : > { %v2712_v34 = vsel %vm665_vm1, %v9499_v56, 0.0 }
 0x469   : > { %2704 = vadd.xlane.f32.xlu1 %v2703_v57  ;;  %2752 = vadd.xlane.f32.xlu0 %v2751_v11 }
 0x46b   : > { %v3038_v14 = vpop.xlane.xlu1 %3037 }
 0x46c   : > { %v3186_v7 = vmul.f32 %v3038_v14, %v5233_v63 }
 0x46e   : > { %v3250_v29 = vadd.f32 1e-05, %v3186_v7  ;;  %v3498_v7 = vmul.f32 %v4879_v18, %v3497_v48  ;;  %v2577_v48 = vmax.f32 %v8454_v22, 0.0 }
 0x470   : > { %4882 = vrsqrt.f32 %v3250_v29  ;;  %v3502_v41 = vsel %vm3501_vm6, %v4879_v18, %v3498_v7  ;;  %vm3509_vm8 = vweird.f32 %v3250_v29  ;;  %v8467_v18 = vadd.f32 %v8366_v37, %v6141_v16 }
 0x471   : > { %2740 = vadd.xlane.f32.xlu1 %v2739_v2  ;;  %v3953_v42 = vmul.f32 %v3502_v41, %v8082_v0 }
 0x473   : > { %v3041_v30 = vpop.xlane.xlu1 %3040  ;;  %v4018_v41 = vmul.f32 %v7458_v6, %v3953_v42 }
 0x474   : > { %v3187_v57 = vmul.f32 %v3041_v30, %v5233_v63  ;;  %v3525_v30 = vmul.f32 %v8446_v15, %v3524_v45  ;;  %v2745_v45 = vsel %vm665_vm1, %v2577_v48, 0.0 }
 0x476   : > { %v4883_v11 = vpop.eup %4882  ;;  %v3251_v14 = vadd.f32 1e-05, %v3187_v57  ;;  %v3526_v19 = vmul.f32 0.5, %v3525_v30 }
 0x477   : > { %v3504_v44 = vmul.f32 %v4883_v11, %v3250_v29  ;;  %vm3510_vm7 = vweird.f32 %v4883_v11 }
 0x478   : > { %4884 = vrsqrt.f32 %v3251_v14  ;;  %vm3511_vm9 = vmor %vm3509_vm8, %vm3510_vm7  ;;  %vm3519_vm13 = vweird.f32 %v3251_v14 }
 0x479   : > { %v3505_v2 = vmul.f32 %v4883_v11, %v3504_v44  ;;  %2713 = vadd.xlane.f32.xlu1 %v2712_v34  ;;  %v2580_v34 = vmax.f32 %v8467_v18, 0.0 }
 0x47b   : > { %v3506_v57 = vmul.f32 0.5, %v3505_v2  ;;  %v3056_v37 = vpop.xlane.xlu1 %3055 }
 0x47c   : > { %v3047_v55 = vpop.xlane.xlu2 %3046 }
 0x47d   : > { %v3507_v60 = vsub.f32 1.5, %v3506_v57  ;;  %v3189_v24 = vmul.f32 %v3047_v55, %v5233_v63  ;;  %v8477_v57 = vpop.xlane.xlu0 %2701 }
 0x47e   : > { %v4885_v46 = vpop.eup %4884 }
 0x47f   : > { %v3508_v56 = vmul.f32 %v4883_v11, %v3507_v60  ;;  %v3514_v8 = vmul.f32 %v4885_v46, %v3251_v14  ;;  %v8463_v44 = vadd.f32 1e-05, %v3189_v24  ;;  %v3527_v60 = vsub.f32 1.5, %v3526_v19 }
 0x480   : > { %vm3520_vm11 = vweird.f32 %v4885_v46 }
 0x481   : > { %v3512_v7 = vsel %vm3511_vm9, %v4883_v11, %v3508_v56  ;;  %v3515_v55 = vmul.f32 %v4885_v46, %v3514_v8  ;;  %4886 = vrsqrt.f32 %v8463_v44  ;;  %2746 = vadd.xlane.f32.xlu1 %v2745_v45  ;;  %v3528_v11 = vmul.f32 %v8446_v15, %v3527_v60  ;;  %vm3521_vm14 = vmor %vm3519_vm13, %vm3520_vm11 }
 0x482   : > { %v3954_v0 = vmul.f32 %v3512_v7, %v8146_v47  ;;  %v4083_v47 = vadd.f32 %v7487_v31, %v4018_v41  ;;  %v3192_v45 = vmul.f32 %v3056_v37, %v5233_v63  ;;  %vm3539_vm3 = vweird.f32 %v8463_v44 }
 0x483   : > { %v3516_v29 = vmul.f32 0.5, %v3515_v55  ;;  %v3532_v52 = vsel %vm3531_vm0, %v8446_v15, %v3528_v11 }
 0x484   : > { %v2699_v2 = vpop.xlane.xlu2 %2698  ;;  %v4019_v30 = vmul.f32 %v7458_v6, %v3954_v0  ;;  %v2754_v0 = vsel %vm665_vm1, %v2580_v34, 0.0 }
 0x485   : > { %v3517_v24 = vsub.f32 1.5, %v3516_v29  ;;  %v2817_v56 = vmul.f32 %v2699_v2, %v5233_v63 }
 0x486   : > { %v4084_v42 = vadd.f32 %v7487_v31, %v4019_v30 }
 0x487   : > { %v8483_v19 = vpop.eup %4886  ;;  %v3518_v8 = vmul.f32 %v4885_v46, %v3517_v24  ;;  %v8489_v7 = vsub.f32 %v2561_v12, %v2817_v56  ;;  %v8501_v12 = vadd.f32 1e-05, %v3192_v45  ;;  %v3956_v24 = vmul.f32 %v3532_v52, %v8055_v3  ;;  %v8525_v52 = vpop.f32.mrf.mxu1 }
 0x488   : > { %v4137_v55 = vpack.c.bf16 %v4084_v42, %v4083_v47  ;;  %v3534_v60 = vmul.f32 %v8483_v19, %v8463_v44  ;;  %vm3540_vm2 = vweird.f32 %v8483_v19 }
 0x489   : > { %v3522_v41 = vsel %vm3521_vm14, %v4885_v46, %v3518_v8  ;;  %2755 = vadd.xlane.f32.xlu1 %v2754_v0  ;;  %v2945_v46 = vmul.f32 %v8489_v7, %v8489_v7  ;;  %4888 = vrsqrt.f32 %v8501_v12  ;;  %v4021_v8 = vmul.f32 %v7458_v6, %v3956_v24  ;;  %vm3541_vm4 = vmor %vm3539_vm3, %vm3540_vm2 }
 0x48a   : > { %v4316_v14 = vpop.f32.mrf.mxu2  ;;  %4665 = vmatmul.msk.bf16.gmra.mxu2 %vm665_vm1, %v4137_v55  ;;  %v3955_v37 = vmul.f32 %v3522_v41, %v8159_v25  ;;  %v3535_v2 = vmul.f32 %v8483_v19, %v3534_v60  ;;  %v3062_v60 = vpop.xlane.xlu1 %3061  ;;  %vm3569_vm9 = vweird.f32 %v8501_v12 }
 0x48b   : > { %v4317_v29 = vadd.f32 %v4316_v14, %v8120_v39  ;;  %v3081_v25 = vsel %vm665_vm1, %v2945_v46, 0.0  ;;  %v3194_v24 = vmul.f32 %v3062_v60, %v5233_v63 }
 0x48c   : > { %v8505_v1 = vpop.xlane.xlu2 %2707  ;;  %v4020_v47 = vmul.f32 %v7458_v6, %v3955_v37  ;;  %v3536_v42 = vmul.f32 0.5, %v3535_v2  ;;  %v2507_v2 = vpop.f32.mrf.mxu3 }
 0x48d   : > { %4456 = vst.msk [vmem:[%s8130_s21 + $0x70] sm:$0xff] %vm4441_vm10, %v4317_v29  ;;  %v3050_v30 = vpop.xlane.xlu0 %3049  ;;  %v4086_v29 = vadd.f32 %v7487_v31, %v4021_v8  ;;  %v8541_v58 = vadd.f32 %v2507_v2, %v6141_v16  ;;  %v8545_v8 = vadd.f32 1e-05, %v3194_v24 }
 0x48e   : > { %v3190_v15 = vmul.f32 %v3050_v30, %v5233_v63  ;;  %v4085_v3 = vadd.f32 %v7487_v31, %v4020_v47  ;;  %v3537_v41 = vsub.f32 1.5, %v3536_v42 }
 0x48f   : > { %v8520_v0 = vpop.eup %4888  ;;  %v2472_v44 = vpop.f32.mrf.mxu1  ;;  %vm3589_vm3 = vweird.f32 %v8545_v8 }
 0x490   : > { %v3254_v56 = vadd.f32 1e-05, %v3190_v15  ;;  %v3564_v30 = vmul.f32 %v8520_v0, %v8501_v12  ;;  %v4138_v15 = vpack.c.bf16 %v4086_v29, %v4085_v3  ;;  %vm3570_vm8 = vweird.f32 %v8520_v0 }
 0x491   : > { %3082 = vadd.xlane.f32.xlu1 %v3081_v25  ;;  %v3538_v25 = vmul.f32 %v8483_v19, %v3537_v41  ;;  %vm3571_vm11 = vmor %vm3569_vm9, %vm3570_vm8 }
 0x492   : > { %4890 = vrsqrt.f32 %v3254_v56  ;;  %v4318_v11 = vpop.f32.mrf.mxu2  ;;  %vm3549_vm6 = vweird.f32 %v3254_v56 }
 0x493   : > { %v4319_v45 = vadd.f32 %v4318_v11, %v8120_v39  ;;  %4892 = vrsqrt.f32 %v8545_v8 }
 0x494   : > { %v2738_v55 = vpop.xlane.xlu2 %2737 }
 0x495   : > { %4457 = vst.msk [vmem:[%s8130_s21 + $0x78] sm:$0xff] %vm4441_vm10, %v4319_v45  ;;  %v2830_v14 = vmul.f32 %v2738_v55, %v5233_v63  ;;  %v3542_v45 = vsel %vm3541_vm4, %v8483_v19, %v3538_v25  ;;  %v3565_v55 = vmul.f32 %v8520_v0, %v3564_v30  ;;  %v8554_v19 = vadd.f32 %v2472_v44, %v6141_v16 }
 0x496   : > { %v3957_v2 = vmul.f32 %v3542_v45, %v8187_v36 }
 0x497   : > { %v8530_v37 = vsub.f32 %v2574_v51, %v2830_v14  ;;  %v2582_v14 = vmax.f32 %v8541_v58, 0.0 }
 0x498   : > { %v4891_v46 = vpop.eup %4890  ;;  %v4022_v36 = vmul.f32 %v7458_v6, %v3957_v2 }
 0x499   : > { %v3544_v47 = vmul.f32 %v4891_v46, %v3254_v56  ;;  %v2958_v42 = vmul.f32 %v8530_v37, %v8530_v37  ;;  %vm3550_vm5 = vweird.f32 %v4891_v46  ;;  %v2760_v25 = vsel %vm665_vm1, %v2582_v14, 0.0 }
 0x49a   : > { %4666 = vmatmul.msk.bf16.gmra.mxu2 %vm665_vm1, %v4138_v15  ;;  %v3566_v15 = vmul.f32 0.5, %v3565_v55  ;;  %vm3551_vm7 = vmor %vm3549_vm6, %vm3550_vm5  ;;  %v8561_v55 = vpop.eup %4892 }
 0x49b   : > { %v3545_v51 = vmul.f32 %v4891_v46, %v3544_v47  ;;  %v3120_v11 = vsel %vm665_vm1, %v2958_v42, 0.0  ;;  %vm3590_vm0 = vweird.f32 %v8561_v55 }
 0x49c   : > { %3121 = vadd.xlane.f32.xlu0 %v3120_v11  ;;  %vm3591_vm5 = vmor %vm3589_vm3, %vm3590_vm0 }
 0x49d   : > { %v3546_v3 = vmul.f32 0.5, %v3545_v51  ;;  %v3053_v41 = vpop.xlane.xlu0 %3052  ;;  %v3567_v51 = vsub.f32 1.5, %v3566_v15  ;;  %v3584_v15 = vmul.f32 %v8561_v55, %v8545_v8 }
 0x49e   : > { %v3191_v60 = vmul.f32 %v3053_v41, %v5233_v63 }
 0x49f   : > { %v3547_v29 = vsub.f32 1.5, %v3546_v3  ;;  %v3568_v2 = vmul.f32 %v8520_v0, %v3567_v51 }
 0x4a0   : > { %v3255_v24 = vadd.f32 1e-05, %v3191_v60 }
 0x4a1   : > { %v3548_v47 = vmul.f32 %v4891_v46, %v3547_v29 }
 0x4a2   : > { %4894 = vrsqrt.f32 %v3255_v24  ;;  %vm3559_vm13 = vweird.f32 %v3255_v24 }
 0x4a3   : > { %v3552_v30 = vsel %vm3551_vm7, %v4891_v46, %v3548_v47  ;;  %v2568_v46 = vmax.f32 %v8554_v19, 0.0 }
 0x4a4   : > { %v3958_v42 = vmul.f32 %v3552_v30, %v8237_v32  ;;  %2761 = vadd.xlane.f32.xlu0 %v2760_v25  ;;  %v4087_v32 = vadd.f32 %v7487_v31, %v4022_v36 }
 0x4a5   : > { %v3068_v11 = vpop.xlane.xlu1 %3067  ;;  %v3059_v45 = vpop.xlane.xlu0 %3058 }
 0x4a6   : > { %v3193_v56 = vmul.f32 %v3059_v45, %v5233_v63  ;;  %v4023_v3 = vmul.f32 %v7458_v6, %v3958_v42  ;;  %v3196_v60 = vmul.f32 %v3068_v11, %v5233_v63  ;;  %v2718_v42 = vsel %vm665_vm1, %v2568_v46, 0.0 }
 0x4a7   : > { %v3572_v11 = vsel %vm3571_vm11, %v8520_v0, %v3568_v2  ;;  %v3585_v45 = vmul.f32 %v8561_v55, %v3584_v15 }
 0x4a8   : > { %v4895_v41 = vpop.eup %4894  ;;  %v3257_v29 = vadd.f32 1e-05, %v3193_v56  ;;  %v4088_v44 = vadd.f32 %v7487_v31, %v4023_v3  ;;  %v8577_v36 = vadd.f32 1e-05, %v3196_v60  ;;  %v3960_v60 = vmul.f32 %v3572_v11, %v8179_v23 }
 0x4a9   : > { %v3554_v47 = vmul.f32 %v4895_v41, %v3255_v24  ;;  %vm3560_vm12 = vweird.f32 %v4895_v41  ;;  %v3586_v0 = vmul.f32 0.5, %v3585_v45 }
 0x4aa   : > { %v4139_v30 = vpack.c.bf16 %v4088_v44, %v4087_v32  ;;  %4896 = vrsqrt.f32 %v3257_v29  ;;  %vm3561_vm14 = vmor %vm3559_vm13, %vm3560_vm12  ;;  %v4025_v23 = vmul.f32 %v7458_v6, %v3960_v60  ;;  %vm3579_vm2 = vweird.f32 %v3257_v29 }
 0x4ab   : > { %v3555_v25 = vmul.f32 %v4895_v41, %v3554_v47  ;;  %4898 = vrsqrt.f32 %v8577_v36  ;;  %v3587_v11 = vsub.f32 1.5, %v3586_v0  ;;  %vm3609_vm11 = vweird.f32 %v8577_v36 }
 0x4ac   : > { %v4321_v51 = vpop.f32.mrf.mxu2  ;;  %4667 = vmatmul.msk.bf16.gmra.mxu2 %vm665_vm1, %v4139_v30  ;;  %2719 = vadd.xlane.f32.xlu0 %v2718_v42  ;;  %v4090_v60 = vadd.f32 %v7487_v31, %v4025_v23 }
 0x4ad   : > { %v3556_v56 = vmul.f32 0.5, %v3555_v25  ;;  %v4322_v12 = vadd.f32 %v4321_v51, %v8120_v39  ;;  %v3065_v3 = vpop.xlane.xlu0 %3064  ;;  %v3588_v0 = vmul.f32 %v8561_v55, %v3587_v11 }
 0x4ae   : > { %v3195_v32 = vmul.f32 %v3065_v3, %v5233_v63 }
 0x4af   : > { %v3557_v44 = vsub.f32 1.5, %v3556_v56  ;;  %4458 = vst.msk [vmem:[%s8130_s21 + $0x80] sm:$0xff] %vm4441_vm10, %v4322_v12 }
 0x4b0   : > { %v8588_v47 = vadd.f32 1e-05, %v3195_v32  ;;  %v4897_v30 = vpop.eup %4896 }
 0x4b1   : > { %v3558_v2 = vmul.f32 %v4895_v41, %v3557_v44  ;;  %v3574_v15 = vmul.f32 %v4897_v30, %v3257_v29  ;;  %v8594_v32 = vpop.eup %4898  ;;  %vm3580_vm15 = vweird.f32 %v4897_v30 }
 0x4b2   : > { %4900 = vrsqrt.f32 %v8588_v47  ;;  %vm3581_vm4 = vmor %vm3579_vm2, %vm3580_vm15  ;;  %vm3610_vm7 = vweird.f32 %v8594_v32  ;;  %vm3599_vm8 = vweird.f32 %v8588_v47 }
 0x4b3   : > { %v3562_v25 = vsel %vm3561_vm14, %v4895_v41, %v3558_v2  ;;  %v3575_v51 = vmul.f32 %v4897_v30, %v3574_v15  ;;  %v3604_v15 = vmul.f32 %v8594_v32, %v8577_v36  ;;  %vm3611_vm12 = vmor %vm3609_vm11, %vm3610_vm7 }
 0x4b4   : > { %v3959_v42 = vmul.f32 %v3562_v25, %v8278_v4  ;;  %v4323_v56 = vpop.f32.mrf.mxu2 }
 0x4b5   : > { %v4324_v12 = vadd.f32 %v4323_v56, %v8120_v39  ;;  %v3071_v3 = vpop.xlane.xlu0 %3070  ;;  %v3576_v45 = vmul.f32 0.5, %v3575_v51 }
 0x4b6   : > { %v4024_v24 = vmul.f32 %v7458_v6, %v3959_v42  ;;  %v3197_v44 = vmul.f32 %v3071_v3, %v5233_v63  ;;  %v3592_v3 = vsel %vm3591_vm5, %v8561_v55, %v3588_v0 }
 0x4b7   : > { %4459 = vst.msk [vmem:[%s8130_s21 + $0x88] sm:$0xff] %vm4441_vm10, %v4324_v12  ;;  %v3577_v2 = vsub.f32 1.5, %v3576_v45  ;;  %v3605_v45 = vmul.f32 %v8594_v32, %v3604_v15  ;;  %v3962_v8 = vmul.f32 %v3592_v3, %v8216_v43 }
 0x4b8   : > { %v4901_v41 = vpop.eup %4900  ;;  %v4089_v4 = vadd.f32 %v7487_v31, %v4024_v24  ;;  %v8608_v12 = vadd.f32 1e-05, %v3197_v44 }
 0x4b9   : > { %v3594_v25 = vmul.f32 %v4901_v41, %v8588_v47  ;;  %v3578_v42 = vmul.f32 %v4897_v30, %v3577_v2  ;;  %v4027_v55 = vmul.f32 %v7458_v6, %v3962_v8  ;;  %vm3600_vm6 = vweird.f32 %v4901_v41 }
 0x4ba   : > { %v4140_v51 = vpack.c.bf16 %v4090_v60, %v4089_v4  ;;  %4902 = vrsqrt.f32 %v8608_v12  ;;  %vm3601_vm9 = vmor %vm3599_vm8, %vm3600_vm6  ;;  %vm3619_vm14 = vweird.f32 %v8608_v12 }
 0x4bb   : > { %v3595_v56 = vmul.f32 %v4901_v41, %v3594_v25  ;;  %v3582_v23 = vsel %vm3581_vm4, %v4897_v30, %v3578_v42  ;;  %v3606_v30 = vmul.f32 0.5, %v3605_v45 }
 0x4bc   : > { %v4326_v11 = vpop.f32.mrf.mxu2  ;;  %4668 = vmatmul.msk.bf16.gmra.mxu2 %vm665_vm1, %v4140_v51  ;;  %v3961_v29 = vmul.f32 %v3582_v23, %v8289_v62  ;;  %v4092_v23 = vadd.f32 %v7487_v31, %v4027_v55 }
 0x4bd   : > { %v4327_v24 = vadd.f32 %v4326_v11, %v8120_v39  ;;  %v3596_v2 = vmul.f32 0.5, %v3595_v56  ;;  %v3607_v15 = vsub.f32 1.5, %v3606_v30  ;;  %v3077_v25 = vpop.xlane.xlu2 %3076 }
 0x4be   : > { %v4026_v44 = vmul.f32 %v7458_v6, %v3961_v29  ;;  %v3199_v56 = vmul.f32 %v3077_v25, %v5233_v63  ;;  %v8636_v29 = vpop.xlane.xlu0 %2710 }
 0x4bf   : > { %4460 = vst.msk [vmem:[%s8130_s21 + $0x90] sm:$0xff] %vm4441_vm10, %v4327_v24  ;;  %v3597_v4 = vsub.f32 1.5, %v3596_v2  ;;  %v3608_v11 = vmul.f32 %v8594_v32, %v3607_v15  ;;  %v2821_v18 = vmul.f32 %v8636_v29, %v5233_v63  ;;  %v9772_v29 = vmax.f32 %v8441_v49, 0.0 }
 0x4c0   : > { %v8621_v0 = vpop.eup %4902  ;;  %v4091_v42 = vadd.f32 %v7487_v31, %v4026_v44  ;;  %v8638_v2 = vadd.f32 1e-05, %v3199_v56 }
 0x4c1   : > { %v3598_v51 = vmul.f32 %v4901_v41, %v3597_v4  ;;  %v3614_v43 = vmul.f32 %v8621_v0, %v8608_v12  ;;  %v3612_v30 = vsel %vm3611_vm12, %v8594_v32, %v3608_v11  ;;  %vm3620_vm13 = vweird.f32 %v8621_v0 }
 0x4c2   : > { %v4141_v3 = vpack.c.bf16 %v4092_v23, %v4091_v42  ;;  %v3964_v36 = vmul.f32 %v3612_v30, %v8304_v28  ;;  %4904 = vrsqrt.f32 %v8638_v2  ;;  %vm3621_vm15 = vmor %vm3619_vm14, %vm3620_vm13  ;;  %vm3639_vm8 = vweird.f32 %v8638_v2 }
 0x4c3   : > { %v3602_v45 = vsel %vm3601_vm9, %v4901_v41, %v3598_v51  ;;  %v3615_v24 = vmul.f32 %v8621_v0, %v3614_v43  ;;  %v2818_v43 = vmul.f32 %v8477_v57, %v5233_v63 }
 0x4c4   : > { %v4328_v60 = vpop.f32.mrf.mxu2  ;;  %v3963_v47 = vmul.f32 %v3602_v45, %v8312_v21 }
 0x4c5   : > { %v4329_v62 = vadd.f32 %v4328_v60, %v8120_v39  ;;  %v3616_v41 = vmul.f32 0.5, %v3615_v24  ;;  %v8669_v57 = vsub.f32 %v2562_v13, %v2818_v43 }
 0x4c6   : > { %v4028_v60 = vmul.f32 %v7458_v6, %v3963_v47 }
 0x4c7   : > { %4461 = vst.msk [vmem:[%s8130_s21 + $0x98] sm:$0xff] %vm4441_vm10, %v4329_v62  ;;  %v3617_v55 = vsub.f32 1.5, %v3616_v41  ;;  %v4029_v62 = vmul.f32 %v7458_v6, %v3964_v36 }
 0x4c8   : > { %v8650_v51 = vpop.eup %4904  ;;  %v4093_v21 = vadd.f32 %v7487_v31, %v4028_v60  ;;  %v2744_v60 = vpop.xlane.xlu2 %2743 }
 0x4c9   : > { %v3618_v11 = vmul.f32 %v8621_v0, %v3617_v55  ;;  %v4094_v45 = vadd.f32 %v7487_v31, %v4029_v62  ;;  %v3634_v24 = vmul.f32 %v8650_v51, %v8638_v2  ;;  %vm3640_vm5 = vweird.f32 %v8650_v51 }
 0x4ca   : > { %vm3641_vm9 = vmor %vm3639_vm8, %vm3640_vm5 }
 0x4cb   : > { %v3635_v41 = vmul.f32 %v8650_v51, %v3634_v24 }
 0x4cc   : > { %4669 = vmatmul.msk.bf16.gmra.mxu2 %vm665_vm1, %v4141_v3  ;;  %v3074_v8 = vpop.xlane.xlu1 %3073 }
 0x4cd   : > { %v3198_v44 = vmul.f32 %v3074_v8, %v5233_v63 }
 0x4cf   : > { %v3262_v4 = vadd.f32 1e-05, %v3198_v44  ;;  %v3622_v44 = vsel %vm3621_vm15, %v8621_v0, %v3618_v11  ;;  %v2946_v0 = vmul.f32 %v8669_v57, %v8669_v57 }
 0x4d0   : > { %v3965_v13 = vmul.f32 %v3622_v44, %v8329_v35  ;;  %v9767_v44 = vmax.f32 %v8427_v50, 0.0 }
 0x4d1   : > { %4906 = vrsqrt.f32 %v3262_v4  ;;  %vm3629_vm2 = vweird.f32 %v3262_v4 }
 0x4d4   : > { %v2735_v15 = vpop.xlane.xlu1 %2734  ;;  %v3080_v25 = vpop.xlane.xlu0 %3079 }
 0x4d5   : > { %v2829_v32 = vmul.f32 %v2735_v15, %v5233_v63  ;;  %v3200_v42 = vmul.f32 %v3080_v25, %v5233_v63  ;;  %v2832_v25 = vmul.f32 %v2744_v60, %v5233_v63 }
 0x4d7   : > { %v4907_v28 = vpop.eup %4906  ;;  %v8657_v56 = vsub.f32 %v2573_v17, %v2829_v32  ;;  %v3264_v23 = vadd.f32 1e-05, %v3200_v42  ;;  %v4142_v17 = vpack.c.bf16 %v4094_v45, %v4093_v21  ;;  %v3636_v42 = vmul.f32 0.5, %v3635_v41 }
 0x4d8   : > { %v3624_v3 = vmul.f32 %v4907_v28, %v3262_v4  ;;  %vm3630_vm0 = vweird.f32 %v4907_v28  ;;  %v9766_v45 = vmax.f32 %v8357_v54, 0.0 }
 0x4d9   : > { %4908 = vrsqrt.f32 %v3264_v23  ;;  %v2957_v8 = vmul.f32 %v8657_v56, %v8657_v56  ;;  %vm3631_vm3 = vmor %vm3629_vm2, %vm3630_vm0  ;;  %vm3649_vm6 = vweird.f32 %v3264_v23 }
 0x4da   : > { %v3625_v53 = vmul.f32 %v4907_v28, %v3624_v3  ;;  %v4030_v3 = vmul.f32 %v7458_v6, %v3965_v13  ;;  %v8692_v24 = vsub.f32 %v9766_v45, %v2832_v25  ;;  %v2750_v45 = vpop.xlane.xlu2 %2749 }
 0x4db   : > { %v3117_v30 = vsel %vm665_vm1, %v2957_v8, 0.0 }
 0x4dc   : > { %v3626_v47 = vmul.f32 0.5, %v3625_v53  ;;  %4670 = vmatmul.msk.bf16.gmra.mxu2 %vm665_vm1, %v4142_v17  ;;  %3118 = vadd.xlane.f32.xlu2 %v3117_v30  ;;  %v2705_v36 = vpop.xlane.xlu1 %2704  ;;  %v2510_v53 = vpop.f32.mrf.mxu3  ;;  %v3637_v17 = vsub.f32 1.5, %v3636_v42  ;;  %v4095_v54 = vadd.f32 %v7487_v31, %v4030_v3  ;;  %v2960_v60 = vmul.f32 %v8692_v24, %v8692_v24 }
 0x4dd   : > { %v2819_v12 = vmul.f32 %v2705_v36, %v5233_v63  ;;  %v8709_v50 = vadd.f32 %v2510_v53, %v6141_v16  ;;  %v2834_v53 = vmul.f32 %v2750_v45, %v5233_v63 }
 0x4de   : > { %v3627_v55 = vsub.f32 1.5, %v3626_v47 }
 0x4df   : > { %v4909_v33 = vpop.eup %4908  ;;  %v8679_v15 = vsub.f32 %v2563_v61, %v2819_v12  ;;  %v3084_v61 = vsel %vm665_vm1, %v2946_v0, 0.0  ;;  %v3638_v12 = vmul.f32 %v8650_v51, %v3637_v17  ;;  %v2583_v2 = vmax.f32 %v8709_v50, 0.0 }
 0x4e0   : > { %v3628_v62 = vmul.f32 %v4907_v28, %v3627_v55  ;;  %v3644_v32 = vmul.f32 %v4909_v33, %v3264_v23  ;;  %vm3650_vm4 = vweird.f32 %v4909_v33 }
 0x4e1   : > { %v2947_v21 = vmul.f32 %v8679_v15, %v8679_v15  ;;  %vm3651_vm7 = vmor %vm3649_vm6, %vm3650_vm4  ;;  %v3642_v42 = vsel %vm3641_vm9, %v8650_v51, %v3638_v12 }
 0x4e2   : > { %v3632_v43 = vsel %vm3631_vm3, %v4907_v28, %v3628_v62  ;;  %v3645_v11 = vmul.f32 %v4909_v33, %v3644_v32  ;;  %v8715_v62 = vadd.f32 %v8525_v52, %v6141_v16  ;;  %v3126_v32 = vsel %vm665_vm1, %v2960_v60, 0.0 }
 0x4e3   : > { %v3966_v35 = vmul.f32 %v3632_v43, %v8381_v59  ;;  %v3087_v5 = vsel %vm665_vm1, %v2947_v21, 0.0  ;;  %v2475_v43 = vpop.f32.mrf.mxu1  ;;  %v2820_v52 = vmul.f32 %v8505_v1, %v5233_v63  ;;  %v9769_v60 = vmax.f32 %v8370_v10, 0.0  ;;  %v2753_v10 = vpop.xlane.xlu0 %2752 }
 0x4e4   : > { %v3646_v4 = vmul.f32 0.5, %v3645_v11  ;;  %v2741_v8 = vpop.xlane.xlu1 %2740  ;;  %3088 = vadd.xlane.f32.xlu0 %v3087_v5  ;;  %3085 = vadd.xlane.f32.xlu2 %v3084_v61  ;;  %v2567_v11 = vmax.f32 %v8715_v62, 0.0  ;;  %v9768_v61 = vmax.f32 %v8222_v40, 0.0 }
 0x4e5   : > { %v2831_v28 = vmul.f32 %v2741_v8, %v5233_v63  ;;  %v4031_v59 = vmul.f32 %v7458_v6, %v3966_v35  ;;  %v3967_v35 = vmul.f32 %v3642_v42, %v8351_v27  ;;  %v8756_v12 = vsub.f32 %v9769_v60, %v2834_v53 }
 0x4e6   : > { %v3647_v30 = vsub.f32 1.5, %v3646_v4  ;;  %v8729_v3 = vsub.f32 %v9768_v61, %v2820_v52  ;;  %v2715_v27 = vsel %vm665_vm1, %v2567_v11, 0.0  ;;  %v9770_v61 = vmax.f32 %v8412_v38, 0.0 }
 0x4e7   : > { %v8698_v47 = vsub.f32 %v9767_v44, %v2831_v28  ;;  %v4096_v36 = vadd.f32 %v7487_v31, %v4031_v59  ;;  %v4032_v4 = vmul.f32 %v7458_v6, %v3967_v35  ;;  %v8777_v35 = vadd.f32 %v2475_v43, %v6141_v16 }
 0x4e8   : > { %v3648_v41 = vmul.f32 %v4909_v33, %v3647_v30  ;;  %v2948_v28 = vmul.f32 %v8729_v3, %v8729_v3 }
 0x4e9   : > { %v4143_v55 = vpack.c.bf16 %v4096_v36, %v4095_v54  ;;  %v2959_v13 = vmul.f32 %v8698_v47, %v8698_v47  ;;  %v4097_v30 = vadd.f32 %v7487_v31, %v4032_v4  ;;  %v2569_v38 = vmax.f32 %v8777_v35, 0.0 }
 0x4ea   : > { %v3652_v0 = vsel %vm3651_vm7, %v4909_v33, %v3648_v41  ;;  %v2512_v33 = vpop.f32.mrf.mxu3  ;;  %v3090_v22 = vsel %vm665_vm1, %v2948_v28, 0.0 }
 0x4eb   : > { %v3123_v25 = vsel %vm665_vm1, %v2959_v13, 0.0  ;;  %v3968_v21 = vmul.f32 %v3652_v0, %v8402_v9  ;;  %v2763_v9 = vsel %vm665_vm1, %v2583_v2, 0.0  ;;  %v8735_v51 = vadd.f32 %v2512_v33, %v6141_v16  ;;  %v2477_v54 = vpop.f32.mrf.mxu1 }
 0x4ec   : > { %4671 = vmatmul.msk.bf16.gmra.mxu2 %vm665_vm1, %v4143_v55  ;;  %3124 = vadd.xlane.f32.xlu1 %v3123_v25  ;;  %v2714_v23 = vpop.xlane.xlu1 %2713  ;;  %v8764_v13 = vadd.f32 %v2477_v54, %v6141_v16  ;;  %v2835_v33 = vmul.f32 %v2753_v10, %v5233_v63  ;;  %v2721_v28 = vsel %vm665_vm1, %v2569_v38, 0.0 }
 0x4ed   : > { %3127 = vadd.xlane.f32.xlu2 %v3126_v32  ;;  %v4033_v5 = vmul.f32 %v7458_v6, %v3968_v21  ;;  %v2584_v59 = vmax.f32 %v8735_v51, 0.0  ;;  %v2962_v32 = vmul.f32 %v8756_v12, %v8756_v12 }
 0x4ee   : > { %v2570_v21 = vmax.f32 %v8764_v13, 0.0 }
 0x4ef   : > { %v4098_v8 = vadd.f32 %v7487_v31, %v4033_v5  ;;  %v2766_v0 = vsel %vm665_vm1, %v2584_v59, 0.0  ;;  %v3132_v5 = vsel %vm665_vm1, %v2962_v32, 0.0 }
 0x4f0   : > { %v2724_v43 = vsel %vm665_vm1, %v2570_v21, 0.0 }
 0x4f1   : > { %v4144_v41 = vpack.c.bf16 %v4098_v8, %v4097_v30  ;;  %v9771_v30 = vmax.f32 %v8341_v26, 0.0 }
 0x4f2   : > { %v2515_v44 = vpop.f32.mrf.mxu3 }
 0x4f3   : > { %v8761_v55 = vadd.f32 %v2515_v44, %v6141_v16  ;;  %v8810_v44 = vsub.f32 %v9771_v30, %v2821_v18  ;;  %v9773_v30 = vmax.f32 %v8393_v20, 0.0 }
 0x4f4   : > { %2764 = vadd.xlane.f32.xlu1 %v2763_v9  ;;  %v2747_v1 = vpop.xlane.xlu1 %2746  ;;  %v8782_v9 = vsub.f32 %v9770_v61, %v2835_v33 }
 0x4f5   : > { %v2833_v40 = vmul.f32 %v2747_v1, %v5233_v63  ;;  %2716 = vadd.xlane.f32.xlu2 %v2715_v27  ;;  %v2585_v42 = vmax.f32 %v8761_v55, 0.0  ;;  %v2480_v27 = vpop.f32.mrf.mxu1  ;;  %v2949_v10 = vmul.f32 %v8810_v44, %v8810_v44 }
 0x4f6   : > { %v2963_v8 = vmul.f32 %v8782_v9, %v8782_v9  ;;  %v8833_v33 = vadd.f32 %v2480_v27, %v6141_v16 }
 0x4f7   : > { %v8746_v17 = vsub.f32 %v2577_v48, %v2833_v40  ;;  %v2769_v1 = vsel %vm665_vm1, %v2585_v42, 0.0  ;;  %v3093_v61 = vsel %vm665_vm1, %v2949_v10, 0.0 }
 0x4f9   : > { %v2961_v36 = vmul.f32 %v8746_v17, %v8746_v17 }
 0x4fa   : > { %v2517_v4 = vpop.f32.mrf.mxu3 }
 0x4fb   : > { %v3129_v48 = vsel %vm665_vm1, %v2961_v36, 0.0  ;;  %v8803_v53 = vadd.f32 %v2517_v4, %v6141_v16  ;;  %v3135_v36 = vsel %vm665_vm1, %v2963_v8, 0.0 }
 0x4fc   : > { %4672 = vmatmul.msk.bf16.gmra.mxu2 %vm665_vm1, %v4144_v41  ;;  %3091 = vadd.xlane.f32.xlu1 %v3090_v22  ;;  %v2756_v25 = vpop.xlane.xlu1 %2755 }
 0x4fd   : > { %3130 = vadd.xlane.f32.xlu0 %v3129_v48  ;;  %2767 = vadd.xlane.f32.xlu2 %v2766_v0  ;;  %v2836_v52 = vmul.f32 %v2756_v25, %v5233_v63  ;;  %v2586_v22 = vmax.f32 %v8803_v53, 0.0  ;;  %v2482_v0 = vpop.f32.mrf.mxu1 }
 0x4fe   : > { %v8827_v25 = vadd.f32 %v2482_v0, %v6141_v16 }
 0x4ff   : > { %v8786_v45 = vsub.f32 %v2580_v34, %v2836_v52  ;;  %v2822_v34 = vmul.f32 %v2714_v23, %v5233_v63  ;;  %v2772_v32 = vsel %vm665_vm1, %v2586_v22, 0.0  ;;  %v2759_v52 = vpop.xlane.xlu2 %2758 }
 0x500   : > { %v2572_v4 = vmax.f32 %v8827_v25, 0.0  ;;  %v2837_v18 = vmul.f32 %v2759_v52, %v5233_v63 }
 0x501   : > { %v2964_v40 = vmul.f32 %v8786_v45, %v8786_v45  ;;  %v8814_v23 = vsub.f32 %v9772_v29, %v2822_v34 }
 0x502   : > { %v2520_v48 = vpop.f32.mrf.mxu3  ;;  %v8850_v29 = vsub.f32 %v9773_v30, %v2837_v18 }
 0x503   : > { %v3138_v54 = vsel %vm665_vm1, %v2964_v40, 0.0  ;;  %v2950_v49 = vmul.f32 %v8814_v23, %v8814_v23  ;;  %v2571_v40 = vmax.f32 %v8833_v33, 0.0  ;;  %v8864_v20 = vadd.f32 %v2520_v48, %v6141_v16 }
 0x504   : > { %3133 = vadd.xlane.f32.xlu1 %v3132_v5  ;;  %v2965_v10 = vmul.f32 %v8850_v29, %v8850_v29 }
 0x505   : > { %2770 = vadd.xlane.f32.xlu0 %v2769_v1  ;;  %2725 = vadd.xlane.f32.xlu2 %v2724_v43  ;;  %v3096_v5 = vsel %vm665_vm1, %v2950_v49, 0.0  ;;  %v2587_v52 = vmax.f32 %v8864_v20, 0.0 }
 0x507   : > { %v2775_v18 = vsel %vm665_vm1, %v2587_v52, 0.0 }
 0x50a   : > { %v2522_v8 = vpop.f32.mrf.mxu3 }
 0x50c   : > { %2722 = vadd.xlane.f32.xlu1 %v2721_v28 }
 0x50d   : > { %v4331_v41 = vpop.f32.mrf.mxu2  ;;  %3139 = vadd.xlane.f32.xlu0 %v3138_v54  ;;  %3136 = vadd.xlane.f32.xlu2 %v3135_v36  ;;  %v2730_v54 = vsel %vm665_vm1, %v2572_v4, 0.0  ;;  %v8856_v36 = vadd.f32 %v2522_v8, %v6141_v16  ;;  %v3141_v16 = vsel %vm665_vm1, %v2965_v10, 0.0 }
 0x50e   : > { %v4332_v60 = vadd.f32 %v4331_v41, %v8120_v39  ;;  %v2727_v41 = vsel %vm665_vm1, %v2571_v40, 0.0 }
 0x50f   : > { %v3122_v26 = vpop.xlane.xlu0 %3121 }
 0x510   : > { %4462 = vst.msk [vmem:[%s8130_s21 + $0xa0] sm:$0xff] %vm4441_vm10, %v4332_v60 }
 0x514   : > { %2773 = vadd.xlane.f32.xlu1 %v2772_v32  ;;  %v2588_v32 = vmax.f32 %v8856_v36, 0.0 }
 0x515   : > { %v4333_v1 = vpop.f32.mrf.mxu2  ;;  %3097 = vadd.xlane.f32.xlu0 %v3096_v5  ;;  %3094 = vadd.xlane.f32.xlu2 %v3093_v61 }
 0x516   : > { %v4334_v43 = vadd.f32 %v4333_v1, %v8120_v39  ;;  %v2778_v48 = vsel %vm665_vm1, %v2588_v32, 0.0 }
 0x517   : > { %v2762_v34 = vpop.xlane.xlu0 %2761 }
 0x518   : > { %4463 = vst.msk [vmem:[%s8130_s21 + $0xa8] sm:$0xff] %vm4441_vm10, %v4334_v43  ;;  %v2838_v27 = vmul.f32 %v2762_v34, %v5233_v63 }
 0x51a   : > { %v8846_v28 = vsub.f32 %v2582_v14, %v2838_v27 }
 0x51c   : > { %2731 = vadd.xlane.f32.xlu1 %v2730_v54  ;;  %v2966_v58 = vmul.f32 %v8846_v28, %v8846_v28  ;;  %v3083_v54 = vpop.xlane.xlu1 %3082 }
 0x51d   : > { %v4336_v14 = vpop.f32.mrf.mxu2  ;;  %2728 = vadd.xlane.f32.xlu0 %v2727_v41  ;;  %v3214_v41 = vmul.f32 %v3122_v26, %v5233_v63 }
 0x51e   : > { %v4337_v60 = vadd.f32 %v4336_v14, %v8120_v39  ;;  %v3144_v0 = vsel %vm665_vm1, %v2966_v58, 0.0  ;;  %v3201_v58 = vmul.f32 %v3083_v54, %v5233_v63 }
 0x51f   : > { %3145 = vadd.xlane.f32.xlu2 %v3144_v0  ;;  %v2720_v49 = vpop.xlane.xlu0 %2719  ;;  %v3278_v14 = vadd.f32 1e-05, %v3214_v41 }
 0x520   : > { %4464 = vst.msk [vmem:[%s8130_s21 + $0xb0] sm:$0xff] %vm4441_vm10, %v4337_v60  ;;  %v2824_v5 = vmul.f32 %v2720_v49, %v5233_v63  ;;  %v3265_v49 = vadd.f32 1e-05, %v3201_v58 }
 0x521   : > { %4910 = vrsqrt.f32 %v3278_v14  ;;  %vm3789_vm12 = vweird.f32 %v3278_v14 }
 0x522   : > { %v8881_v1 = vsub.f32 %v2568_v46, %v2824_v5  ;;  %4912 = vrsqrt.f32 %v3265_v49  ;;  %vm3659_vm15 = vweird.f32 %v3265_v49 }
 0x524   : > { %3142 = vadd.xlane.f32.xlu1 %v3141_v16  ;;  %v2952_v34 = vmul.f32 %v8881_v1, %v8881_v1 }
 0x525   : > { %v4338_v61 = vpop.f32.mrf.mxu2  ;;  %2779 = vadd.xlane.f32.xlu0 %v2778_v48 }
 0x526   : > { %v4339_v43 = vadd.f32 %v4338_v61, %v8120_v39  ;;  %v3102_v27 = vsel %vm665_vm1, %v2952_v34, 0.0 }
 0x527   : > { %2776 = vadd.xlane.f32.xlu2 %v2775_v18  ;;  %v4911_v5 = vpop.eup %4910 }
 0x528   : > { %4465 = vst.msk [vmem:[%s8130_s21 + $0xb8] sm:$0xff] %vm4441_vm10, %v4339_v43  ;;  %v4913_v26 = vpop.eup %4912  ;;  %v3784_v48 = vmul.f32 %v4911_v5, %v3278_v14  ;;  %vm3790_vm11 = vweird.f32 %v4911_v5 }
 0x529   : > { %v3654_v61 = vmul.f32 %v4913_v26, %v3265_v49  ;;  %vm3660_vm13 = vweird.f32 %v4913_v26  ;;  %vm8920_vm14 = vmor %vm3789_vm12, %vm3790_vm11 }
 0x52a   : > { %v3785_v43 = vmul.f32 %v4911_v5, %v3784_v48  ;;  %vm8929_vm0 = vmor %vm3659_vm15, %vm3660_vm13 }
 0x52f   : > { %v4341_v8 = vpop.f32.mrf.mxu2  ;;  %3103 = vadd.xlane.f32.xlu2 %v3102_v27 }
 0x530   : > { %v4342_v19 = vadd.f32 %v4341_v8, %v8120_v39 }
 0x532   : > { %4466 = vst.msk [vmem:[%s8130_s21 + $0xc0] sm:$0xff] %vm4441_vm10, %v4342_v19  ;;  %v3655_v19 = vmul.f32 %v4913_v26, %v3654_v61 }
 0x534   : > { %v3656_v54 = vmul.f32 0.5, %v3655_v19 }
 0x537   : > { %v4343_v46 = vpop.f32.mrf.mxu2 }
 0x538   : > { %v4344_v30 = vadd.f32 %v4343_v46, %v8120_v39 }
 0x53a   : > { %4467 = vst.msk [vmem:[%s8130_s21 + $0xc8] sm:$0xff] %vm4441_vm10, %v4344_v30  ;;  %v3786_v30 = vmul.f32 0.5, %v3785_v43 }
 0x53c   : > { %v3787_v41 = vsub.f32 1.5, %v3786_v30 }
 0x53f   : > { %v4346_v60 = vpop.f32.mrf.mxu2 }
 0x540   : > { %v4347_v0 = vadd.f32 %v4346_v60, %v8120_v39 }
 0x542   : > { %4468 = vst.msk [vmem:[%s8130_s21 + $0xd0] sm:$0xff] %vm4441_vm10, %v4347_v0 }
 0x547   : > { %v4348_v10 = vpop.f32.mrf.mxu2 }
 0x548   : > { %v4349_v16 = vadd.f32 %v4348_v10, %v8120_v39 }
 0x54a   : > { %4469 = vst.msk [vmem:[%s8130_s21 + $0xd8] sm:$0xff] %vm4441_vm10, %v4349_v16 }
 0x54f   : > { %v4351_v18 = vpop.f32.mrf.mxu2  ;;  %v3119_v34 = vpop.xlane.xlu2 %3118 }
 0x550   : > { %v4352_v27 = vadd.f32 %v4351_v18, %v8120_v39  ;;  %v3213_v8 = vmul.f32 %v3119_v34, %v5233_v63  ;;  %v3657_v34 = vsub.f32 1.5, %v3656_v54 }
 0x552   : > { %4470 = vst.msk [vmem:[%s8130_s21 + $0xe0] sm:$0xff] %vm4441_vm10, %v4352_v27  ;;  %v3277_v46 = vadd.f32 1e-05, %v3213_v8  ;;  %v3788_v27 = vmul.f32 %v4911_v5, %v3787_v41  ;;  %v3658_v30 = vmul.f32 %v4913_v26, %v3657_v34 }
 0x554   : > { %4914 = vrsqrt.f32 %v3277_v46  ;;  %v3792_v54 = vsel %vm8920_vm14, %v4911_v5, %v3788_v27  ;;  %v3662_v5 = vsel %vm8929_vm0, %v4913_v26, %v3658_v30  ;;  %vm3779_vm3 = vweird.f32 %v3277_v46 }
 0x555   : > { %v3982_v27 = vmul.f32 %v3792_v54, %v8530_v37 }
 0x557   : > { %v4353_v58 = vpop.f32.mrf.mxu2  ;;  %v3086_v60 = vpop.xlane.xlu2 %3085  ;;  %v4047_v37 = vmul.f32 %v7458_v6, %v3982_v27 }
 0x558   : > { %v4354_v0 = vadd.f32 %v4353_v58, %v8120_v39  ;;  %v3202_v10 = vmul.f32 %v3086_v60, %v5233_v63  ;;  %v3089_v16 = vpop.xlane.xlu0 %3088 }
 0x559   : > { %v3203_v48 = vmul.f32 %v3089_v16, %v5233_v63 }
 0x55a   : > { %v4915_v18 = vpop.eup %4914  ;;  %4471 = vst.msk [vmem:[%s8130_s21 + $0xe8] sm:$0xff] %vm4441_vm10, %v4354_v0  ;;  %v8915_v61 = vadd.f32 1e-05, %v3202_v10 }
 0x55b   : > { %v3774_v43 = vmul.f32 %v4915_v18, %v3277_v46  ;;  %v8917_v8 = vadd.f32 1e-05, %v3203_v48  ;;  %vm3780_vm2 = vweird.f32 %v4915_v18 }
 0x55c   : > { %4916 = vrsqrt.f32 %v8915_v61  ;;  %vm3781_vm4 = vmor %vm3779_vm3, %vm3780_vm2  ;;  %vm3669_vm6 = vweird.f32 %v8915_v61 }
 0x55d   : > { %v3775_v19 = vmul.f32 %v4915_v18, %v3774_v43  ;;  %4918 = vrsqrt.f32 %v8917_v8  ;;  %vm3679_vm0 = vweird.f32 %v8917_v8 }
 0x55f   : > { %v3776_v41 = vmul.f32 0.5, %v3775_v19  ;;  %v4356_v60 = vpop.f32.mrf.mxu2  ;;  %v3125_v0 = vpop.xlane.xlu1 %3124 }
 0x560   : > { %v4357_v10 = vadd.f32 %v4356_v60, %v8120_v39  ;;  %v3215_v14 = vmul.f32 %v3125_v0, %v5233_v63  ;;  %v3128_v16 = vpop.xlane.xlu2 %3127 }
 0x561   : > { %v3777_v34 = vsub.f32 1.5, %v3776_v41  ;;  %v3216_v43 = vmul.f32 %v3128_v16, %v5233_v63  ;;  %v3969_v16 = vmul.f32 %v3662_v5, %v8489_v7 }
 0x562   : > { %v4917_v58 = vpop.eup %4916  ;;  %4472 = vst.msk [vmem:[%s8130_s21 + $0xf0] sm:$0xff] %vm4441_vm10, %v4357_v10  ;;  %v8939_v49 = vadd.f32 1e-05, %v3215_v14 }
 0x563   : > { %v3778_v19 = vmul.f32 %v4915_v18, %v3777_v34  ;;  %v3664_v60 = vmul.f32 %v4917_v58, %v8915_v61  ;;  %v8942_v0 = vadd.f32 1e-05, %v3216_v43  ;;  %v8944_v41 = vpop.eup %4918  ;;  %vm3670_vm5 = vweird.f32 %v4917_v58 }
 0x564   : > { %4920 = vrsqrt.f32 %v8939_v49  ;;  %v3674_v10 = vmul.f32 %v8944_v41, %v8917_v8  ;;  %vm3671_vm7 = vmor %vm3669_vm6, %vm3670_vm5  ;;  %vm3799_vm11 = vweird.f32 %v8939_v49  ;;  %vm3680_vm15 = vweird.f32 %v8944_v41 }
 0x565   : > { %v3782_v26 = vsel %vm3781_vm4, %v4915_v18, %v3778_v19  ;;  %v3665_v30 = vmul.f32 %v4917_v58, %v3664_v60  ;;  %4922 = vrsqrt.f32 %v8942_v0  ;;  %v4112_v60 = vadd.f32 %v7487_v31, %v4047_v37  ;;  %vm9038_vm2 = vmor %vm3679_vm0, %vm3680_vm15 }
 0x566   : > { %v3981_v54 = vmul.f32 %v3782_v26, %v8657_v56  ;;  %v4034_v56 = vmul.f32 %v7458_v6, %v3969_v16  ;;  %vm3809_vm13 = vweird.f32 %v8942_v0 }
 0x567   : > { %v3666_v46 = vmul.f32 0.5, %v3665_v30  ;;  %v4358_v14 = vpop.f32.mrf.mxu2  ;;  %v2765_v48 = vpop.xlane.xlu1 %2764 }
 0x568   : > { %v4046_v34 = vmul.f32 %v7458_v6, %v3981_v54  ;;  %v4359_v43 = vadd.f32 %v4358_v14, %v8120_v39  ;;  %v2839_v7 = vmul.f32 %v2765_v48, %v5233_v63  ;;  %v2717_v18 = vpop.xlane.xlu2 %2716  ;;  %v3675_v14 = vmul.f32 %v8944_v41, %v3674_v10 }
 0x569   : > { %v3667_v5 = vsub.f32 1.5, %v3666_v46  ;;  %v2823_v27 = vmul.f32 %v2717_v18, %v5233_v63  ;;  %v4099_v62 = vadd.f32 %v7487_v31, %v4034_v56 }
 0x56a   : > { %v4921_v19 = vpop.eup %4920  ;;  %v4111_v26 = vadd.f32 %v7487_v31, %v4046_v34  ;;  %4473 = vst.msk [vmem:[%s8130_s21 + $0xf8] sm:$0xff] %vm4441_vm10, %v4359_v43  ;;  %v8965_v30 = vsub.f32 %v2583_v2, %v2839_v7 }
 0x56b   : > { %v4923_v54 = vpop.eup %4922  ;;  %v3668_v46 = vmul.f32 %v4917_v58, %v3667_v5  ;;  %v3794_v48 = vmul.f32 %v4921_v19, %v8939_v49  ;;  %v8971_v16 = vsub.f32 %v2567_v11, %v2823_v27  ;;  %v3676_v11 = vmul.f32 0.5, %v3675_v14 }
 0x56c   : > { %v4151_v37 = vpack.c.bf16 %v4112_v60, %v4111_v26  ;;  %v3804_v61 = vmul.f32 %v4923_v54, %v8942_v0  ;;  %v2967_v50 = vmul.f32 %v8965_v30, %v8965_v30  ;;  %vm3800_vm8 = vweird.f32 %v4921_v19 }
 0x56d   : > { %v3672_v34 = vsel %vm3671_vm7, %v4917_v58, %v3668_v46  ;;  %v3795_v43 = vmul.f32 %v4921_v19, %v3794_v48  ;;  %v2951_v2 = vmul.f32 %v8971_v16, %v8971_v16  ;;  %vm3810_vm9 = vweird.f32 %v4923_v54  ;;  %vm3801_vm12 = vmor %vm3799_vm11, %vm3800_vm8 }
 0x56e   : > { %v3970_v10 = vmul.f32 %v3672_v34, %v8669_v57  ;;  %v3805_v7 = vmul.f32 %v4923_v54, %v3804_v61  ;;  %4679 = vmatmul.msk.bf16.vlgmr.msra.gmra.mxu3 %vm665_vm1, %v4151_v37  ;;  %v3147_v58 = vsel %vm665_vm1, %v2967_v50, 0.0  ;;  %vm3811_vm14 = vmor %vm3809_vm13, %vm3810_vm9 }
 0x56f   : > { %v3796_v18 = vmul.f32 0.5, %v3795_v43  ;;  %v4361_v5 = vpop.f32.mrf.mxu2  ;;  %v3092_v27 = vpop.xlane.xlu1 %3091  ;;  %v3099_v60 = vsel %vm665_vm1, %v2951_v2, 0.0  ;;  %3148 = vadd.xlane.f32.xlu0 %v3147_v58 }
 0x570   : > { %v3806_v26 = vmul.f32 0.5, %v3805_v7  ;;  %v4362_v46 = vadd.f32 %v4361_v5, %v8120_v39  ;;  %v3204_v48 = vmul.f32 %v3092_v27, %v5233_v63  ;;  %3100 = vadd.xlane.f32.xlu1 %v3099_v60  ;;  %v2768_v57 = vpop.xlane.xlu2 %2767  ;;  %v3131_v37 = vpop.xlane.xlu0 %3130  ;;  %v4035_v56 = vmul.f32 %v7458_v6, %v3970_v10 }
 0x571   : > { %v3797_v14 = vsub.f32 1.5, %v3796_v18  ;;  %v2840_v61 = vmul.f32 %v2768_v57, %v5233_v63  ;;  %v3217_v34 = vmul.f32 %v3131_v37, %v5233_v63  ;;  %v3677_v60 = vsub.f32 1.5, %v3676_v11 }
 0x572   : > { %v3807_v43 = vsub.f32 1.5, %v3806_v26  ;;  %4474 = vst.msk [vmem:[%s8130_s21 + $0x100] sm:$0xff] %vm4441_vm10, %v4362_v46  ;;  %v8991_v50 = vadd.f32 1e-05, %v3204_v48  ;;  %v4100_v2 = vadd.f32 %v7487_v31, %v4035_v56 }
 0x573   : > { %v3798_v7 = vmul.f32 %v4921_v19, %v3797_v14  ;;  %v8997_v10 = vsub.f32 %v2584_v59, %v2840_v61  ;;  %v8999_v18 = vadd.f32 1e-05, %v3217_v34  ;;  %v3678_v14 = vmul.f32 %v8944_v41, %v3677_v60 }
 0x574   : > { %v3808_v5 = vmul.f32 %v4923_v54, %v3807_v43  ;;  %4924 = vrsqrt.f32 %v8991_v50  ;;  %v4145_v27 = vpack.c.bf16 %v4100_v2, %v4099_v62  ;;  %vm3689_vm5 = vweird.f32 %v8991_v50 }
 0x575   : > { %v3802_v58 = vsel %vm3801_vm12, %v4921_v19, %v3798_v7  ;;  %4926 = vrsqrt.f32 %v8999_v18  ;;  %v2968_v49 = vmul.f32 %v8997_v10, %v8997_v10  ;;  %v3682_v8 = vsel %vm9038_vm2, %v8944_v41, %v3678_v14 }
 0x576   : > { %v3983_v51 = vmul.f32 %v3802_v58, %v8698_v47  ;;  %v3812_v59 = vsel %vm3811_vm14, %v4923_v54, %v3808_v5  ;;  %4673 = vmatmul.msk.bf16.gmra.mxu2 %vm665_vm1, %v4145_v27  ;;  %vm3819_vm7 = vweird.f32 %v8999_v18 }
 0x577   : > { %v3984_v26 = vmul.f32 %v3812_v59, %v8692_v24  ;;  %v4363_v0 = vpop.f32.mrf.mxu2  ;;  %v3134_v46 = vpop.xlane.xlu1 %3133  ;;  %v3150_v62 = vsel %vm665_vm1, %v2968_v49, 0.0 }
 0x578   : > { %v4364_v19 = vadd.f32 %v4363_v0, %v8120_v39  ;;  %v3218_v48 = vmul.f32 %v3134_v46, %v5233_v63  ;;  %3151 = vadd.xlane.f32.xlu1 %v3150_v62  ;;  %v2726_v57 = vpop.xlane.xlu2 %2725  ;;  %v2771_v37 = vpop.xlane.xlu0 %2770  ;;  %v4048_v11 = vmul.f32 %v7458_v6, %v3983_v51 }
 0x579   : > { %v2826_v47 = vmul.f32 %v2726_v57, %v5233_v63  ;;  %v2841_v54 = vmul.f32 %v2771_v37, %v5233_v63  ;;  %v4049_v24 = vmul.f32 %v7458_v6, %v3984_v26 }
 0x57a   : > { %v4925_v56 = vpop.eup %4924  ;;  %4475 = vst.msk [vmem:[%s8130_s21 + $0x108] sm:$0xff] %vm4441_vm10, %v4364_v19  ;;  %v9020_v61 = vadd.f32 1e-05, %v3218_v48  ;;  %v4113_v5 = vadd.f32 %v7487_v31, %v4048_v11 }
 0x57b   : > { %v9022_v34 = vpop.eup %4926  ;;  %v3684_v43 = vmul.f32 %v4925_v56, %v8991_v50  ;;  %v9027_v2 = vsub.f32 %v2570_v21, %v2826_v47  ;;  %v9031_v7 = vsub.f32 %v2585_v42, %v2841_v54  ;;  %v4114_v21 = vadd.f32 %v7487_v31, %v4049_v24 }
 0x57c   : > { %v3814_v27 = vmul.f32 %v9022_v34, %v8999_v18  ;;  %4928 = vrsqrt.f32 %v9020_v61  ;;  %vm3690_vm3 = vweird.f32 %v4925_v56  ;;  %v3971_v24 = vmul.f32 %v3682_v8, %v8679_v15 }
 0x57d   : > { %v3685_v13 = vmul.f32 %v4925_v56, %v3684_v43  ;;  %v2954_v55 = vmul.f32 %v9027_v2, %v9027_v2  ;;  %v2969_v42 = vmul.f32 %v9031_v7, %v9031_v7  ;;  %v4152_v59 = vpack.c.bf16 %v4114_v21, %v4113_v5  ;;  %vm3691_vm6 = vmor %vm3689_vm5, %vm3690_vm3 }
 0x57e   : > { %v3815_v49 = vmul.f32 %v9022_v34, %v3814_v27  ;;  %vm3820_vm4 = vweird.f32 %v9022_v34  ;;  %v4036_v18 = vmul.f32 %v7458_v6, %v3971_v24  ;;  %vm3829_vm11 = vweird.f32 %v9020_v61 }
 0x57f   : > { %v3686_v60 = vmul.f32 0.5, %v3685_v13  ;;  %v4366_v51 = vpop.f32.mrf.mxu2  ;;  %v2723_v26 = vpop.xlane.xlu1 %2722  ;;  %v3108_v0 = vsel %vm665_vm1, %v2954_v55, 0.0  ;;  %v3153_v46 = vsel %vm665_vm1, %v2969_v42, 0.0  ;;  %4680 = vmatmul.msk.bf16.gmra.mxu3 %vm665_vm1, %v4152_v59  ;;  %vm9076_vm8 = vmor %vm3819_vm7, %vm3820_vm4 }
 0x580   : > { %v3816_v62 = vmul.f32 0.5, %v3815_v49  ;;  %v4367_v19 = vadd.f32 %v4366_v51, %v8120_v39  ;;  %v2825_v48 = vmul.f32 %v2723_v26, %v5233_v63  ;;  %3109 = vadd.xlane.f32.xlu0 %v3108_v0  ;;  %v3137_v57 = vpop.xlane.xlu2 %3136  ;;  %3154 = vadd.xlane.f32.xlu1 %v3153_v46  ;;  %v3140_v41 = vpop.xlane.xlu0 %3139 }
 0x581   : > { %v3687_v37 = vsub.f32 1.5, %v3686_v60  ;;  %v3219_v11 = vmul.f32 %v3137_v57, %v5233_v63  ;;  %v3220_v47 = vmul.f32 %v3140_v41, %v5233_v63  ;;  %v4101_v57 = vadd.f32 %v7487_v31, %v4036_v18 }
 0x582   : > { %v4929_v54 = vpop.eup %4928  ;;  %v3817_v14 = vsub.f32 1.5, %v3816_v62  ;;  %4476 = vst.msk [vmem:[%s8130_s21 + $0x110] sm:$0xff] %vm4441_vm10, %v4367_v19  ;;  %v9064_v43 = vsub.f32 %v2569_v38, %v2825_v48 }
 0x583   : > { %v3688_v5 = vmul.f32 %v4925_v56, %v3687_v37  ;;  %v3824_v27 = vmul.f32 %v4929_v54, %v9020_v61  ;;  %v9068_v58 = vadd.f32 1e-05, %v3219_v11  ;;  %v9072_v15 = vadd.f32 1e-05, %v3220_v47 }
 0x584   : > { %v3818_v13 = vmul.f32 %v9022_v34, %v3817_v14  ;;  %v2953_v21 = vmul.f32 %v9064_v43, %v9064_v43  ;;  %vm3830_vm9 = vweird.f32 %v4929_v54 }
 0x585   : > { %v3692_v35 = vsel %vm3691_vm6, %v4925_v56, %v3688_v5  ;;  %v3825_v50 = vmul.f32 %v4929_v54, %v3824_v27  ;;  %4930 = vrsqrt.f32 %v9068_v58  ;;  %vm3831_vm12 = vmor %vm3829_vm11, %vm3830_vm9  ;;  %vm3839_vm15 = vweird.f32 %v9068_v58 }
 0x586   : > { %v3972_v55 = vmul.f32 %v3692_v35, %v8729_v3  ;;  %v3822_v42 = vsel %vm9076_vm8, %v9022_v34, %v3818_v13  ;;  %4932 = vrsqrt.f32 %v9072_v15  ;;  %v3105_v60 = vsel %vm665_vm1, %v2953_v21, 0.0 }
 0x587   : > { %v3826_v8 = vmul.f32 0.5, %v3825_v50  ;;  %v4368_v56 = vpop.f32.mrf.mxu2  ;;  %v2774_v49 = vpop.xlane.xlu1 %2773  ;;  %3106 = vadd.xlane.f32.xlu2 %v3105_v60  ;;  %v3985_v0 = vmul.f32 %v3822_v42, %v8746_v17  ;;  %vm3849_vm2 = vweird.f32 %v9072_v15 }
 0x588   : > { %v4369_v51 = vadd.f32 %v4368_v56, %v8120_v39  ;;  %v2842_v59 = vmul.f32 %v2774_v49, %v5233_v63  ;;  %v3095_v3 = vpop.xlane.xlu2 %3094  ;;  %v3098_v26 = vpop.xlane.xlu0 %3097  ;;  %v4037_v34 = vmul.f32 %v7458_v6, %v3972_v55 }
 0x589   : > { %v3827_v46 = vsub.f32 1.5, %v3826_v8  ;;  %v3205_v62 = vmul.f32 %v3095_v3, %v5233_v63  ;;  %v3206_v19 = vmul.f32 %v3098_v26, %v5233_v63  ;;  %v4050_v61 = vmul.f32 %v7458_v6, %v3985_v0 }
 0x58a   : > { %4477 = vst.msk [vmem:[%s8130_s21 + $0x118] sm:$0xff] %vm4441_vm10, %v4369_v51  ;;  %v9098_v48 = vsub.f32 %v2586_v22, %v2842_v59  ;;  %v4102_v41 = vadd.f32 %v7487_v31, %v4037_v34 }
 0x58b   : > { %v4931_v37 = vpop.eup %4930  ;;  %v3828_v11 = vmul.f32 %v4929_v54, %v3827_v46  ;;  %v9103_v17 = vadd.f32 1e-05, %v3205_v62  ;;  %v9105_v47 = vadd.f32 1e-05, %v3206_v19 }
 0x58c   : > { %v4933_v24 = vpop.eup %4932  ;;  %v3834_v14 = vmul.f32 %v4931_v37, %v9068_v58  ;;  %v4146_v53 = vpack.c.bf16 %v4102_v41, %v4101_v57  ;;  %v2970_v22 = vmul.f32 %v9098_v48, %v9098_v48  ;;  %vm3840_vm13 = vweird.f32 %v4931_v37 }
 0x58d   : > { %v3832_v5 = vsel %vm3831_vm12, %v4929_v54, %v3828_v11  ;;  %v3844_v27 = vmul.f32 %v4933_v24, %v9072_v15  ;;  %4934 = vrsqrt.f32 %v9103_v17  ;;  %vm3850_vm14 = vweird.f32 %v4933_v24  ;;  %vm3841_vm0 = vmor %vm3839_vm15, %vm3840_vm13 }
 0x58e   : > { %v3986_v13 = vmul.f32 %v3832_v5, %v8756_v12  ;;  %v3835_v21 = vmul.f32 %v4931_v37, %v3834_v14  ;;  %4936 = vrsqrt.f32 %v9105_v47  ;;  %4674 = vmatmul.msk.bf16.gmra.mxu2 %vm665_vm1, %v4146_v53  ;;  %v3156_v50 = vsel %vm665_vm1, %v2970_v22, 0.0  ;;  %vm3851_vm3 = vmor %vm3849_vm2, %vm3850_vm14 }
 0x58f   : > { %v3845_v35 = vmul.f32 %v4933_v24, %v3844_v27  ;;  %v2732_v38 = vpop.xlane.xlu1 %2731  ;;  %3157 = vadd.xlane.f32.xlu2 %v3156_v50  ;;  %v4115_v12 = vadd.f32 %v7487_v31, %v4050_v61  ;;  %vm3699_vm4 = vweird.f32 %v9103_v17  ;;  %vm3709_vm8 = vweird.f32 %v9105_v47 }
 0x590   : > { %v3836_v55 = vmul.f32 0.5, %v3835_v21  ;;  %v2828_v54 = vmul.f32 %v2732_v38, %v5233_v63  ;;  %v2729_v42 = vpop.xlane.xlu0 %2728  ;;  %v4051_v18 = vmul.f32 %v7458_v6, %v3986_v13 }
 0x591   : > { %v3846_v8 = vmul.f32 0.5, %v3845_v35  ;;  %v2827_v56 = vmul.f32 %v2729_v42, %v5233_v63 }
 0x592   : > { %v3837_v49 = vsub.f32 1.5, %v3836_v55  ;;  %v9124_v60 = vsub.f32 %v2572_v4, %v2828_v54  ;;  %v3146_v51 = vpop.xlane.xlu2 %3145  ;;  %v4116_v59 = vadd.f32 %v7487_v31, %v4051_v18 }
 0x593   : > { %v4935_v3 = vpop.eup %4934  ;;  %v3847_v26 = vsub.f32 1.5, %v3846_v8  ;;  %v3222_v34 = vmul.f32 %v3146_v51, %v5233_v63  ;;  %v9130_v0 = vsub.f32 %v2571_v40, %v2827_v56 }
 0x594   : > { %v4937_v46 = vpop.eup %4936  ;;  %v3838_v62 = vmul.f32 %v4931_v37, %v3837_v49  ;;  %v3694_v25 = vmul.f32 %v4935_v3, %v9103_v17  ;;  %v4153_v4 = vpack.c.bf16 %v4116_v59, %v4115_v12  ;;  %v2956_v40 = vmul.f32 %v9124_v60, %v9124_v60 }
 0x595   : > { %v3848_v19 = vmul.f32 %v4933_v24, %v3847_v26  ;;  %v3704_v57 = vmul.f32 %v4937_v46, %v9105_v47  ;;  %v9136_v41 = vadd.f32 1e-05, %v3222_v34  ;;  %v2955_v58 = vmul.f32 %v9130_v0, %v9130_v0 }
 0x596   : > { %v3842_v11 = vsel %vm3841_vm0, %v4931_v37, %v3838_v62  ;;  %v3695_v33 = vmul.f32 %v4935_v3, %v3694_v25  ;;  %4681 = vmatmul.msk.bf16.gmra.mxu3 %vm665_vm1, %v4153_v4  ;;  %v3114_v21 = vsel %vm665_vm1, %v2956_v40, 0.0  ;;  %vm3700_vm5 = vweird.f32 %v4935_v3 }
 0x597   : > { %v3852_v14 = vsel %vm3851_vm3, %v4933_v24, %v3848_v19  ;;  %v3705_v53 = vmul.f32 %v4937_v46, %v3704_v57  ;;  %4938 = vrsqrt.f32 %v9136_v41  ;;  %v3143_v15 = vpop.xlane.xlu1 %3142  ;;  %v3987_v22 = vmul.f32 %v3842_v11, %v8782_v9  ;;  %3115 = vadd.xlane.f32.xlu1 %v3114_v21  ;;  %vm3701_vm7 = vmor %vm3699_vm4, %vm3700_vm5 }
 0x598   : > { %v3988_v5 = vmul.f32 %v3852_v14, %v8786_v45  ;;  %v3696_v37 = vmul.f32 0.5, %v3695_v33  ;;  %v3221_v27 = vmul.f32 %v3143_v15, %v5233_v63  ;;  %v2780_v61 = vpop.xlane.xlu0 %2779  ;;  %v3111_v35 = vsel %vm665_vm1, %v2955_v58, 0.0 }
 0x599   : > { %v3706_v13 = vmul.f32 0.5, %v3705_v53  ;;  %v2844_v38 = vmul.f32 %v2780_v61, %v5233_v63  ;;  %3112 = vadd.xlane.f32.xlu0 %v3111_v35  ;;  %vm3710_vm6 = vweird.f32 %v4937_v46  ;;  %v4052_v18 = vmul.f32 %v7458_v6, %v3987_v22 }
 0x59a   : > { %v3697_v24 = vsub.f32 1.5, %v3696_v37  ;;  %v3285_v50 = vadd.f32 1e-05, %v3221_v27  ;;  %v2777_v55 = vpop.xlane.xlu2 %2776  ;;  %v4053_v8 = vmul.f32 %v7458_v6, %v3988_v5  ;;  %vm3711_vm9 = vmor %vm3709_vm8, %vm3710_vm6  ;;  %vm3869_vm12 = vweird.f32 %v9136_v41 }
 0x59b   : > { %v3707_v9 = vsub.f32 1.5, %v3706_v13  ;;  %v2843_v45 = vmul.f32 %v2777_v55, %v5233_v63  ;;  %v9154_v54 = vsub.f32 %v2588_v32, %v2844_v38 }
 0x59c   : > { %v3698_v42 = vmul.f32 %v4935_v3, %v3697_v24  ;;  %4940 = vrsqrt.f32 %v3285_v50  ;;  %v4118_v62 = vadd.f32 %v7487_v31, %v4053_v8  ;;  %vm3859_vm15 = vweird.f32 %v3285_v50 }
 0x59d   : > { %v4939_v56 = vpop.eup %4938  ;;  %v3708_v12 = vmul.f32 %v4937_v46, %v3707_v9  ;;  %v9163_v49 = vsub.f32 %v2587_v52, %v2843_v45  ;;  %v2972_v36 = vmul.f32 %v9154_v54, %v9154_v54  ;;  %v4117_v52 = vadd.f32 %v7487_v31, %v4052_v18 }
 0x59e   : > { %v3702_v32 = vsel %vm3701_vm7, %v4935_v3, %v3698_v42  ;;  %v3864_v51 = vmul.f32 %v4939_v56, %v9136_v41  ;;  %vm3870_vm11 = vweird.f32 %v4939_v56 }
 0x59f   : > { %v3973_v59 = vmul.f32 %v3702_v32, %v8810_v44  ;;  %v3712_v26 = vsel %vm3711_vm9, %v4937_v46, %v3708_v12  ;;  %v2971_v17 = vmul.f32 %v9163_v49, %v9163_v49  ;;  %v3162_v34 = vsel %vm665_vm1, %v2972_v36, 0.0  ;;  %vm3871_vm13 = vmor %vm3869_vm12, %vm3870_vm11 }
 0x5a0   : > { %v3974_v47 = vmul.f32 %v3712_v26, %v8814_v23  ;;  %v3865_v20 = vmul.f32 %v4939_v56, %v3864_v51  ;;  %v4154_v33 = vpack.c.bf16 %v4118_v62, %v4117_v52 }
 0x5a1   : > { %v3159_v3 = vsel %vm665_vm1, %v2971_v17, 0.0  ;;  %v4038_v25 = vmul.f32 %v7458_v6, %v3973_v59  ;;  %3163 = vadd.xlane.f32.xlu0 %v3162_v34 }
 0x5a2   : > { %v4941_v4 = vpop.eup %4940  ;;  %v3866_v19 = vmul.f32 0.5, %v3865_v20  ;;  %3160 = vadd.xlane.f32.xlu2 %v3159_v3  ;;  %v4039_v44 = vmul.f32 %v7458_v6, %v3974_v47  ;;  %v3104_v24 = vpop.xlane.xlu2 %3103 }
 0x5a3   : > { %v3854_v46 = vmul.f32 %v4941_v4, %v3285_v50  ;;  %v4103_v57 = vadd.f32 %v7487_v31, %v4038_v25  ;;  %vm3860_vm14 = vweird.f32 %v4941_v4 }
 0x5a4   : > { %v3867_v11 = vsub.f32 1.5, %v3866_v19  ;;  %v4104_v23 = vadd.f32 %v7487_v31, %v4039_v44  ;;  %vm3861_vm0 = vmor %vm3859_vm15, %vm3860_vm14 }
 0x5a5   : > { %v3855_v40 = vmul.f32 %v4941_v4, %v3854_v46 }
 0x5a6   : > { %v3868_v58 = vmul.f32 %v4939_v56, %v3867_v11  ;;  %v4147_v14 = vpack.c.bf16 %v4104_v23, %v4103_v57  ;;  %4682 = vmatmul.msk.bf16.gmra.mxu3 %vm665_vm1, %v4154_v33 }
 0x5a7   : > { %v3856_v53 = vmul.f32 0.5, %v3855_v40 }
 0x5a8   : > { %v3872_v15 = vsel %vm3871_vm13, %v4939_v56, %v3868_v58  ;;  %4675 = vmatmul.msk.bf16.gmra.mxu2 %vm665_vm1, %v4147_v14 }
 0x5a9   : > { %v3857_v22 = vsub.f32 1.5, %v3856_v53  ;;  %v3990_v5 = vmul.f32 %v3872_v15, %v8846_v28  ;;  %v3208_v28 = vmul.f32 %v3104_v24, %v5233_v63 }
 0x5ab   : > { %v3858_v37 = vmul.f32 %v4941_v4, %v3857_v22  ;;  %v4055_v41 = vmul.f32 %v7458_v6, %v3990_v5  ;;  %v3272_v55 = vadd.f32 1e-05, %v3208_v28 }
 0x5ad   : > { %v3862_v27 = vsel %vm3861_vm0, %v4941_v4, %v3858_v37  ;;  %v4120_v35 = vadd.f32 %v7487_v31, %v4055_v41  ;;  %4942 = vrsqrt.f32 %v3272_v55  ;;  %vm3729_vm3 = vweird.f32 %v3272_v55 }
 0x5ae   : > { %v3989_v61 = vmul.f32 %v3862_v27, %v8850_v29 }
 0x5b0   : > { %v4054_v13 = vmul.f32 %v7458_v6, %v3989_v61 }
 0x5b2   : > { %v4119_v21 = vadd.f32 %v7487_v31, %v4054_v13 }
 0x5b3   : > { %v4943_v50 = vpop.eup %4942 }
 0x5b4   : > { %v4155_v38 = vpack.c.bf16 %v4120_v35, %v4119_v21  ;;  %v3724_v9 = vmul.f32 %v4943_v50, %v3272_v55  ;;  %vm3730_vm2 = vweird.f32 %v4943_v50 }
 0x5b5   : > { %vm9198_vm4 = vmor %vm3729_vm3, %vm3730_vm2 }
 0x5b6   : > { %4683 = vmatmul.msk.bf16.gmra.mxu3 %vm665_vm1, %v4155_v38  ;;  %v3725_v42 = vmul.f32 %v4943_v50, %v3724_v9 }
 0x5b8   : > { %v3726_v36 = vmul.f32 0.5, %v3725_v42 }
 0x5ba   : > { %v3727_v51 = vsub.f32 1.5, %v3726_v36 }
 0x5bc   : > { %v3728_v20 = vmul.f32 %v4943_v50, %v3727_v51 }
 0x5be   : > { %v3732_v11 = vsel %vm9198_vm4, %v4943_v50, %v3728_v20 }
 0x5bf   : > { %v3976_v5 = vmul.f32 %v3732_v11, %v8881_v1 }
 0x5c1   : > { %v4041_v9 = vmul.f32 %v7458_v6, %v3976_v5 }
 0x5c3   : > { %v4106_v51 = vadd.f32 %v7487_v31, %v4041_v9 }
 0x5e2   : > { %v3149_v29 = vpop.xlane.xlu0 %3148 }
 0x5e3   : > { %v3101_v45 = vpop.xlane.xlu1 %3100  ;;  %v3223_v8 = vmul.f32 %v3149_v29, %v5233_v63 }
 0x5e4   : > { %v3207_v18 = vmul.f32 %v3101_v45, %v5233_v63 }
 0x5e5   : > { %v3287_v12 = vadd.f32 1e-05, %v3223_v8 }
 0x5e6   : > { %v3271_v56 = vadd.f32 1e-05, %v3207_v18 }
 0x5e7   : > { %vm3879_vm9 = vweird.f32 %v3287_v12 }
 0x5e8   : > { %4944 = vrsqrt.f32 %v3271_v56  ;;  %vm3719_vm7 = vweird.f32 %v3271_v56 }
 0x5e9   : > { %4946 = vrsqrt.f32 %v3287_v12 }
 0x5eb   : > { %v3152_v32 = vpop.xlane.xlu1 %3151 }
 0x5ec   : > { %v3224_v59 = vmul.f32 %v3152_v32, %v5233_v63 }
 0x5ee   : > { %v4945_v26 = vpop.eup %4944  ;;  %v9194_v17 = vadd.f32 1e-05, %v3224_v59 }
 0x5ef   : > { %v4947_v34 = vpop.eup %4946  ;;  %v3714_v47 = vmul.f32 %v4945_v26, %v3271_v56  ;;  %vm3720_vm5 = vweird.f32 %v4945_v26 }
 0x5f0   : > { %v3874_v52 = vmul.f32 %v4947_v34, %v3287_v12  ;;  %4948 = vrsqrt.f32 %v9194_v17  ;;  %vm3880_vm6 = vweird.f32 %v4947_v34  ;;  %vm3721_vm8 = vmor %vm3719_vm7, %vm3720_vm5  ;;  %vm3889_vm13 = vweird.f32 %v9194_v17 }
 0x5f1   : > { %v3715_v62 = vmul.f32 %v4945_v26, %v3714_v47  ;;  %v4401_v3 = vpop.f32.mrf.mxu3  ;;  %vm3881_vm11 = vmor %vm3879_vm9, %vm3880_vm6 }
 0x5f2   : > { %v3875_v25 = vmul.f32 %v4947_v34, %v3874_v52  ;;  %v4402_v4 = vadd.f32 %v4401_v3, %v8120_v39 }
 0x5f3   : > { %v3716_v44 = vmul.f32 0.5, %v3715_v62  ;;  %v3155_v46 = vpop.xlane.xlu1 %3154  ;;  %v3110_v57 = vpop.xlane.xlu0 %3109 }
 0x5f4   : > { %v3876_v23 = vmul.f32 0.5, %v3875_v25  ;;  %4490 = vst.msk [vmem:[%s8130_s21 + $0x180] sm:$0xff] %vm4441_vm10, %v4402_v4  ;;  %v3225_v33 = vmul.f32 %v3155_v46, %v5233_v63  ;;  %v3210_v40 = vmul.f32 %v3110_v57, %v5233_v63 }
 0x5f5   : > { %v3717_v58 = vsub.f32 1.5, %v3716_v44 }
 0x5f6   : > { %v4949_v14 = vpop.eup %4948  ;;  %v3877_v53 = vsub.f32 1.5, %v3876_v23  ;;  %v9208_v15 = vadd.f32 1e-05, %v3225_v33  ;;  %v9210_v22 = vadd.f32 1e-05, %v3210_v40 }
 0x5f7   : > { %v3718_v37 = vmul.f32 %v4945_v26, %v3717_v58  ;;  %v3884_v27 = vmul.f32 %v4949_v14, %v9194_v17  ;;  %vm3890_vm12 = vweird.f32 %v4949_v14 }
 0x5f8   : > { %v3878_v61 = vmul.f32 %v4947_v34, %v3877_v53  ;;  %4950 = vrsqrt.f32 %v9208_v15  ;;  %vm3891_vm14 = vmor %vm3889_vm13, %vm3890_vm12  ;;  %vm3749_vm0 = vweird.f32 %v9210_v22  ;;  %vm3899_vm6 = vweird.f32 %v9208_v15 }
 0x5f9   : > { %v3722_v41 = vsel %vm3721_vm8, %v4945_v26, %v3718_v37  ;;  %v3885_v13 = vmul.f32 %v4949_v14, %v3884_v27  ;;  %4952 = vrsqrt.f32 %v9210_v22  ;;  %v4371_v21 = vpop.f32.mrf.mxu2  ;;  %v4403_v35 = vpop.f32.mrf.mxu3 }
 0x5fa   : > { %v3975_v1 = vmul.f32 %v3722_v41, %v8971_v16  ;;  %v3882_v38 = vsel %vm3881_vm11, %v4947_v34, %v3878_v61  ;;  %v4372_v24 = vadd.f32 %v4371_v21, %v8120_v39  ;;  %v4404_v28 = vadd.f32 %v4403_v35, %v8120_v39  ;;  %v3107_v50 = vpop.xlane.xlu2 %3106 }
 0x5fb   : > { %v3886_v55 = vmul.f32 0.5, %v3885_v13  ;;  %v3209_v45 = vmul.f32 %v3107_v50, %v5233_v63  ;;  %v3991_v42 = vmul.f32 %v3882_v38, %v8965_v30 }
 0x5fc   : > { %4478 = vst.msk [vmem:[%s8130_s21 + $0x120] sm:$0xff] %vm4441_vm10, %v4372_v24  ;;  %v4040_v29 = vmul.f32 %v7458_v6, %v3975_v1 }
 0x5fd   : > { %v3887_v18 = vsub.f32 1.5, %v3886_v55  ;;  %4491 = vst.msk [vmem:[%s8130_s21 + $0x188] sm:$0xff] %vm4441_vm10, %v4404_v28  ;;  %v3273_v8 = vadd.f32 1e-05, %v3209_v45  ;;  %v4056_v47 = vmul.f32 %v7458_v6, %v3991_v42 }
 0x5fe   : > { %v9227_v16 = vpop.eup %4950  ;;  %v4105_v56 = vadd.f32 %v7487_v31, %v4040_v29 }
 0x5ff   : > { %v4953_v12 = vpop.eup %4952  ;;  %v3888_v36 = vmul.f32 %v4949_v14, %v3887_v18  ;;  %v3894_v32 = vmul.f32 %v9227_v16, %v9208_v15  ;;  %4954 = vrsqrt.f32 %v3273_v8  ;;  %vm3900_vm3 = vweird.f32 %v9227_v16 }
 0x600   : > { %v3744_v30 = vmul.f32 %v4953_v12, %v9210_v22  ;;  %v4148_v34 = vpack.c.bf16 %v4106_v51, %v4105_v56  ;;  %vm3750_vm15 = vweird.f32 %v4953_v12  ;;  %vm3739_vm5 = vweird.f32 %v3273_v8  ;;  %vm3901_vm8 = vmor %vm3899_vm6, %vm3900_vm3 }
 0x601   : > { %v3892_v59 = vsel %vm3891_vm14, %v4949_v14, %v3888_v36  ;;  %v4373_v26 = vpop.f32.mrf.mxu2  ;;  %v3895_v52 = vmul.f32 %v9227_v16, %v3894_v32  ;;  %vm3751_vm2 = vmor %vm3749_vm0, %vm3750_vm15 }
 0x602   : > { %v3992_v20 = vmul.f32 %v3892_v59, %v8997_v10  ;;  %v3745_v17 = vmul.f32 %v4953_v12, %v3744_v30  ;;  %v4374_v62 = vadd.f32 %v4373_v26, %v8120_v39  ;;  %4676 = vmatmul.msk.bf16.gmra.mxu2 %vm665_vm1, %v4148_v34  ;;  %v3158_v3 = vpop.xlane.xlu2 %3157  ;;  %v4406_v4 = vpop.f32.mrf.mxu3  ;;  %v4121_v10 = vadd.f32 %v7487_v31, %v4056_v47 }
 0x603   : > { %v3226_v19 = vmul.f32 %v3158_v3, %v5233_v63  ;;  %v4407_v46 = vadd.f32 %v4406_v4, %v8120_v39  ;;  %v3896_v11 = vmul.f32 0.5, %v3895_v52 }
 0x604   : > { %v3746_v25 = vmul.f32 0.5, %v3745_v17  ;;  %4479 = vst.msk [vmem:[%s8130_s21 + $0x128] sm:$0xff] %vm4441_vm10, %v4374_v62  ;;  %v4057_v44 = vmul.f32 %v7458_v6, %v3992_v20 }
 0x605   : > { %v4955_v57 = vpop.eup %4954  ;;  %v3290_v33 = vadd.f32 1e-05, %v3226_v19  ;;  %4492 = vst.msk [vmem:[%s8130_s21 + $0x190] sm:$0xff] %vm4441_vm10, %v4407_v46  ;;  %v3897_v37 = vsub.f32 1.5, %v3896_v11 }
 0x606   : > { %v3747_v23 = vsub.f32 1.5, %v3746_v25  ;;  %v4122_v40 = vadd.f32 %v7487_v31, %v4057_v44  ;;  %v3734_v58 = vmul.f32 %v4955_v57, %v3273_v8  ;;  %vm3740_vm4 = vweird.f32 %v4955_v57 }
 0x607   : > { %4956 = vrsqrt.f32 %v3290_v33  ;;  %v3898_v22 = vmul.f32 %v9227_v16, %v3897_v37  ;;  %vm3741_vm7 = vmor %vm3739_vm5, %vm3740_vm4  ;;  %vm3909_vm11 = vweird.f32 %v3290_v33 }
 0x608   : > { %v3748_v14 = vmul.f32 %v4953_v12, %v3747_v23  ;;  %v4156_v53 = vpack.c.bf16 %v4122_v40, %v4121_v10  ;;  %v3735_v5 = vmul.f32 %v4955_v57, %v3734_v58 }
 0x609   : > { %v3902_v56 = vsel %vm3901_vm8, %v9227_v16, %v3898_v22 }
 0x60a   : > { %4684 = vmatmul.msk.bf16.gmra.mxu3 %vm665_vm1, %v4156_v53  ;;  %v3752_v27 = vsel %vm3751_vm2, %v4953_v12, %v3748_v14  ;;  %v3736_v61 = vmul.f32 0.5, %v3735_v5  ;;  %v4408_v41 = vpop.f32.mrf.mxu3  ;;  %v3116_v35 = vpop.xlane.xlu1 %3115  ;;  %v3993_v51 = vmul.f32 %v3902_v56, %v9031_v7 }
 0x60b   : > { %v4409_v21 = vadd.f32 %v4408_v41, %v8120_v39  ;;  %v3978_v24 = vmul.f32 %v3752_v27, %v9027_v2  ;;  %v3212_v28 = vmul.f32 %v3116_v35, %v5233_v63 }
 0x60c   : > { %v3737_v13 = vsub.f32 1.5, %v3736_v61  ;;  %v3113_v1 = vpop.xlane.xlu0 %3112  ;;  %v4058_v10 = vmul.f32 %v7458_v6, %v3993_v51 }
 0x60d   : > { %v4957_v38 = vpop.eup %4956  ;;  %v3211_v55 = vmul.f32 %v3113_v1, %v5233_v63  ;;  %4493 = vst.msk [vmem:[%s8130_s21 + $0x198] sm:$0xff] %vm4441_vm10, %v4409_v21  ;;  %v9260_v45 = vadd.f32 1e-05, %v3212_v28  ;;  %v4043_v15 = vmul.f32 %v7458_v6, %v3978_v24 }
 0x60e   : > { %v3738_v50 = vmul.f32 %v4955_v57, %v3737_v13  ;;  %v3904_v9 = vmul.f32 %v4957_v38, %v3290_v33  ;;  %vm3910_vm9 = vweird.f32 %v4957_v38  ;;  %v4123_v14 = vadd.f32 %v7487_v31, %v4058_v10 }
 0x60f   : > { %v9262_v29 = vadd.f32 1e-05, %v3211_v55  ;;  %4958 = vrsqrt.f32 %v9260_v45  ;;  %v4108_v47 = vadd.f32 %v7487_v31, %v4043_v15  ;;  %vm3911_vm12 = vmor %vm3909_vm11, %vm3910_vm9  ;;  %vm3769_vm15 = vweird.f32 %v9260_v45 }
 0x610   : > { %v3742_v2 = vsel %vm3741_vm7, %v4955_v57, %v3738_v50  ;;  %v3905_v42 = vmul.f32 %v4957_v38, %v3904_v9 }
 0x611   : > { %v4376_v18 = vpop.f32.mrf.mxu2  ;;  %v3977_v8 = vmul.f32 %v3742_v2, %v9064_v43  ;;  %4960 = vrsqrt.f32 %v9262_v29  ;;  %vm3759_vm2 = vweird.f32 %v9262_v29 }
 0x612   : > { %v3906_v12 = vmul.f32 0.5, %v3905_v42  ;;  %v4377_v36 = vadd.f32 %v4376_v18, %v8120_v39 }
 0x613   : > { %v4042_v32 = vmul.f32 %v7458_v6, %v3977_v8 }
 0x614   : > { %v3907_v30 = vsub.f32 1.5, %v3906_v12  ;;  %4480 = vst.msk [vmem:[%s8130_s21 + $0x130] sm:$0xff] %vm4441_vm10, %v4377_v36  ;;  %v3164_v59 = vpop.xlane.xlu0 %3163 }
 0x615   : > { %v3161_v16 = vpop.xlane.xlu2 %3160  ;;  %v3228_v26 = vmul.f32 %v3164_v59, %v5233_v63  ;;  %v4107_v34 = vadd.f32 %v7487_v31, %v4042_v32  ;;  %v4959_v52 = vpop.eup %4958 }
 0x616   : > { %v3227_v43 = vmul.f32 %v3161_v16, %v5233_v63  ;;  %v3908_v20 = vmul.f32 %v4957_v38, %v3907_v30  ;;  %v3764_v4 = vmul.f32 %v4959_v52, %v9260_v45  ;;  %vm3770_vm13 = vweird.f32 %v4959_v52 }
 0x617   : > { %v9282_v7 = vadd.f32 1e-05, %v3228_v26  ;;  %v4149_v62 = vpack.c.bf16 %v4108_v47, %v4107_v34  ;;  %v4961_v3 = vpop.eup %4960  ;;  %vm3771_vm0 = vmor %vm3769_vm15, %vm3770_vm13 }
 0x618   : > { %v9280_v17 = vadd.f32 1e-05, %v3227_v43  ;;  %v3912_v25 = vsel %vm3911_vm12, %v4957_v38, %v3908_v20  ;;  %v3754_v46 = vmul.f32 %v4961_v3, %v9262_v29  ;;  %v3765_v57 = vmul.f32 %v4959_v52, %v3764_v4 }
 0x619   : > { %v4378_v19 = vpop.f32.mrf.mxu2  ;;  %v4411_v63 = vpop.f32.mrf.mxu3  ;;  %v3994_v44 = vmul.f32 %v3912_v25, %v9098_v48  ;;  %4677 = vmatmul.msk.bf16.gmra.mxu2 %vm665_vm1, %v4149_v62  ;;  %vm3760_vm14 = vweird.f32 %v4961_v3  ;;  %vm3929_vm8 = vweird.f32 %v9282_v7 }
 0x61a   : > { %4962 = vrsqrt.f32 %v9280_v17  ;;  %v3755_v11 = vmul.f32 %v4961_v3, %v3754_v46  ;;  %v4379_v23 = vadd.f32 %v4378_v19, %v8120_v39  ;;  %v4412_v33 = vadd.f32 %v4411_v63, %v8120_v39  ;;  %vm3761_vm3 = vmor %vm3759_vm2, %vm3760_vm14 }
 0x61b   : > { %4964 = vrsqrt.f32 %v9282_v7  ;;  %v4059_v40 = vmul.f32 %v7458_v6, %v3994_v44  ;;  %v3766_v48 = vmul.f32 0.5, %v3765_v57  ;;  %vm3919_vm6 = vweird.f32 %v9280_v17 }
 0x61c   : > { %v3756_v58 = vmul.f32 0.5, %v3755_v11  ;;  %4481 = vst.msk [vmem:[%s8130_s21 + $0x138] sm:$0xff] %vm4441_vm10, %v4379_v23 }
 0x61d   : > { %v4124_v53 = vadd.f32 %v7487_v31, %v4059_v40  ;;  %v3767_v5 = vsub.f32 1.5, %v3766_v48  ;;  %4494 = vst.msk [vmem:[%s8130_s21 + $0x1a0] sm:$0xff] %vm4441_vm10, %v4412_v33 }
 0x61e   : > { %v3757_v27 = vsub.f32 1.5, %v3756_v58 }
 0x61f   : > { %v4157_v61 = vpack.c.bf16 %v4124_v53, %v4123_v14  ;;  %v3768_v13 = vmul.f32 %v4959_v52, %v3767_v5 }
 0x620   : > { %v4963_v37 = vpop.eup %4962  ;;  %v3758_v1 = vmul.f32 %v4961_v3, %v3757_v27 }
 0x621   : > { %v4965_v41 = vpop.eup %4964  ;;  %v3914_v21 = vmul.f32 %v4963_v37, %v9280_v17  ;;  %v4413_v35 = vpop.f32.mrf.mxu3  ;;  %4685 = vmatmul.msk.bf16.gmra.mxu3 %vm665_vm1, %v4157_v61  ;;  %v3772_v24 = vsel %vm3771_vm0, %v4959_v52, %v3768_v13  ;;  %vm3920_vm4 = vweird.f32 %v4963_v37 }
 0x622   : > { %v3924_v38 = vmul.f32 %v4965_v41, %v9282_v7  ;;  %v4414_v22 = vadd.f32 %v4413_v35, %v8120_v39  ;;  %v3980_v55 = vmul.f32 %v3772_v24, %v9124_v60  ;;  %v3762_v50 = vsel %vm3761_vm3, %v4961_v3, %v3758_v1  ;;  %vm3921_vm7 = vmor %vm3919_vm6, %vm3920_vm4 }
 0x623   : > { %v3915_v28 = vmul.f32 %v4963_v37, %v3914_v21  ;;  %v3979_v45 = vmul.f32 %v3762_v50, %v9130_v0  ;;  %vm3930_vm5 = vweird.f32 %v4965_v41 }
 0x624   : > { %v3925_v9 = vmul.f32 %v4965_v41, %v3924_v38  ;;  %4495 = vst.msk [vmem:[%s8130_s21 + $0x1a8] sm:$0xff] %vm4441_vm10, %v4414_v22  ;;  %v4045_v29 = vmul.f32 %v7458_v6, %v3980_v55  ;;  %vm3931_vm9 = vmor %vm3929_vm8, %vm3930_vm5 }
 0x625   : > { %v3916_v2 = vmul.f32 0.5, %v3915_v28  ;;  %v4044_v56 = vmul.f32 %v7458_v6, %v3979_v45 }
 0x626   : > { %v3926_v42 = vmul.f32 0.5, %v3925_v9  ;;  %v4110_v15 = vadd.f32 %v7487_v31, %v4045_v29 }
 0x627   : > { %v3917_v18 = vsub.f32 1.5, %v3916_v2  ;;  %v4109_v12 = vadd.f32 %v7487_v31, %v4044_v56 }
 0x628   : > { %v3927_v8 = vsub.f32 1.5, %v3926_v42 }
 0x629   : > { %v3918_v60 = vmul.f32 %v4963_v37, %v3917_v18  ;;  %v4416_v0 = vpop.f32.mrf.mxu3  ;;  %v4150_v16 = vpack.c.bf16 %v4110_v15, %v4109_v12 }
 0x62a   : > { %v3928_v36 = vmul.f32 %v4965_v41, %v3927_v8  ;;  %v4417_v32 = vadd.f32 %v4416_v0, %v8120_v39 }
 0x62b   : > { %v3922_v51 = vsel %vm3921_vm7, %v4963_v37, %v3918_v60  ;;  %v4381_v30 = vpop.f32.mrf.mxu2  ;;  %4678 = vmatmul.msk.bf16.gmra.mxu2 %vm665_vm1, %v4150_v16 }
 0x62c   : > { %v3995_v59 = vmul.f32 %v3922_v51, %v9163_v49  ;;  %v3932_v43 = vsel %vm3931_vm9, %v4965_v41, %v3928_v36  ;;  %v4382_v26 = vadd.f32 %v4381_v30, %v8120_v39  ;;  %4496 = vst.msk [vmem:[%s8130_s21 + $0x1b0] sm:$0xff] %vm4441_vm10, %v4417_v32 }
 0x62d   : > { %v3996_v34 = vmul.f32 %v3932_v43, %v9154_v54 }
 0x62e   : > { %4482 = vst.msk [vmem:[%s8130_s21 + $0x140] sm:$0xff] %vm4441_vm10, %v4382_v26  ;;  %v4060_v47 = vmul.f32 %v7458_v6, %v3995_v59 }
 0x62f   : > { %v4061_v20 = vmul.f32 %v7458_v6, %v3996_v34 }
 0x630   : > { %v4125_v49 = vadd.f32 %v7487_v31, %v4060_v47 }
 0x631   : > { %v4418_v52 = vpop.f32.mrf.mxu3  ;;  %v4126_v17 = vadd.f32 %v7487_v31, %v4061_v20 }
 0x632   : > { %v4419_v7 = vadd.f32 %v4418_v52, %v8120_v39 }
 0x633   : > { %v4383_v62 = vpop.f32.mrf.mxu2  ;;  %v4158_v54 = vpack.c.bf16 %v4126_v17, %v4125_v49 }
 0x634   : > { %v4384_v3 = vadd.f32 %v4383_v62, %v8120_v39  ;;  %4497 = vst.msk [vmem:[%s8130_s21 + $0x1b8] sm:$0xff] %vm4441_vm10, %v4419_v7 }
 0x635   : > { %4686 = vmatmul.msk.bf16.gmra.mxu3 %vm665_vm1, %v4158_v54 }
 0x636   : > { %4483 = vst.msk [vmem:[%s8130_s21 + $0x148] sm:$0xff] %vm4441_vm10, %v4384_v3 }
 0x639   : > { %v4421_v6 = vpop.f32.mrf.mxu3 }
 0x63a   : > { %v4422_v25 = vadd.f32 %v4421_v6, %v8120_v39 }
 0x63c   : > { %4498 = vst.msk [vmem:[%s8130_s21 + $0x1c0] sm:$0xff] %vm4441_vm10, %v4422_v25 }
 0x641   : > { %v4423_v31 = vpop.f32.mrf.mxu3 }
 0x642   : > { %v4424_v4 = vadd.f32 %v4423_v31, %v8120_v39 }
 0x644   : > { %4499 = vst.msk [vmem:[%s8130_s21 + $0x1c8] sm:$0xff] %vm4441_vm10, %v4424_v4 }
 0x685   : > { %v4386_v19 = vpop.f32.mrf.mxu2 }
 0x686   : > { %v4387_v63 = vadd.f32 %v4386_v19, %v8120_v39 }
 0x688   : > { %4484 = vst.msk [vmem:[%s8130_s21 + $0x150] sm:$0xff] %vm4441_vm10, %v4387_v63 }
 0x68d   : > { %v4426_v44 = vpop.f32.mrf.mxu3  ;;  %v4388_v46 = vpop.f32.mrf.mxu2 }
 0x68e   : > { %v4427_v10 = vadd.f32 %v4426_v44, %v8120_v39  ;;  %v4389_v57 = vadd.f32 %v4388_v46, %v8120_v39 }
 0x690   : > { %4500 = vst.msk [vmem:[%s8130_s21 + $0x1d0] sm:$0xff] %vm4441_vm10, %v4427_v10 }
 0x691   : > { %4485 = vst.msk [vmem:[%s8130_s21 + $0x158] sm:$0xff] %vm4441_vm10, %v4389_v57 }
 0x695   : > { %v4428_v11 = vpop.f32.mrf.mxu3 }
 0x696   : > { %v4429_v23 = vadd.f32 %v4428_v11, %v8120_v39 }
 0x698   : > { %4501 = vst.msk [vmem:[%s8130_s21 + $0x1d8] sm:$0xff] %vm4441_vm10, %v4429_v23 }
 0x69c   : > { %v4391_v33 = vpop.f32.mrf.mxu2 }
 0x69d   : > { %v4392_v40 = vadd.f32 %v4391_v33, %v8120_v39 }
 0x69f   : > { %4486 = vst.msk [vmem:[%s8130_s21 + $0x160] sm:$0xff] %vm4441_vm10, %v4392_v40 }
 0x6a4   : > { %v4393_v48 = vpop.f32.mrf.mxu2  ;;  %v4431_v58 = vpop.f32.mrf.mxu3 }
 0x6a5   : > { %v4394_v14 = vadd.f32 %v4393_v48, %v8120_v39  ;;  %v4432_v53 = vadd.f32 %v4431_v58, %v8120_v39 }
 0x6a7   : > { %4487 = vst.msk [vmem:[%s8130_s21 + $0x168] sm:$0xff] %vm4441_vm10, %v4394_v14 }
 0x6a8   : > { %4502 = vst.msk [vmem:[%s8130_s21 + $0x1e0] sm:$0xff] %vm4441_vm10, %v4432_v53 }
 0x6ac   : > { %v4433_v5 = vpop.f32.mrf.mxu3 }
 0x6ad   : > { %v4434_v37 = vadd.f32 %v4433_v5, %v8120_v39 }
 0x6ae   : > { %v4396_v27 = vpop.f32.mrf.mxu2 }
 0x6af   : > { %4503 = vst.msk [vmem:[%s8130_s21 + $0x1e8] sm:$0xff] %vm4441_vm10, %v4434_v37  ;;  %v4397_v61 = vadd.f32 %v4396_v27, %v8120_v39 }
 0x6b1   : > { %4488 = vst.msk [vmem:[%s8130_s21 + $0x170] sm:$0xff] %vm4441_vm10, %v4397_v61 }
 0x6b6   : > { %v4398_v41 = vpop.f32.mrf.mxu2 }
 0x6b7   : > { %v4399_v21 = vadd.f32 %v4398_v41, %v8120_v39 }
 0x6b8   : > { %v4436_v13 = vpop.f32.mrf.mxu3 }
 0x6b9   : > { %v4437_v35 = vadd.f32 %v4436_v13, %v8120_v39  ;;  %4489 = vst.msk [vmem:[%s8130_s21 + $0x178] sm:$0xff] %vm4441_vm10, %v4399_v21 }
 0x6bb   : > { %4504 = vst.msk [vmem:[%s8130_s21 + $0x1f0] sm:$0xff] %vm4441_vm10, %v4437_v35 }
 0x6c0   : > { %v4438_v1 = vpop.f32.mrf.mxu3 }
 0x6c1   : > { %v4439_v38 = vadd.f32 %v4438_v1, %v8120_v39 }
 0x6c3   : > { %4505 = vst.msk [vmem:[%s8130_s21 + $0x1f8] sm:$0xff] %vm4441_vm10, %v4439_v38 }
 0x6c4 PF: > { %s15_s18 = sadd.s32 1, %s4975_s18  }
 0x6c5   : > { %p12_p4 = scmp.ge.s32.totalorder %s15_s18, 4  }
 0x6c7   :  { %14 = sbr.rel (!%p12_p4) target bundleno = 1 (0x1), region = 70 }

</bundles_post_ra>
